<compile_context>
chip_gen: v5e
topology: v5e:2x2
jax: 0.10.0
libtpu: 0.0.40
codegen_flags: <defaults>
</compile_context>

<pallas_src>
import numpy as np
import jax
import jax.numpy as jnp
from jax import lax
from jax.experimental import pallas as pl
from jax.experimental.pallas import tpu as pltpu

# ----------------------- config (what the JSON cfg would hold) ---------------
BPL = [3, 2, 1]                      # buckets per layer
N_LAYERS = len(BPL)
NB = sum(BPL)                        # total buckets = 6
G = 9.8
INITIAL_HEAD = 5.0                   # initial_head_in_buckets
HID = 32                             # fcnn_hidden_size
T = 8                                # length of precip_record
UNIT_PRECIP = 6.0
# precip_distribution == 'upstream'; do_predict_theta_with_fcnn == True

PAD = 128                            # lane padding for NB / NT / HID
MROWS = 16                           # basins (ensemble members) per state tile


def n_spigots_in_layer(il):
    return BPL[il + 1] if il < N_LAYERS - 1 else 1


MAXSP = max(n_spigots_in_layer(i) for i in range(N_LAYERS))

# flat (bucket, spigot) enumeration — identical order to the PyTorch theta
bucket_of, spigot_of, layer_of = [], [], []
for _il in range(N_LAYERS):
    _nsp = n_spigots_in_layer(_il)
    for _ib in range(BPL[_il]):
        _gb = sum(BPL[:_il]) + _ib
        for _isp in range(_nsp):
            bucket_of.append(_gb)
            spigot_of.append(_isp)
            layer_of.append(_il)
NT = len(bucket_of)                  # total spigots / theta size = 9
assert NB <= 32 and HID <= 32 and NT <= PAD

# Runs of identical lane-shift (t - bucket_of[t]) used for the roll-based
# gather (bucket -> flat spigot) and the two scatter-adds (flat spigot ->
# bucket outflow / bucket inflow).  Each run is a contiguous lane range.
SHIFT_RANGES = []                    # [shift, first_lane, last_lane]
for _t in range(NT):
    _s = _t - bucket_of[_t]
    if SHIFT_RANGES and SHIFT_RANGES[-1][0] == _s:
        SHIFT_RANGES[-1][2] = _t
    else:
        SHIFT_RANGES.append([_s, _t, _t])
SHIFT_RANGES = [tuple(r) for r in SHIFT_RANGES]

_HP = lax.Precision.HIGHEST          # reference only (matches torch f32)


def _sigmoid(x):
    return 1.0 / (1.0 + jnp.exp(-x))


# ------------------------------- Pallas kernel -------------------------------
def ncn_kernel(precip_ref, w1_ref, b1_ref, w2_ref, b2_ref, w3_ref, b3_ref,
               s0_ref, s1_ref, y_ref):
    f32, bf16 = jnp.float32, jnp.bfloat16
    n_steps = precip_ref.shape[0]

    # ---- loop-invariant setup (once per grid step) --------------------------
    lane = lax.broadcasted_iota(jnp.int32, (MROWS, PAD), 1)

    def band(lo, hi):                # 1.0 for lanes in [lo, hi), else 0.0
        return ((lane >= lo) & (lane < hi)).astype(f32)

    inmask = band(1, NB)             # buckets that receive upstream inflow
    thmask = band(0, NT)             # valid theta lanes (kills sigmoid(0)=0.5 pad)
    lastm = band(NT - BPL[-1], NT)   # flat spigots of the last layer
    gmasks = [band(lo, hi + 1) for (_s, lo, hi) in SHIFT_RANGES]

    w1 = w1_ref[...]                 # (PAD, PAD) bf16, K-packed [W_hi; W_hi; W_lo]
    w2 = w2_ref[...]
    w3 = w3_ref[...]
    b1 = jnp.broadcast_to(b1_ref[...], (MROWS, PAD))   # hoisted broadcasts
    b2 = jnp.broadcast_to(b2_ref[...], (MROWS, PAD))
    b3 = jnp.broadcast_to(b3_ref[...], (MROWS, PAD))
    s0 = jnp.broadcast_to(s0_ref[...], (MROWS, PAD))
    s1 = jnp.broadcast_to(s1_ref[...], (MROWS, PAD))

    def sigmoid_fast(x):             # one EUP tanh instead of exp + exact divide
        return 0.5 * (jnp.tanh(0.5 * x) + 1.0)

    def pack_k(x):
        # bf16_3x packed along K: lanes [0,32)=x_hi, [32,64)=x_lo, [64,96)=x_hi.
        # Relies on x being exactly zero in lanes >= 32 (true for H/H0 and for
        # every FCNN activation, whose padded columns/biases are zero).
        x_hi = x.astype(bf16).astype(f32)
        p = x + pltpu.roll(x - x_hi, 32, 1) + pltpu.roll(x, 64, 1)
        return p.astype(bf16)

    def fcnn_dot(x, w_pack, b):      # ONE MXU push per layer (was 3)
        return jnp.dot(pack_k(x), w_pack, preferred_element_type=f32) + b

    def gather_to_spigots(h_b):      # H_flat[t] = H[bucket_of[t]]  (exact)
        acc = jnp.zeros((MROWS, PAD), f32)
        for gm, (s, _lo, _hi) in zip(gmasks, SHIFT_RANGES):
            rolled = h_b if s == 0 else pltpu.roll(h_b, s, 1)
            acc = acc + rolled * gm
        return acc

    def scatter_outflow(flow):       # outflow[b] = sum_{bucket_of[t]=b} flow[t]
        acc = jnp.zeros((MROWS, PAD), f32)
        for gm, (s, _lo, _hi) in zip(gmasks, SHIFT_RANGES):
            m = flow * gm
            acc = acc + (m if s == 0 else pltpu.roll(m, PAD - s, 1))
        return acc

    def scatter_inflow(flow):        # inflow[b] = sum_{bucket_of[t]=b-1} flow[t]
        acc = jnp.zeros((MROWS, PAD), f32)
        for gm, (s, _lo, _hi) in zip(gmasks, SHIFT_RANGES):
            m = flow * gm
            sh = (1 - s) % PAD
            acc = acc + (m if sh == 0 else pltpu.roll(m, sh, 1))
        return acc

    H = INITIAL_HEAD * band(0, NB)               # initial heads, per basin row
    y_acc = jnp.zeros((MROWS, PAD), f32)         # step-t outflow lands in lane t

    # NOTE: correctness relies on padded lanes staying EXACTLY zero:
    # H (lanes >= NB), flow_out (lanes >= NT) and roll wrap-around lanes are
    # all killed by thmask / gmasks / inmask / zero s0,s1 padding.
    for t in range(n_steps):                     # n_steps is static -> unrolled
        # FCNN: theta = sigmoid(fc3(tanh(fc2(tanh(fc1(H / H0))))))
        x = H * (1.0 / INITIAL_HEAD)
        z1 = jnp.tanh(fcnn_dot(x, w1, b1))
        z2 = jnp.tanh(fcnn_dot(z1, w2, b2))
        theta = sigmoid_fast(fcnn_dot(z2, w3, b3)) * thmask

        # spigot outflow, flat over (bucket, spigot)
        H_flat = gather_to_spigots(H)
        h = jnp.maximum(0.0, H_flat - s0)
        flow_rate = theta * jnp.sqrt(2.0 * G * h)
        max_flow = h * s1
        scale = sigmoid_fast(max_flow - flow_rate)
        flow_out = flow_rate * scale * s1

        # network fluxes: two independent scatter trees (issue in parallel on
        # the XLU ports) + 'upstream' precip already placed at lane 0.
        outflow_b = scatter_outflow(flow_out)
        inflow_b = scatter_inflow(flow_out) * inmask + precip_ref[t]
        H = H + inflow_b - outflow_b

        # network outflow (last layer).  With BPL[-1]==1 it is a single lane,
        # so one XLU roll moves it to lane t — no cross-lane reduction.
        last_flow = flow_out * lastm
        if BPL[-1] == 1:
            y_acc = y_acc + pltpu.roll(last_flow, (t - (NT - 1)) % PAD, 1)
        else:
            y_t = jnp.sum(last_flow, axis=1, keepdims=True)
            y_acc = y_acc + y_t * (lane == t).astype(f32)

    y_ref[...] = y_acc                            # single lane-dense store


def ncn_forward_pallas(u, params):
    """u: (B, T) precip record per basin / ensemble member. Returns (B, T)."""
    (w1p, b1, w2p, b2, w3p, b3, s0f, s1f) = params
    u = jnp.asarray(u, jnp.float32)
    B, Tn = u.shape
    assert Tn <= PAD, "time steps live on the lane axis of the output tile"

    nchunks = pl.cdiv(B, MROWS)
    Bp = nchunks * MROWS
    up = jnp.zeros((Bp, Tn), jnp.float32).at[:B].set(u)

    # 'upstream' precip distribution: the step-t precip of each basin is placed
    # at lane 0 (bucket 0) of its sublane row; every other lane stays zero.
    precip_in = jnp.zeros((nchunks, Tn, MROWS, PAD), jnp.float32)
    precip_in = precip_in.at[:, :, :, 0].set(
        up.reshape(nchunks, MROWS, Tn).transpose(0, 2, 1))

    wspec = pl.BlockSpec((PAD, PAD), lambda c: (0, 0))      # shared weights
    rspec = pl.BlockSpec((1, PAD), lambda c: (0, 0))        # shared rows

    out = pl.pallas_call(
        ncn_kernel,
        out_shape=jax.ShapeDtypeStruct((nchunks, MROWS, PAD), jnp.float32),
        grid=(nchunks,),
        in_specs=[
            pl.BlockSpec((None, Tn, MROWS, PAD), lambda c: (c, 0, 0, 0)),
            wspec, rspec, wspec, rspec, wspec, rspec, rspec, rspec,
        ],
        out_specs=pl.BlockSpec((None, MROWS, PAD), lambda c: (c, 0, 0)),
        compiler_params=pltpu.CompilerParams(
            dimension_semantics=("parallel",)),   # both TensorCores on v7x
    )(precip_in, w1p, b1, w2p, b2, w3p, b3, s0f, s1f)
    return out.reshape(Bp, PAD)[:B, :Tn]


# ----------------------- deterministic parameter setup -----------------------
def build_params(key):
    keys = jax.random.split(key, 4)

    # spigot tensors per layer, like torch.rand((n_buckets, n_spigots, 2))
    s0_flat = np.zeros(NT, np.float32)
    s1_flat = np.zeros(NT, np.float32)
    S_pad = np.zeros((NB, MAXSP, 2), np.float32)
    theta_map = -np.ones((NB, MAXSP), np.int32)
    layer_keys = jax.random.split(keys[0], N_LAYERS)
    t_idx = 0
    for il in range(N_LAYERS):
        nsp = n_spigots_in_layer(il)
        S_layer = np.asarray(
            jax.random.uniform(layer_keys[il], (BPL[il], nsp, 2), jnp.float32))
        for ib in range(BPL[il]):
            gb = sum(BPL[:il]) + ib
            for isp in range(nsp):
                s0_flat[t_idx] = S_layer[ib, isp, 0]
                s1_flat[t_idx] = S_layer[ib, isp, 1]
                S_pad[gb, isp, :] = S_layer[ib, isp, :]
                theta_map[gb, isp] = t_idx
                t_idx += 1

    # FCNN weights, nn.Linear-style uniform(-1/sqrt(fan_in), 1/sqrt(fan_in)),
    # stored as (in, out)
    def linear(k, fan_in, fan_out):
        k1, k2 = jax.random.split(k)
        bound = 1.0 / np.sqrt(fan_in)
        W = np.asarray(jax.random.uniform(k1, (fan_in, fan_out), jnp.float32,
                                          -bound, bound))
        b = np.asarray(jax.random.uniform(k2, (fan_out,), jnp.float32,
                                          -bound, bound))
        return W, b

    W1u, b1u = linear(keys[1], NB, HID)
    W2u, b2u = linear(keys[2], HID, HID)
    W3u, b3u = linear(keys[3], HID, NT)

    def pack_weight(Wu):
        # Host-side bf16_3x K-packing: rows [0,32)=W_hi, [32,64)=W_hi,
        # [64,96)=W_lo; matches the in-kernel LHS packing [x_hi | x_lo | x_hi].
        k_in, k_out = Wu.shape
        assert k_in <= 32 and k_out <= PAD
        Whi = np.asarray(jnp.asarray(Wu).astype(jnp.bfloat16).astype(jnp.float32))
        Wlo = (Wu - Whi).astype(np.float32)
        P = np.zeros((PAD, PAD), np.float32)
        P[0:k_in, 0:k_out] = Whi
        P[32:32 + k_in, 0:k_out] = Whi
        P[64:64 + k_in, 0:k_out] = Wlo
        return jnp.asarray(P).astype(jnp.bfloat16)

    def pad_row(v):
        row = np.zeros((1, PAD), np.float32)
        row[0, :v.shape[0]] = v
        return jnp.asarray(row)

    params = (pack_weight(W1u), pad_row(b1u),
              pack_weight(W2u), pad_row(b2u),
              pack_weight(W3u), pad_row(b3u),
              pad_row(s0_flat), pad_row(s1_flat))
    H0v = np.full(NB, INITIAL_HEAD, np.float32)
    ref = (H0v, S_pad, theta_map, W1u, b1u, W2u, b2u, W3u, b3u)
    return params, ref


# --------------------------- pure-JAX reference -------------------------------
def ncn_forward_reference(u, H0v, S_pad, theta_map, W1u, b1u, W2u, b2u, W3u, b3u):
    H = jnp.asarray(H0v)
    S_pad = jnp.asarray(S_pad)
    tm = jnp.asarray(theta_map)
    last_start = sum(BPL[:-1])
    ys = []
    for i in range(u.shape[0]):
        precip = jnp.sum(u[i])
        x = H / INITIAL_HEAD
        z1 = jnp.tanh(jnp.dot(x, W1u, precision=_HP) + b1u)
        z2 = jnp.tanh(jnp.dot(z1, W2u, precision=_HP) + b2u)
        theta = _sigmoid(jnp.dot(z2, W3u, precision=_HP) + b3u)
        theta_sp = jnp.where(tm >= 0, theta[jnp.clip(tm, 0, NT - 1)], 0.0)
        h = jnp.maximum(0.0, H[:, None] - S_pad[:, :, 0])
        max_flow = h * S_pad[:, :, 1]
        flow_rate = theta_sp * jnp.sqrt(2.0 * G * h)
        scale = _sigmoid(max_flow - flow_rate)
        s_q = flow_rate * scale * S_pad[:, :, 1]
        outflows = jnp.sum(s_q, axis=1)
        inflows = jnp.zeros(NB, jnp.float32).at[1:].set(jnp.sum(s_q[:-1], axis=1))
        inflows = inflows.at[0].add(precip)          # 'upstream' distribution
        H = H + inflows - outflows
        ys.append(jnp.sum(s_q[last_start:, :1]))     # network_outflow
    # TODO(synk): 'even' precip_distribution branch not implemented (config uses 'upstream').
    return jnp.stack(ys)


# ------------------------------------ main ------------------------------------
if __name__ == "__main__":
    key = jax.random.PRNGKey(0)
    kp, ku = jax.random.split(key)
    params, ref = build_params(kp)

    # Batch of independent basins / ensemble members (each follows the original
    # module's forward exactly); 16 per sublane tile, 2 grid chunks.
    B = 32
    u = UNIT_PRECIP * jax.random.uniform(ku, (B, T), jnp.float32)

    y = ncn_forward_pallas(u, params)
    y = jax.block_until_ready(y)

    y_ref = jax.jit(jax.vmap(lambda uu: ncn_forward_reference(uu, *ref)))(u)
    y_ref = jax.block_until_ready(y_ref)

    assert y.shape == (B, T)
    assert jnp.allclose(y, y_ref, rtol=2e-3, atol=2e-3), (y, y_ref)
    print("KERNEL_OK")
</pallas_src>

<mosaic_0001>
module attributes {stable_mosaic.version = 11 : i64} {
  func.func @ncn_kernel(%arg0: i32, %arg1: memref<1x8x16x128xf32, #tpu.memory_space<vmem>>, %arg2: memref<128x128xbf16, #tpu.memory_space<vmem>>, %arg3: memref<1x128xf32, #tpu.memory_space<vmem>>, %arg4: memref<128x128xbf16, #tpu.memory_space<vmem>>, %arg5: memref<1x128xf32, #tpu.memory_space<vmem>>, %arg6: memref<128x128xbf16, #tpu.memory_space<vmem>>, %arg7: memref<1x128xf32, #tpu.memory_space<vmem>>, %arg8: memref<1x128xf32, #tpu.memory_space<vmem>>, %arg9: memref<1x128xf32, #tpu.memory_space<vmem>>, %arg10: memref<1x16x128xf32, #tpu.memory_space<vmem>>) attributes {dimension_semantics = [#tpu.dimension_semantics<parallel>], iteration_bounds = array<i64: 2>, scalar_prefetch = 0 : i64, scratch_operands = 0 : i64, tpu.core_type = #tpu.core_type<tc>, window_params = [{transform_indices = @transform_0, window_bounds = array<i64: 1, 8, 16, 128>}, {pipeline_mode = #tpu.pipeline_mode<synchronous>, transform_indices = @transform_1, window_bounds = array<i64: 128, 128>}, {pipeline_mode = #tpu.pipeline_mode<synchronous>, transform_indices = @transform_2, window_bounds = array<i64: 1, 128>}, {pipeline_mode = #tpu.pipeline_mode<synchronous>, transform_indices = @transform_3, window_bounds = array<i64: 128, 128>}, {pipeline_mode = #tpu.pipeline_mode<synchronous>, transform_indices = @transform_4, window_bounds = array<i64: 1, 128>}, {pipeline_mode = #tpu.pipeline_mode<synchronous>, transform_indices = @transform_5, window_bounds = array<i64: 128, 128>}, {pipeline_mode = #tpu.pipeline_mode<synchronous>, transform_indices = @transform_6, window_bounds = array<i64: 1, 128>}, {pipeline_mode = #tpu.pipeline_mode<synchronous>, transform_indices = @transform_7, window_bounds = array<i64: 1, 128>}, {pipeline_mode = #tpu.pipeline_mode<synchronous>, transform_indices = @transform_8, window_bounds = array<i64: 1, 128>}, {transform_indices = @transform_9, window_bounds = array<i64: 1, 16, 128>}]} {
    %0 = tpu.iota {dimensions = array<i32: 1>} : vector<16x128xi32>
    %c1_i32 = arith.constant 1 : i32
    %1 = vector.broadcast %c1_i32 : i32 to vector<16x128xi32>
    %2 = arith.cmpi sge, %0, %1 : vector<16x128xi32>
    %c6_i32 = arith.constant 6 : i32
    %3 = vector.broadcast %c6_i32 : i32 to vector<16x128xi32>
    %4 = arith.cmpi slt, %0, %3 : vector<16x128xi32>
    %5 = arith.andi %2, %4 : vector<16x128xi1>
    %6 = arith.extui %5 : vector<16x128xi1> to vector<16x128xi32>
    %7 = arith.sitofp %6 : vector<16x128xi32> to vector<16x128xf32>
    %c0_i32 = arith.constant 0 : i32
    %8 = vector.broadcast %c0_i32 : i32 to vector<16x128xi32>
    %9 = arith.cmpi sge, %0, %8 : vector<16x128xi32>
    %c9_i32 = arith.constant 9 : i32
    %10 = vector.broadcast %c9_i32 : i32 to vector<16x128xi32>
    %11 = arith.cmpi slt, %0, %10 : vector<16x128xi32>
    %12 = arith.andi %9, %11 : vector<16x128xi1>
    %13 = arith.extui %12 : vector<16x128xi1> to vector<16x128xi32>
    %14 = arith.sitofp %13 : vector<16x128xi32> to vector<16x128xf32>
    %c8_i32 = arith.constant 8 : i32
    %15 = vector.broadcast %c8_i32 : i32 to vector<16x128xi32>
    %16 = arith.cmpi sge, %0, %15 : vector<16x128xi32>
    %c9_i32_0 = arith.constant 9 : i32
    %17 = vector.broadcast %c9_i32_0 : i32 to vector<16x128xi32>
    %18 = arith.cmpi slt, %0, %17 : vector<16x128xi32>
    %19 = arith.andi %16, %18 : vector<16x128xi1>
    %20 = arith.extui %19 : vector<16x128xi1> to vector<16x128xi32>
    %21 = arith.sitofp %20 : vector<16x128xi32> to vector<16x128xf32>
    %c0_i32_1 = arith.constant 0 : i32
    %22 = vector.broadcast %c0_i32_1 : i32 to vector<16x128xi32>
    %23 = arith.cmpi sge, %0, %22 : vector<16x128xi32>
    %c1_i32_2 = arith.constant 1 : i32
    %24 = vector.broadcast %c1_i32_2 : i32 to vector<16x128xi32>
    %25 = arith.cmpi slt, %0, %24 : vector<16x128xi32>
    %26 = arith.andi %23, %25 : vector<16x128xi1>
    %27 = arith.extui %26 : vector<16x128xi1> to vector<16x128xi32>
    %28 = arith.sitofp %27 : vector<16x128xi32> to vector<16x128xf32>
    %c1_i32_3 = arith.constant 1 : i32
    %29 = vector.broadcast %c1_i32_3 : i32 to vector<16x128xi32>
    %30 = arith.cmpi sge, %0, %29 : vector<16x128xi32>
    %c3_i32 = arith.constant 3 : i32
    %31 = vector.broadcast %c3_i32 : i32 to vector<16x128xi32>
    %32 = arith.cmpi slt, %0, %31 : vector<16x128xi32>
    %33 = arith.andi %30, %32 : vector<16x128xi1>
    %34 = arith.extui %33 : vector<16x128xi1> to vector<16x128xi32>
    %35 = arith.sitofp %34 : vector<16x128xi32> to vector<16x128xf32>
    %c3_i32_4 = arith.constant 3 : i32
    %36 = vector.broadcast %c3_i32_4 : i32 to vector<16x128xi32>
    %37 = arith.cmpi sge, %0, %36 : vector<16x128xi32>
    %c5_i32 = arith.constant 5 : i32
    %38 = vector.broadcast %c5_i32 : i32 to vector<16x128xi32>
    %39 = arith.cmpi slt, %0, %38 : vector<16x128xi32>
    %40 = arith.andi %37, %39 : vector<16x128xi1>
    %41 = arith.extui %40 : vector<16x128xi1> to vector<16x128xi32>
    %42 = arith.sitofp %41 : vector<16x128xi32> to vector<16x128xf32>
    %c5_i32_5 = arith.constant 5 : i32
    %43 = vector.broadcast %c5_i32_5 : i32 to vector<16x128xi32>
    %44 = arith.cmpi sge, %0, %43 : vector<16x128xi32>
    %c9_i32_6 = arith.constant 9 : i32
    %45 = vector.broadcast %c9_i32_6 : i32 to vector<16x128xi32>
    %46 = arith.cmpi slt, %0, %45 : vector<16x128xi32>
    %47 = arith.andi %44, %46 : vector<16x128xi1>
    %48 = arith.extui %47 : vector<16x128xi1> to vector<16x128xi32>
    %49 = arith.sitofp %48 : vector<16x128xi32> to vector<16x128xf32>
    %c0 = arith.constant 0 : index
    %c0_7 = arith.constant 0 : index
    %50 = vector.load %arg2[%c0, %c0_7] : memref<128x128xbf16, #tpu.memory_space<vmem>>, vector<128x128xbf16>
    %c0_8 = arith.constant 0 : index
    %c0_9 = arith.constant 0 : index
    %51 = vector.load %arg4[%c0_8, %c0_9] : memref<128x128xbf16, #tpu.memory_space<vmem>>, vector<128x128xbf16>
    %c0_10 = arith.constant 0 : index
    %c0_11 = arith.constant 0 : index
    %52 = vector.load %arg6[%c0_10, %c0_11] : memref<128x128xbf16, #tpu.memory_space<vmem>>, vector<128x128xbf16>
    %c0_12 = arith.constant 0 : index
    %c0_13 = arith.constant 0 : index
    %53 = vector.load %arg3[%c0_12, %c0_13] : memref<1x128xf32, #tpu.memory_space<vmem>>, vector<1x128xf32>
    %54 = vector.shape_cast %53 : vector<1x128xf32> to vector<1x128xf32>
    %55 = vector.broadcast %54 : vector<1x128xf32> to vector<16x128xf32>
    %c0_14 = arith.constant 0 : index
    %c0_15 = arith.constant 0 : index
    %56 = vector.load %arg5[%c0_14, %c0_15] : memref<1x128xf32, #tpu.memory_space<vmem>>, vector<1x128xf32>
    %57 = vector.shape_cast %56 : vector<1x128xf32> to vector<1x128xf32>
    %58 = vector.broadcast %57 : vector<1x128xf32> to vector<16x128xf32>
    %c0_16 = arith.constant 0 : index
    %c0_17 = arith.constant 0 : index
    %59 = vector.load %arg7[%c0_16, %c0_17] : memref<1x128xf32, #tpu.memory_space<vmem>>, vector<1x128xf32>
    %60 = vector.shape_cast %59 : vector<1x128xf32> to vector<1x128xf32>
    %61 = vector.broadcast %60 : vector<1x128xf32> to vector<16x128xf32>
    %c0_18 = arith.constant 0 : index
    %c0_19 = arith.constant 0 : index
    %62 = vector.load %arg8[%c0_18, %c0_19] : memref<1x128xf32, #tpu.memory_space<vmem>>, vector<1x128xf32>
    %63 = vector.shape_cast %62 : vector<1x128xf32> to vector<1x128xf32>
    %64 = vector.broadcast %63 : vector<1x128xf32> to vector<16x128xf32>
    %c0_20 = arith.constant 0 : index
    %c0_21 = arith.constant 0 : index
    %65 = vector.load %arg9[%c0_20, %c0_21] : memref<1x128xf32, #tpu.memory_space<vmem>>, vector<1x128xf32>
    %66 = vector.shape_cast %65 : vector<1x128xf32> to vector<1x128xf32>
    %67 = vector.broadcast %66 : vector<1x128xf32> to vector<16x128xf32>
    %c0_i32_22 = arith.constant 0 : i32
    %68 = vector.broadcast %c0_i32_22 : i32 to vector<16x128xi32>
    %69 = arith.cmpi sge, %0, %68 : vector<16x128xi32>
    %c6_i32_23 = arith.constant 6 : i32
    %70 = vector.broadcast %c6_i32_23 : i32 to vector<16x128xi32>
    %71 = arith.cmpi slt, %0, %70 : vector<16x128xi32>
    %72 = arith.andi %69, %71 : vector<16x128xi1>
    %73 = arith.extui %72 : vector<16x128xi1> to vector<16x128xi32>
    %74 = arith.sitofp %73 : vector<16x128xi32> to vector<16x128xf32>
    %cst = arith.constant 5.000000e+00 : f32
    %75 = vector.broadcast %cst : f32 to vector<16x128xf32>
    %76 = arith.mulf %75, %74 : vector<16x128xf32>
    %cst_24 = arith.constant 0.000000e+00 : f32
    %77 = vector.broadcast %cst_24 : f32 to vector<16x128xf32>
    %cst_25 = arith.constant 2.000000e-01 : f32
    %78 = vector.broadcast %cst_25 : f32 to vector<16x128xf32>
    %79 = arith.mulf %76, %78 : vector<16x128xf32>
    %80 = arith.truncf %79 : vector<16x128xf32> to vector<16x128xbf16>
    %81 = arith.extf %80 : vector<16x128xbf16> to vector<16x128xf32>
    %82 = arith.subf %79, %81 : vector<16x128xf32>
    %c32_i32 = arith.constant 32 : i32
    %83 = tpu.dynamic_rotate %82 by %c32_i32 dim 1 : vector<16x128xf32>, i32 -> vector<16x128xf32>
    %84 = arith.addf %79, %83 : vector<16x128xf32>
    %c64_i32 = arith.constant 64 : i32
    %85 = tpu.dynamic_rotate %79 by %c64_i32 dim 1 : vector<16x128xf32>, i32 -> vector<16x128xf32>
    %86 = arith.addf %84, %85 : vector<16x128xf32>
    %87 = arith.truncf %86 : vector<16x128xf32> to vector<16x128xbf16>
    %cst_26 = arith.constant dense<0.000000e+00> : vector<16x128xf32>
    %88 = tpu.matmul %87, %50, %cst_26 {dimension_numbers = #tpu.dot_dimension_numbers<[1], [0], [0], [1], [0, 0, 1, 1], [], []>} : vector<16x128xbf16>, vector<128x128xbf16>, vector<16x128xf32> -> vector<16x128xf32>
    %89 = arith.addf %88, %55 : vector<16x128xf32>
    %90 = math.tanh %89 : vector<16x128xf32>
    %91 = arith.truncf %90 : vector<16x128xf32> to vector<16x128xbf16>
    %92 = arith.extf %91 : vector<16x128xbf16> to vector<16x128xf32>
    %93 = arith.subf %90, %92 : vector<16x128xf32>
    %c32_i32_27 = arith.constant 32 : i32
    %94 = tpu.dynamic_rotate %93 by %c32_i32_27 dim 1 : vector<16x128xf32>, i32 -> vector<16x128xf32>
    %95 = arith.addf %90, %94 : vector<16x128xf32>
    %c64_i32_28 = arith.constant 64 : i32
    %96 = tpu.dynamic_rotate %90 by %c64_i32_28 dim 1 : vector<16x128xf32>, i32 -> vector<16x128xf32>
    %97 = arith.addf %95, %96 : vector<16x128xf32>
    %98 = arith.truncf %97 : vector<16x128xf32> to vector<16x128xbf16>
    %cst_29 = arith.constant dense<0.000000e+00> : vector<16x128xf32>
    %99 = tpu.matmul %98, %51, %cst_29 {dimension_numbers = #tpu.dot_dimension_numbers<[1], [0], [0], [1], [0, 0, 1, 1], [], []>} : vector<16x128xbf16>, vector<128x128xbf16>, vector<16x128xf32> -> vector<16x128xf32>
    %100 = arith.addf %99, %58 : vector<16x128xf32>
    %101 = math.tanh %100 : vector<16x128xf32>
    %102 = arith.truncf %101 : vector<16x128xf32> to vector<16x128xbf16>
    %103 = arith.extf %102 : vector<16x128xbf16> to vector<16x128xf32>
    %104 = arith.subf %101, %103 : vector<16x128xf32>
    %c32_i32_30 = arith.constant 32 : i32
    %105 = tpu.dynamic_rotate %104 by %c32_i32_30 dim 1 : vector<16x128xf32>, i32 -> vector<16x128xf32>
    %106 = arith.addf %101, %105 : vector<16x128xf32>
    %c64_i32_31 = arith.constant 64 : i32
    %107 = tpu.dynamic_rotate %101 by %c64_i32_31 dim 1 : vector<16x128xf32>, i32 -> vector<16x128xf32>
    %108 = arith.addf %106, %107 : vector<16x128xf32>
    %109 = arith.truncf %108 : vector<16x128xf32> to vector<16x128xbf16>
    %cst_32 = arith.constant dense<0.000000e+00> : vector<16x128xf32>
    %110 = tpu.matmul %109, %52, %cst_32 {dimension_numbers = #tpu.dot_dimension_numbers<[1], [0], [0], [1], [0, 0, 1, 1], [], []>} : vector<16x128xbf16>, vector<128x128xbf16>, vector<16x128xf32> -> vector<16x128xf32>
    %111 = arith.addf %110, %61 : vector<16x128xf32>
    %cst_33 = arith.constant 5.000000e-01 : f32
    %112 = vector.broadcast %cst_33 : f32 to vector<16x128xf32>
    %113 = arith.mulf %112, %111 : vector<16x128xf32>
    %114 = math.tanh %113 : vector<16x128xf32>
    %cst_34 = arith.constant 1.000000e+00 : f32
    %115 = vector.broadcast %cst_34 : f32 to vector<16x128xf32>
    %116 = arith.addf %114, %115 : vector<16x128xf32>
    %cst_35 = arith.constant 5.000000e-01 : f32
    %117 = vector.broadcast %cst_35 : f32 to vector<16x128xf32>
    %118 = arith.mulf %117, %116 : vector<16x128xf32>
    %119 = arith.mulf %118, %14 : vector<16x128xf32>
    %cst_36 = arith.constant 0.000000e+00 : f32
    %120 = vector.broadcast %cst_36 : f32 to vector<16x128xf32>
    %121 = arith.mulf %76, %28 : vector<16x128xf32>
    %122 = arith.addf %120, %121 : vector<16x128xf32>
    %c1_i32_37 = arith.constant 1 : i32
    %123 = tpu.dynamic_rotate %76 by %c1_i32_37 dim 1 : vector<16x128xf32>, i32 -> vector<16x128xf32>
    %124 = arith.mulf %123, %35 : vector<16x128xf32>
    %125 = arith.addf %122, %124 : vector<16x128xf32>
    %c2_i32 = arith.constant 2 : i32
    %126 = tpu.dynamic_rotate %76 by %c2_i32 dim 1 : vector<16x128xf32>, i32 -> vector<16x128xf32>
    %127 = arith.mulf %126, %42 : vector<16x128xf32>
    %128 = arith.addf %125, %127 : vector<16x128xf32>
    %c3_i32_38 = arith.constant 3 : i32
    %129 = tpu.dynamic_rotate %76 by %c3_i32_38 dim 1 : vector<16x128xf32>, i32 -> vector<16x128xf32>
    %130 = arith.mulf %129, %49 : vector<16x128xf32>
    %131 = arith.addf %128, %130 : vector<16x128xf32>
    %132 = arith.subf %131, %64 : vector<16x128xf32>
    %cst_39 = arith.constant 0.000000e+00 : f32
    %133 = vector.broadcast %cst_39 : f32 to vector<16x128xf32>
    %134 = arith.maximumf %133, %132 : vector<16x128xf32>
    %cst_40 = arith.constant 1.960000e+01 : f32
    %135 = vector.broadcast %cst_40 : f32 to vector<16x128xf32>
    %136 = arith.mulf %135, %134 : vector<16x128xf32>
    %137 = math.sqrt %136 : vector<16x128xf32>
    %138 = arith.mulf %119, %137 : vector<16x128xf32>
    %139 = arith.mulf %134, %67 : vector<16x128xf32>
    %140 = arith.subf %139, %138 : vector<16x128xf32>
    %cst_41 = arith.constant 5.000000e-01 : f32
    %141 = vector.broadcast %cst_41 : f32 to vector<16x128xf32>
    %142 = arith.mulf %141, %140 : vector<16x128xf32>
    %143 = math.tanh %142 : vector<16x128xf32>
    %cst_42 = arith.constant 1.000000e+00 : f32
    %144 = vector.broadcast %cst_42 : f32 to vector<16x128xf32>
    %145 = arith.addf %143, %144 : vector<16x128xf32>
    %cst_43 = arith.constant 5.000000e-01 : f32
    %146 = vector.broadcast %cst_43 : f32 to vector<16x128xf32>
    %147 = arith.mulf %146, %145 : vector<16x128xf32>
    %148 = arith.mulf %138, %147 : vector<16x128xf32>
    %149 = arith.mulf %148, %67 : vector<16x128xf32>
    %cst_44 = arith.constant 0.000000e+00 : f32
    %150 = vector.broadcast %cst_44 : f32 to vector<16x128xf32>
    %151 = arith.mulf %149, %28 : vector<16x128xf32>
    %152 = arith.addf %150, %151 : vector<16x128xf32>
    %153 = arith.mulf %149, %35 : vector<16x128xf32>
    %c127_i32 = arith.constant 127 : i32
    %154 = tpu.dynamic_rotate %153 by %c127_i32 dim 1 : vector<16x128xf32>, i32 -> vector<16x128xf32>
    %155 = arith.addf %152, %154 : vector<16x128xf32>
    %156 = arith.mulf %149, %42 : vector<16x128xf32>
    %c126_i32 = arith.constant 126 : i32
    %157 = tpu.dynamic_rotate %156 by %c126_i32 dim 1 : vector<16x128xf32>, i32 -> vector<16x128xf32>
    %158 = arith.addf %155, %157 : vector<16x128xf32>
    %159 = arith.mulf %149, %49 : vector<16x128xf32>
    %c125_i32 = arith.constant 125 : i32
    %160 = tpu.dynamic_rotate %159 by %c125_i32 dim 1 : vector<16x128xf32>, i32 -> vector<16x128xf32>
    %161 = arith.addf %158, %160 : vector<16x128xf32>
    %cst_45 = arith.constant 0.000000e+00 : f32
    %162 = vector.broadcast %cst_45 : f32 to vector<16x128xf32>
    %163 = arith.mulf %149, %28 : vector<16x128xf32>
    %c1_i32_46 = arith.constant 1 : i32
    %164 = tpu.dynamic_rotate %163 by %c1_i32_46 dim 1 : vector<16x128xf32>, i32 -> vector<16x128xf32>
    %165 = arith.addf %162, %164 : vector<16x128xf32>
    %166 = arith.mulf %149, %35 : vector<16x128xf32>
    %167 = arith.addf %165, %166 : vector<16x128xf32>
    %168 = arith.mulf %149, %42 : vector<16x128xf32>
    %c127_i32_47 = arith.constant 127 : i32
    %169 = tpu.dynamic_rotate %168 by %c127_i32_47 dim 1 : vector<16x128xf32>, i32 -> vector<16x128xf32>
    %170 = arith.addf %167, %169 : vector<16x128xf32>
    %171 = arith.mulf %149, %49 : vector<16x128xf32>
    %c126_i32_48 = arith.constant 126 : i32
    %172 = tpu.dynamic_rotate %171 by %c126_i32_48 dim 1 : vector<16x128xf32>, i32 -> vector<16x128xf32>
    %173 = arith.addf %170, %172 : vector<16x128xf32>
    %174 = arith.mulf %173, %7 : vector<16x128xf32>
    %c0_49 = arith.constant 0 : index
    %c0_50 = arith.constant 0 : index
    %c0_51 = arith.constant 0 : index
    %c0_52 = arith.constant 0 : index
    %175 = vector.load %arg1[%c0_49, %c0_50, %c0_51, %c0_52] : memref<1x8x16x128xf32, #tpu.memory_space<vmem>>, vector<1x1x16x128xf32>
    %176 = vector.shape_cast %175 : vector<1x1x16x128xf32> to vector<16x128xf32>
    %177 = arith.addf %174, %176 : vector<16x128xf32>
    %178 = arith.addf %76, %177 : vector<16x128xf32>
    %179 = arith.subf %178, %161 : vector<16x128xf32>
    %180 = arith.mulf %149, %21 : vector<16x128xf32>
    %c120_i32 = arith.constant 120 : i32
    %181 = tpu.dynamic_rotate %180 by %c120_i32 dim 1 : vector<16x128xf32>, i32 -> vector<16x128xf32>
    %182 = arith.addf %77, %181 : vector<16x128xf32>
    %cst_53 = arith.constant 2.000000e-01 : f32
    %183 = vector.broadcast %cst_53 : f32 to vector<16x128xf32>
    %184 = arith.mulf %179, %183 : vector<16x128xf32>
    %185 = arith.truncf %184 : vector<16x128xf32> to vector<16x128xbf16>
    %186 = arith.extf %185 : vector<16x128xbf16> to vector<16x128xf32>
    %187 = arith.subf %184, %186 : vector<16x128xf32>
    %c32_i32_54 = arith.constant 32 : i32
    %188 = tpu.dynamic_rotate %187 by %c32_i32_54 dim 1 : vector<16x128xf32>, i32 -> vector<16x128xf32>
    %189 = arith.addf %184, %188 : vector<16x128xf32>
    %c64_i32_55 = arith.constant 64 : i32
    %190 = tpu.dynamic_rotate %184 by %c64_i32_55 dim 1 : vector<16x128xf32>, i32 -> vector<16x128xf32>
    %191 = arith.addf %189, %190 : vector<16x128xf32>
    %192 = arith.truncf %191 : vector<16x128xf32> to vector<16x128xbf16>
    %cst_56 = arith.constant dense<0.000000e+00> : vector<16x128xf32>
    %193 = tpu.matmul %192, %50, %cst_56 {dimension_numbers = #tpu.dot_dimension_numbers<[1], [0], [0], [1], [0, 0, 1, 1], [], []>} : vector<16x128xbf16>, vector<128x128xbf16>, vector<16x128xf32> -> vector<16x128xf32>
    %194 = arith.addf %193, %55 : vector<16x128xf32>
    %195 = math.tanh %194 : vector<16x128xf32>
    %196 = arith.truncf %195 : vector<16x128xf32> to vector<16x128xbf16>
    %197 = arith.extf %196 : vector<16x128xbf16> to vector<16x128xf32>
    %198 = arith.subf %195, %197 : vector<16x128xf32>
    %c32_i32_57 = arith.constant 32 : i32
    %199 = tpu.dynamic_rotate %198 by %c32_i32_57 dim 1 : vector<16x128xf32>, i32 -> vector<16x128xf32>
    %200 = arith.addf %195, %199 : vector<16x128xf32>
    %c64_i32_58 = arith.constant 64 : i32
    %201 = tpu.dynamic_rotate %195 by %c64_i32_58 dim 1 : vector<16x128xf32>, i32 -> vector<16x128xf32>
    %202 = arith.addf %200, %201 : vector<16x128xf32>
    %203 = arith.truncf %202 : vector<16x128xf32> to vector<16x128xbf16>
    %cst_59 = arith.constant dense<0.000000e+00> : vector<16x128xf32>
    %204 = tpu.matmul %203, %51, %cst_59 {dimension_numbers = #tpu.dot_dimension_numbers<[1], [0], [0], [1], [0, 0, 1, 1], [], []>} : vector<16x128xbf16>, vector<128x128xbf16>, vector<16x128xf32> -> vector<16x128xf32>
    %205 = arith.addf %204, %58 : vector<16x128xf32>
    %206 = math.tanh %205 : vector<16x128xf32>
    %207 = arith.truncf %206 : vector<16x128xf32> to vector<16x128xbf16>
    %208 = arith.extf %207 : vector<16x128xbf16> to vector<16x128xf32>
    %209 = arith.subf %206, %208 : vector<16x128xf32>
    %c32_i32_60 = arith.constant 32 : i32
    %210 = tpu.dynamic_rotate %209 by %c32_i32_60 dim 1 : vector<16x128xf32>, i32 -> vector<16x128xf32>
    %211 = arith.addf %206, %210 : vector<16x128xf32>
    %c64_i32_61 = arith.constant 64 : i32
    %212 = tpu.dynamic_rotate %206 by %c64_i32_61 dim 1 : vector<16x128xf32>, i32 -> vector<16x128xf32>
    %213 = arith.addf %211, %212 : vector<16x128xf32>
    %214 = arith.truncf %213 : vector<16x128xf32> to vector<16x128xbf16>
    %cst_62 = arith.constant dense<0.000000e+00> : vector<16x128xf32>
    %215 = tpu.matmul %214, %52, %cst_62 {dimension_numbers = #tpu.dot_dimension_numbers<[1], [0], [0], [1], [0, 0, 1, 1], [], []>} : vector<16x128xbf16>, vector<128x128xbf16>, vector<16x128xf32> -> vector<16x128xf32>
    %216 = arith.addf %215, %61 : vector<16x128xf32>
    %cst_63 = arith.constant 5.000000e-01 : f32
    %217 = vector.broadcast %cst_63 : f32 to vector<16x128xf32>
    %218 = arith.mulf %217, %216 : vector<16x128xf32>
    %219 = math.tanh %218 : vector<16x128xf32>
    %cst_64 = arith.constant 1.000000e+00 : f32
    %220 = vector.broadcast %cst_64 : f32 to vector<16x128xf32>
    %221 = arith.addf %219, %220 : vector<16x128xf32>
    %cst_65 = arith.constant 5.000000e-01 : f32
    %222 = vector.broadcast %cst_65 : f32 to vector<16x128xf32>
    %223 = arith.mulf %222, %221 : vector<16x128xf32>
    %224 = arith.mulf %223, %14 : vector<16x128xf32>
    %cst_66 = arith.constant 0.000000e+00 : f32
    %225 = vector.broadcast %cst_66 : f32 to vector<16x128xf32>
    %226 = arith.mulf %179, %28 : vector<16x128xf32>
    %227 = arith.addf %225, %226 : vector<16x128xf32>
    %c1_i32_67 = arith.constant 1 : i32
    %228 = tpu.dynamic_rotate %179 by %c1_i32_67 dim 1 : vector<16x128xf32>, i32 -> vector<16x128xf32>
    %229 = arith.mulf %228, %35 : vector<16x128xf32>
    %230 = arith.addf %227, %229 : vector<16x128xf32>
    %c2_i32_68 = arith.constant 2 : i32
    %231 = tpu.dynamic_rotate %179 by %c2_i32_68 dim 1 : vector<16x128xf32>, i32 -> vector<16x128xf32>
    %232 = arith.mulf %231, %42 : vector<16x128xf32>
    %233 = arith.addf %230, %232 : vector<16x128xf32>
    %c3_i32_69 = arith.constant 3 : i32
    %234 = tpu.dynamic_rotate %179 by %c3_i32_69 dim 1 : vector<16x128xf32>, i32 -> vector<16x128xf32>
    %235 = arith.mulf %234, %49 : vector<16x128xf32>
    %236 = arith.addf %233, %235 : vector<16x128xf32>
    %237 = arith.subf %236, %64 : vector<16x128xf32>
    %cst_70 = arith.constant 0.000000e+00 : f32
    %238 = vector.broadcast %cst_70 : f32 to vector<16x128xf32>
    %239 = arith.maximumf %238, %237 : vector<16x128xf32>
    %cst_71 = arith.constant 1.960000e+01 : f32
    %240 = vector.broadcast %cst_71 : f32 to vector<16x128xf32>
    %241 = arith.mulf %240, %239 : vector<16x128xf32>
    %242 = math.sqrt %241 : vector<16x128xf32>
    %243 = arith.mulf %224, %242 : vector<16x128xf32>
    %244 = arith.mulf %239, %67 : vector<16x128xf32>
    %245 = arith.subf %244, %243 : vector<16x128xf32>
    %cst_72 = arith.constant 5.000000e-01 : f32
    %246 = vector.broadcast %cst_72 : f32 to vector<16x128xf32>
    %247 = arith.mulf %246, %245 : vector<16x128xf32>
    %248 = math.tanh %247 : vector<16x128xf32>
    %cst_73 = arith.constant 1.000000e+00 : f32
    %249 = vector.broadcast %cst_73 : f32 to vector<16x128xf32>
    %250 = arith.addf %248, %249 : vector<16x128xf32>
    %cst_74 = arith.constant 5.000000e-01 : f32
    %251 = vector.broadcast %cst_74 : f32 to vector<16x128xf32>
    %252 = arith.mulf %251, %250 : vector<16x128xf32>
    %253 = arith.mulf %243, %252 : vector<16x128xf32>
    %254 = arith.mulf %253, %67 : vector<16x128xf32>
    %cst_75 = arith.constant 0.000000e+00 : f32
    %255 = vector.broadcast %cst_75 : f32 to vector<16x128xf32>
    %256 = arith.mulf %254, %28 : vector<16x128xf32>
    %257 = arith.addf %255, %256 : vector<16x128xf32>
    %258 = arith.mulf %254, %35 : vector<16x128xf32>
    %c127_i32_76 = arith.constant 127 : i32
    %259 = tpu.dynamic_rotate %258 by %c127_i32_76 dim 1 : vector<16x128xf32>, i32 -> vector<16x128xf32>
    %260 = arith.addf %257, %259 : vector<16x128xf32>
    %261 = arith.mulf %254, %42 : vector<16x128xf32>
    %c126_i32_77 = arith.constant 126 : i32
    %262 = tpu.dynamic_rotate %261 by %c126_i32_77 dim 1 : vector<16x128xf32>, i32 -> vector<16x128xf32>
    %263 = arith.addf %260, %262 : vector<16x128xf32>
    %264 = arith.mulf %254, %49 : vector<16x128xf32>
    %c125_i32_78 = arith.constant 125 : i32
    %265 = tpu.dynamic_rotate %264 by %c125_i32_78 dim 1 : vector<16x128xf32>, i32 -> vector<16x128xf32>
    %266 = arith.addf %263, %265 : vector<16x128xf32>
    %cst_79 = arith.constant 0.000000e+00 : f32
    %267 = vector.broadcast %cst_79 : f32 to vector<16x128xf32>
    %268 = arith.mulf %254, %28 : vector<16x128xf32>
    %c1_i32_80 = arith.constant 1 : i32
    %269 = tpu.dynamic_rotate %268 by %c1_i32_80 dim 1 : vector<16x128xf32>, i32 -> vector<16x128xf32>
    %270 = arith.addf %267, %269 : vector<16x128xf32>
    %271 = arith.mulf %254, %35 : vector<16x128xf32>
    %272 = arith.addf %270, %271 : vector<16x128xf32>
    %273 = arith.mulf %254, %42 : vector<16x128xf32>
    %c127_i32_81 = arith.constant 127 : i32
    %274 = tpu.dynamic_rotate %273 by %c127_i32_81 dim 1 : vector<16x128xf32>, i32 -> vector<16x128xf32>
    %275 = arith.addf %272, %274 : vector<16x128xf32>
    %276 = arith.mulf %254, %49 : vector<16x128xf32>
    %c126_i32_82 = arith.constant 126 : i32
    %277 = tpu.dynamic_rotate %276 by %c126_i32_82 dim 1 : vector<16x128xf32>, i32 -> vector<16x128xf32>
    %278 = arith.addf %275, %277 : vector<16x128xf32>
    %279 = arith.mulf %278, %7 : vector<16x128xf32>
    %c0_83 = arith.constant 0 : index
    %c1 = arith.constant 1 : index
    %c0_84 = arith.constant 0 : index
    %c0_85 = arith.constant 0 : index
    %280 = vector.load %arg1[%c0_83, %c1, %c0_84, %c0_85] : memref<1x8x16x128xf32, #tpu.memory_space<vmem>>, vector<1x1x16x128xf32>
    %281 = vector.shape_cast %280 : vector<1x1x16x128xf32> to vector<16x128xf32>
    %282 = arith.addf %279, %281 : vector<16x128xf32>
    %283 = arith.addf %179, %282 : vector<16x128xf32>
    %284 = arith.subf %283, %266 : vector<16x128xf32>
    %285 = arith.mulf %254, %21 : vector<16x128xf32>
    %c121_i32 = arith.constant 121 : i32
    %286 = tpu.dynamic_rotate %285 by %c121_i32 dim 1 : vector<16x128xf32>, i32 -> vector<16x128xf32>
    %287 = arith.addf %182, %286 : vector<16x128xf32>
    %cst_86 = arith.constant 2.000000e-01 : f32
    %288 = vector.broadcast %cst_86 : f32 to vector<16x128xf32>
    %289 = arith.mulf %284, %288 : vector<16x128xf32>
    %290 = arith.truncf %289 : vector<16x128xf32> to vector<16x128xbf16>
    %291 = arith.extf %290 : vector<16x128xbf16> to vector<16x128xf32>
    %292 = arith.subf %289, %291 : vector<16x128xf32>
    %c32_i32_87 = arith.constant 32 : i32
    %293 = tpu.dynamic_rotate %292 by %c32_i32_87 dim 1 : vector<16x128xf32>, i32 -> vector<16x128xf32>
    %294 = arith.addf %289, %293 : vector<16x128xf32>
    %c64_i32_88 = arith.constant 64 : i32
    %295 = tpu.dynamic_rotate %289 by %c64_i32_88 dim 1 : vector<16x128xf32>, i32 -> vector<16x128xf32>
    %296 = arith.addf %294, %295 : vector<16x128xf32>
    %297 = arith.truncf %296 : vector<16x128xf32> to vector<16x128xbf16>
    %cst_89 = arith.constant dense<0.000000e+00> : vector<16x128xf32>
    %298 = tpu.matmul %297, %50, %cst_89 {dimension_numbers = #tpu.dot_dimension_numbers<[1], [0], [0], [1], [0, 0, 1, 1], [], []>} : vector<16x128xbf16>, vector<128x128xbf16>, vector<16x128xf32> -> vector<16x128xf32>
    %299 = arith.addf %298, %55 : vector<16x128xf32>
    %300 = math.tanh %299 : vector<16x128xf32>
    %301 = arith.truncf %300 : vector<16x128xf32> to vector<16x128xbf16>
    %302 = arith.extf %301 : vector<16x128xbf16> to vector<16x128xf32>
    %303 = arith.subf %300, %302 : vector<16x128xf32>
    %c32_i32_90 = arith.constant 32 : i32
    %304 = tpu.dynamic_rotate %303 by %c32_i32_90 dim 1 : vector<16x128xf32>, i32 -> vector<16x128xf32>
    %305 = arith.addf %300, %304 : vector<16x128xf32>
    %c64_i32_91 = arith.constant 64 : i32
    %306 = tpu.dynamic_rotate %300 by %c64_i32_91 dim 1 : vector<16x128xf32>, i32 -> vector<16x128xf32>
    %307 = arith.addf %305, %306 : vector<16x128xf32>
    %308 = arith.truncf %307 : vector<16x128xf32> to vector<16x128xbf16>
    %cst_92 = arith.constant dense<0.000000e+00> : vector<16x128xf32>
    %309 = tpu.matmul %308, %51, %cst_92 {dimension_numbers = #tpu.dot_dimension_numbers<[1], [0], [0], [1], [0, 0, 1, 1], [], []>} : vector<16x128xbf16>, vector<128x128xbf16>, vector<16x128xf32> -> vector<16x128xf32>
    %310 = arith.addf %309, %58 : vector<16x128xf32>
    %311 = math.tanh %310 : vector<16x128xf32>
    %312 = arith.truncf %311 : vector<16x128xf32> to vector<16x128xbf16>
    %313 = arith.extf %312 : vector<16x128xbf16> to vector<16x128xf32>
    %314 = arith.subf %311, %313 : vector<16x128xf32>
    %c32_i32_93 = arith.constant 32 : i32
    %315 = tpu.dynamic_rotate %314 by %c32_i32_93 dim 1 : vector<16x128xf32>, i32 -> vector<16x128xf32>
    %316 = arith.addf %311, %315 : vector<16x128xf32>
    %c64_i32_94 = arith.constant 64 : i32
    %317 = tpu.dynamic_rotate %311 by %c64_i32_94 dim 1 : vector<16x128xf32>, i32 -> vector<16x128xf32>
    %318 = arith.addf %316, %317 : vector<16x128xf32>
    %319 = arith.truncf %318 : vector<16x128xf32> to vector<16x128xbf16>
    %cst_95 = arith.constant dense<0.000000e+00> : vector<16x128xf32>
    %320 = tpu.matmul %319, %52, %cst_95 {dimension_numbers = #tpu.dot_dimension_numbers<[1], [0], [0], [1], [0, 0, 1, 1], [], []>} : vector<16x128xbf16>, vector<128x128xbf16>, vector<16x128xf32> -> vector<16x128xf32>
    %321 = arith.addf %320, %61 : vector<16x128xf32>
    %cst_96 = arith.constant 5.000000e-01 : f32
    %322 = vector.broadcast %cst_96 : f32 to vector<16x128xf32>
    %323 = arith.mulf %322, %321 : vector<16x128xf32>
    %324 = math.tanh %323 : vector<16x128xf32>
    %cst_97 = arith.constant 1.000000e+00 : f32
    %325 = vector.broadcast %cst_97 : f32 to vector<16x128xf32>
    %326 = arith.addf %324, %325 : vector<16x128xf32>
    %cst_98 = arith.constant 5.000000e-01 : f32
    %327 = vector.broadcast %cst_98 : f32 to vector<16x128xf32>
    %328 = arith.mulf %327, %326 : vector<16x128xf32>
    %329 = arith.mulf %328, %14 : vector<16x128xf32>
    %cst_99 = arith.constant 0.000000e+00 : f32
    %330 = vector.broadcast %cst_99 : f32 to vector<16x128xf32>
    %331 = arith.mulf %284, %28 : vector<16x128xf32>
    %332 = arith.addf %330, %331 : vector<16x128xf32>
    %c1_i32_100 = arith.constant 1 : i32
    %333 = tpu.dynamic_rotate %284 by %c1_i32_100 dim 1 : vector<16x128xf32>, i32 -> vector<16x128xf32>
    %334 = arith.mulf %333, %35 : vector<16x128xf32>
    %335 = arith.addf %332, %334 : vector<16x128xf32>
    %c2_i32_101 = arith.constant 2 : i32
    %336 = tpu.dynamic_rotate %284 by %c2_i32_101 dim 1 : vector<16x128xf32>, i32 -> vector<16x128xf32>
    %337 = arith.mulf %336, %42 : vector<16x128xf32>
    %338 = arith.addf %335, %337 : vector<16x128xf32>
    %c3_i32_102 = arith.constant 3 : i32
    %339 = tpu.dynamic_rotate %284 by %c3_i32_102 dim 1 : vector<16x128xf32>, i32 -> vector<16x128xf32>
    %340 = arith.mulf %339, %49 : vector<16x128xf32>
    %341 = arith.addf %338, %340 : vector<16x128xf32>
    %342 = arith.subf %341, %64 : vector<16x128xf32>
    %cst_103 = arith.constant 0.000000e+00 : f32
    %343 = vector.broadcast %cst_103 : f32 to vector<16x128xf32>
    %344 = arith.maximumf %343, %342 : vector<16x128xf32>
    %cst_104 = arith.constant 1.960000e+01 : f32
    %345 = vector.broadcast %cst_104 : f32 to vector<16x128xf32>
    %346 = arith.mulf %345, %344 : vector<16x128xf32>
    %347 = math.sqrt %346 : vector<16x128xf32>
    %348 = arith.mulf %329, %347 : vector<16x128xf32>
    %349 = arith.mulf %344, %67 : vector<16x128xf32>
    %350 = arith.subf %349, %348 : vector<16x128xf32>
    %cst_105 = arith.constant 5.000000e-01 : f32
    %351 = vector.broadcast %cst_105 : f32 to vector<16x128xf32>
    %352 = arith.mulf %351, %350 : vector<16x128xf32>
    %353 = math.tanh %352 : vector<16x128xf32>
    %cst_106 = arith.constant 1.000000e+00 : f32
    %354 = vector.broadcast %cst_106 : f32 to vector<16x128xf32>
    %355 = arith.addf %353, %354 : vector<16x128xf32>
    %cst_107 = arith.constant 5.000000e-01 : f32
    %356 = vector.broadcast %cst_107 : f32 to vector<16x128xf32>
    %357 = arith.mulf %356, %355 : vector<16x128xf32>
    %358 = arith.mulf %348, %357 : vector<16x128xf32>
    %359 = arith.mulf %358, %67 : vector<16x128xf32>
    %cst_108 = arith.constant 0.000000e+00 : f32
    %360 = vector.broadcast %cst_108 : f32 to vector<16x128xf32>
    %361 = arith.mulf %359, %28 : vector<16x128xf32>
    %362 = arith.addf %360, %361 : vector<16x128xf32>
    %363 = arith.mulf %359, %35 : vector<16x128xf32>
    %c127_i32_109 = arith.constant 127 : i32
    %364 = tpu.dynamic_rotate %363 by %c127_i32_109 dim 1 : vector<16x128xf32>, i32 -> vector<16x128xf32>
    %365 = arith.addf %362, %364 : vector<16x128xf32>
    %366 = arith.mulf %359, %42 : vector<16x128xf32>
    %c126_i32_110 = arith.constant 126 : i32
    %367 = tpu.dynamic_rotate %366 by %c126_i32_110 dim 1 : vector<16x128xf32>, i32 -> vector<16x128xf32>
    %368 = arith.addf %365, %367 : vector<16x128xf32>
    %369 = arith.mulf %359, %49 : vector<16x128xf32>
    %c125_i32_111 = arith.constant 125 : i32
    %370 = tpu.dynamic_rotate %369 by %c125_i32_111 dim 1 : vector<16x128xf32>, i32 -> vector<16x128xf32>
    %371 = arith.addf %368, %370 : vector<16x128xf32>
    %cst_112 = arith.constant 0.000000e+00 : f32
    %372 = vector.broadcast %cst_112 : f32 to vector<16x128xf32>
    %373 = arith.mulf %359, %28 : vector<16x128xf32>
    %c1_i32_113 = arith.constant 1 : i32
    %374 = tpu.dynamic_rotate %373 by %c1_i32_113 dim 1 : vector<16x128xf32>, i32 -> vector<16x128xf32>
    %375 = arith.addf %372, %374 : vector<16x128xf32>
    %376 = arith.mulf %359, %35 : vector<16x128xf32>
    %377 = arith.addf %375, %376 : vector<16x128xf32>
    %378 = arith.mulf %359, %42 : vector<16x128xf32>
    %c127_i32_114 = arith.constant 127 : i32
    %379 = tpu.dynamic_rotate %378 by %c127_i32_114 dim 1 : vector<16x128xf32>, i32 -> vector<16x128xf32>
    %380 = arith.addf %377, %379 : vector<16x128xf32>
    %381 = arith.mulf %359, %49 : vector<16x128xf32>
    %c126_i32_115 = arith.constant 126 : i32
    %382 = tpu.dynamic_rotate %381 by %c126_i32_115 dim 1 : vector<16x128xf32>, i32 -> vector<16x128xf32>
    %383 = arith.addf %380, %382 : vector<16x128xf32>
    %384 = arith.mulf %383, %7 : vector<16x128xf32>
    %c0_116 = arith.constant 0 : index
    %c2 = arith.constant 2 : index
    %c0_117 = arith.constant 0 : index
    %c0_118 = arith.constant 0 : index
    %385 = vector.load %arg1[%c0_116, %c2, %c0_117, %c0_118] : memref<1x8x16x128xf32, #tpu.memory_space<vmem>>, vector<1x1x16x128xf32>
    %386 = vector.shape_cast %385 : vector<1x1x16x128xf32> to vector<16x128xf32>
    %387 = arith.addf %384, %386 : vector<16x128xf32>
    %388 = arith.addf %284, %387 : vector<16x128xf32>
    %389 = arith.subf %388, %371 : vector<16x128xf32>
    %390 = arith.mulf %359, %21 : vector<16x128xf32>
    %c122_i32 = arith.constant 122 : i32
    %391 = tpu.dynamic_rotate %390 by %c122_i32 dim 1 : vector<16x128xf32>, i32 -> vector<16x128xf32>
    %392 = arith.addf %287, %391 : vector<16x128xf32>
    %cst_119 = arith.constant 2.000000e-01 : f32
    %393 = vector.broadcast %cst_119 : f32 to vector<16x128xf32>
    %394 = arith.mulf %389, %393 : vector<16x128xf32>
    %395 = arith.truncf %394 : vector<16x128xf32> to vector<16x128xbf16>
    %396 = arith.extf %395 : vector<16x128xbf16> to vector<16x128xf32>
    %397 = arith.subf %394, %396 : vector<16x128xf32>
    %c32_i32_120 = arith.constant 32 : i32
    %398 = tpu.dynamic_rotate %397 by %c32_i32_120 dim 1 : vector<16x128xf32>, i32 -> vector<16x128xf32>
    %399 = arith.addf %394, %398 : vector<16x128xf32>
    %c64_i32_121 = arith.constant 64 : i32
    %400 = tpu.dynamic_rotate %394 by %c64_i32_121 dim 1 : vector<16x128xf32>, i32 -> vector<16x128xf32>
    %401 = arith.addf %399, %400 : vector<16x128xf32>
    %402 = arith.truncf %401 : vector<16x128xf32> to vector<16x128xbf16>
    %cst_122 = arith.constant dense<0.000000e+00> : vector<16x128xf32>
    %403 = tpu.matmul %402, %50, %cst_122 {dimension_numbers = #tpu.dot_dimension_numbers<[1], [0], [0], [1], [0, 0, 1, 1], [], []>} : vector<16x128xbf16>, vector<128x128xbf16>, vector<16x128xf32> -> vector<16x128xf32>
    %404 = arith.addf %403, %55 : vector<16x128xf32>
    %405 = math.tanh %404 : vector<16x128xf32>
    %406 = arith.truncf %405 : vector<16x128xf32> to vector<16x128xbf16>
    %407 = arith.extf %406 : vector<16x128xbf16> to vector<16x128xf32>
    %408 = arith.subf %405, %407 : vector<16x128xf32>
    %c32_i32_123 = arith.constant 32 : i32
    %409 = tpu.dynamic_rotate %408 by %c32_i32_123 dim 1 : vector<16x128xf32>, i32 -> vector<16x128xf32>
    %410 = arith.addf %405, %409 : vector<16x128xf32>
    %c64_i32_124 = arith.constant 64 : i32
    %411 = tpu.dynamic_rotate %405 by %c64_i32_124 dim 1 : vector<16x128xf32>, i32 -> vector<16x128xf32>
    %412 = arith.addf %410, %411 : vector<16x128xf32>
    %413 = arith.truncf %412 : vector<16x128xf32> to vector<16x128xbf16>
    %cst_125 = arith.constant dense<0.000000e+00> : vector<16x128xf32>
    %414 = tpu.matmul %413, %51, %cst_125 {dimension_numbers = #tpu.dot_dimension_numbers<[1], [0], [0], [1], [0, 0, 1, 1], [], []>} : vector<16x128xbf16>, vector<128x128xbf16>, vector<16x128xf32> -> vector<16x128xf32>
    %415 = arith.addf %414, %58 : vector<16x128xf32>
    %416 = math.tanh %415 : vector<16x128xf32>
    %417 = arith.truncf %416 : vector<16x128xf32> to vector<16x128xbf16>
    %418 = arith.extf %417 : vector<16x128xbf16> to vector<16x128xf32>
    %419 = arith.subf %416, %418 : vector<16x128xf32>
    %c32_i32_126 = arith.constant 32 : i32
    %420 = tpu.dynamic_rotate %419 by %c32_i32_126 dim 1 : vector<16x128xf32>, i32 -> vector<16x128xf32>
    %421 = arith.addf %416, %420 : vector<16x128xf32>
    %c64_i32_127 = arith.constant 64 : i32
    %422 = tpu.dynamic_rotate %416 by %c64_i32_127 dim 1 : vector<16x128xf32>, i32 -> vector<16x128xf32>
    %423 = arith.addf %421, %422 : vector<16x128xf32>
    %424 = arith.truncf %423 : vector<16x128xf32> to vector<16x128xbf16>
    %cst_128 = arith.constant dense<0.000000e+00> : vector<16x128xf32>
    %425 = tpu.matmul %424, %52, %cst_128 {dimension_numbers = #tpu.dot_dimension_numbers<[1], [0], [0], [1], [0, 0, 1, 1], [], []>} : vector<16x128xbf16>, vector<128x128xbf16>, vector<16x128xf32> -> vector<16x128xf32>
    %426 = arith.addf %425, %61 : vector<16x128xf32>
    %cst_129 = arith.constant 5.000000e-01 : f32
    %427 = vector.broadcast %cst_129 : f32 to vector<16x128xf32>
    %428 = arith.mulf %427, %426 : vector<16x128xf32>
    %429 = math.tanh %428 : vector<16x128xf32>
    %cst_130 = arith.constant 1.000000e+00 : f32
    %430 = vector.broadcast %cst_130 : f32 to vector<16x128xf32>
    %431 = arith.addf %429, %430 : vector<16x128xf32>
    %cst_131 = arith.constant 5.000000e-01 : f32
    %432 = vector.broadcast %cst_131 : f32 to vector<16x128xf32>
    %433 = arith.mulf %432, %431 : vector<16x128xf32>
    %434 = arith.mulf %433, %14 : vector<16x128xf32>
    %cst_132 = arith.constant 0.000000e+00 : f32
    %435 = vector.broadcast %cst_132 : f32 to vector<16x128xf32>
    %436 = arith.mulf %389, %28 : vector<16x128xf32>
    %437 = arith.addf %435, %436 : vector<16x128xf32>
    %c1_i32_133 = arith.constant 1 : i32
    %438 = tpu.dynamic_rotate %389 by %c1_i32_133 dim 1 : vector<16x128xf32>, i32 -> vector<16x128xf32>
    %439 = arith.mulf %438, %35 : vector<16x128xf32>
    %440 = arith.addf %437, %439 : vector<16x128xf32>
    %c2_i32_134 = arith.constant 2 : i32
    %441 = tpu.dynamic_rotate %389 by %c2_i32_134 dim 1 : vector<16x128xf32>, i32 -> vector<16x128xf32>
    %442 = arith.mulf %441, %42 : vector<16x128xf32>
    %443 = arith.addf %440, %442 : vector<16x128xf32>
    %c3_i32_135 = arith.constant 3 : i32
    %444 = tpu.dynamic_rotate %389 by %c3_i32_135 dim 1 : vector<16x128xf32>, i32 -> vector<16x128xf32>
    %445 = arith.mulf %444, %49 : vector<16x128xf32>
    %446 = arith.addf %443, %445 : vector<16x128xf32>
    %447 = arith.subf %446, %64 : vector<16x128xf32>
    %cst_136 = arith.constant 0.000000e+00 : f32
    %448 = vector.broadcast %cst_136 : f32 to vector<16x128xf32>
    %449 = arith.maximumf %448, %447 : vector<16x128xf32>
    %cst_137 = arith.constant 1.960000e+01 : f32
    %450 = vector.broadcast %cst_137 : f32 to vector<16x128xf32>
    %451 = arith.mulf %450, %449 : vector<16x128xf32>
    %452 = math.sqrt %451 : vector<16x128xf32>
    %453 = arith.mulf %434, %452 : vector<16x128xf32>
    %454 = arith.mulf %449, %67 : vector<16x128xf32>
    %455 = arith.subf %454, %453 : vector<16x128xf32>
    %cst_138 = arith.constant 5.000000e-01 : f32
    %456 = vector.broadcast %cst_138 : f32 to vector<16x128xf32>
    %457 = arith.mulf %456, %455 : vector<16x128xf32>
    %458 = math.tanh %457 : vector<16x128xf32>
    %cst_139 = arith.constant 1.000000e+00 : f32
    %459 = vector.broadcast %cst_139 : f32 to vector<16x128xf32>
    %460 = arith.addf %458, %459 : vector<16x128xf32>
    %cst_140 = arith.constant 5.000000e-01 : f32
    %461 = vector.broadcast %cst_140 : f32 to vector<16x128xf32>
    %462 = arith.mulf %461, %460 : vector<16x128xf32>
    %463 = arith.mulf %453, %462 : vector<16x128xf32>
    %464 = arith.mulf %463, %67 : vector<16x128xf32>
    %cst_141 = arith.constant 0.000000e+00 : f32
    %465 = vector.broadcast %cst_141 : f32 to vector<16x128xf32>
    %466 = arith.mulf %464, %28 : vector<16x128xf32>
    %467 = arith.addf %465, %466 : vector<16x128xf32>
    %468 = arith.mulf %464, %35 : vector<16x128xf32>
    %c127_i32_142 = arith.constant 127 : i32
    %469 = tpu.dynamic_rotate %468 by %c127_i32_142 dim 1 : vector<16x128xf32>, i32 -> vector<16x128xf32>
    %470 = arith.addf %467, %469 : vector<16x128xf32>
    %471 = arith.mulf %464, %42 : vector<16x128xf32>
    %c126_i32_143 = arith.constant 126 : i32
    %472 = tpu.dynamic_rotate %471 by %c126_i32_143 dim 1 : vector<16x128xf32>, i32 -> vector<16x128xf32>
    %473 = arith.addf %470, %472 : vector<16x128xf32>
    %474 = arith.mulf %464, %49 : vector<16x128xf32>
    %c125_i32_144 = arith.constant 125 : i32
    %475 = tpu.dynamic_rotate %474 by %c125_i32_144 dim 1 : vector<16x128xf32>, i32 -> vector<16x128xf32>
    %476 = arith.addf %473, %475 : vector<16x128xf32>
    %cst_145 = arith.constant 0.000000e+00 : f32
    %477 = vector.broadcast %cst_145 : f32 to vector<16x128xf32>
    %478 = arith.mulf %464, %28 : vector<16x128xf32>
    %c1_i32_146 = arith.constant 1 : i32
    %479 = tpu.dynamic_rotate %478 by %c1_i32_146 dim 1 : vector<16x128xf32>, i32 -> vector<16x128xf32>
    %480 = arith.addf %477, %479 : vector<16x128xf32>
    %481 = arith.mulf %464, %35 : vector<16x128xf32>
    %482 = arith.addf %480, %481 : vector<16x128xf32>
    %483 = arith.mulf %464, %42 : vector<16x128xf32>
    %c127_i32_147 = arith.constant 127 : i32
    %484 = tpu.dynamic_rotate %483 by %c127_i32_147 dim 1 : vector<16x128xf32>, i32 -> vector<16x128xf32>
    %485 = arith.addf %482, %484 : vector<16x128xf32>
    %486 = arith.mulf %464, %49 : vector<16x128xf32>
    %c126_i32_148 = arith.constant 126 : i32
    %487 = tpu.dynamic_rotate %486 by %c126_i32_148 dim 1 : vector<16x128xf32>, i32 -> vector<16x128xf32>
    %488 = arith.addf %485, %487 : vector<16x128xf32>
    %489 = arith.mulf %488, %7 : vector<16x128xf32>
    %c0_149 = arith.constant 0 : index
    %c3 = arith.constant 3 : index
    %c0_150 = arith.constant 0 : index
    %c0_151 = arith.constant 0 : index
    %490 = vector.load %arg1[%c0_149, %c3, %c0_150, %c0_151] : memref<1x8x16x128xf32, #tpu.memory_space<vmem>>, vector<1x1x16x128xf32>
    %491 = vector.shape_cast %490 : vector<1x1x16x128xf32> to vector<16x128xf32>
    %492 = arith.addf %489, %491 : vector<16x128xf32>
    %493 = arith.addf %389, %492 : vector<16x128xf32>
    %494 = arith.subf %493, %476 : vector<16x128xf32>
    %495 = arith.mulf %464, %21 : vector<16x128xf32>
    %c123_i32 = arith.constant 123 : i32
    %496 = tpu.dynamic_rotate %495 by %c123_i32 dim 1 : vector<16x128xf32>, i32 -> vector<16x128xf32>
    %497 = arith.addf %392, %496 : vector<16x128xf32>
    %cst_152 = arith.constant 2.000000e-01 : f32
    %498 = vector.broadcast %cst_152 : f32 to vector<16x128xf32>
    %499 = arith.mulf %494, %498 : vector<16x128xf32>
    %500 = arith.truncf %499 : vector<16x128xf32> to vector<16x128xbf16>
    %501 = arith.extf %500 : vector<16x128xbf16> to vector<16x128xf32>
    %502 = arith.subf %499, %501 : vector<16x128xf32>
    %c32_i32_153 = arith.constant 32 : i32
    %503 = tpu.dynamic_rotate %502 by %c32_i32_153 dim 1 : vector<16x128xf32>, i32 -> vector<16x128xf32>
    %504 = arith.addf %499, %503 : vector<16x128xf32>
    %c64_i32_154 = arith.constant 64 : i32
    %505 = tpu.dynamic_rotate %499 by %c64_i32_154 dim 1 : vector<16x128xf32>, i32 -> vector<16x128xf32>
    %506 = arith.addf %504, %505 : vector<16x128xf32>
    %507 = arith.truncf %506 : vector<16x128xf32> to vector<16x128xbf16>
    %cst_155 = arith.constant dense<0.000000e+00> : vector<16x128xf32>
    %508 = tpu.matmul %507, %50, %cst_155 {dimension_numbers = #tpu.dot_dimension_numbers<[1], [0], [0], [1], [0, 0, 1, 1], [], []>} : vector<16x128xbf16>, vector<128x128xbf16>, vector<16x128xf32> -> vector<16x128xf32>
    %509 = arith.addf %508, %55 : vector<16x128xf32>
    %510 = math.tanh %509 : vector<16x128xf32>
    %511 = arith.truncf %510 : vector<16x128xf32> to vector<16x128xbf16>
    %512 = arith.extf %511 : vector<16x128xbf16> to vector<16x128xf32>
    %513 = arith.subf %510, %512 : vector<16x128xf32>
    %c32_i32_156 = arith.constant 32 : i32
    %514 = tpu.dynamic_rotate %513 by %c32_i32_156 dim 1 : vector<16x128xf32>, i32 -> vector<16x128xf32>
    %515 = arith.addf %510, %514 : vector<16x128xf32>
    %c64_i32_157 = arith.constant 64 : i32
    %516 = tpu.dynamic_rotate %510 by %c64_i32_157 dim 1 : vector<16x128xf32>, i32 -> vector<16x128xf32>
    %517 = arith.addf %515, %516 : vector<16x128xf32>
    %518 = arith.truncf %517 : vector<16x128xf32> to vector<16x128xbf16>
    %cst_158 = arith.constant dense<0.000000e+00> : vector<16x128xf32>
    %519 = tpu.matmul %518, %51, %cst_158 {dimension_numbers = #tpu.dot_dimension_numbers<[1], [0], [0], [1], [0, 0, 1, 1], [], []>} : vector<16x128xbf16>, vector<128x128xbf16>, vector<16x128xf32> -> vector<16x128xf32>
    %520 = arith.addf %519, %58 : vector<16x128xf32>
    %521 = math.tanh %520 : vector<16x128xf32>
    %522 = arith.truncf %521 : vector<16x128xf32> to vector<16x128xbf16>
    %523 = arith.extf %522 : vector<16x128xbf16> to vector<16x128xf32>
    %524 = arith.subf %521, %523 : vector<16x128xf32>
    %c32_i32_159 = arith.constant 32 : i32
    %525 = tpu.dynamic_rotate %524 by %c32_i32_159 dim 1 : vector<16x128xf32>, i32 -> vector<16x128xf32>
    %526 = arith.addf %521, %525 : vector<16x128xf32>
    %c64_i32_160 = arith.constant 64 : i32
    %527 = tpu.dynamic_rotate %521 by %c64_i32_160 dim 1 : vector<16x128xf32>, i32 -> vector<16x128xf32>
    %528 = arith.addf %526, %527 : vector<16x128xf32>
    %529 = arith.truncf %528 : vector<16x128xf32> to vector<16x128xbf16>
    %cst_161 = arith.constant dense<0.000000e+00> : vector<16x128xf32>
    %530 = tpu.matmul %529, %52, %cst_161 {dimension_numbers = #tpu.dot_dimension_numbers<[1], [0], [0], [1], [0, 0, 1, 1], [], []>} : vector<16x128xbf16>, vector<128x128xbf16>, vector<16x128xf32> -> vector<16x128xf32>
    %531 = arith.addf %530, %61 : vector<16x128xf32>
    %cst_162 = arith.constant 5.000000e-01 : f32
    %532 = vector.broadcast %cst_162 : f32 to vector<16x128xf32>
    %533 = arith.mulf %532, %531 : vector<16x128xf32>
    %534 = math.tanh %533 : vector<16x128xf32>
    %cst_163 = arith.constant 1.000000e+00 : f32
    %535 = vector.broadcast %cst_163 : f32 to vector<16x128xf32>
    %536 = arith.addf %534, %535 : vector<16x128xf32>
    %cst_164 = arith.constant 5.000000e-01 : f32
    %537 = vector.broadcast %cst_164 : f32 to vector<16x128xf32>
    %538 = arith.mulf %537, %536 : vector<16x128xf32>
    %539 = arith.mulf %538, %14 : vector<16x128xf32>
    %cst_165 = arith.constant 0.000000e+00 : f32
    %540 = vector.broadcast %cst_165 : f32 to vector<16x128xf32>
    %541 = arith.mulf %494, %28 : vector<16x128xf32>
    %542 = arith.addf %540, %541 : vector<16x128xf32>
    %c1_i32_166 = arith.constant 1 : i32
    %543 = tpu.dynamic_rotate %494 by %c1_i32_166 dim 1 : vector<16x128xf32>, i32 -> vector<16x128xf32>
    %544 = arith.mulf %543, %35 : vector<16x128xf32>
    %545 = arith.addf %542, %544 : vector<16x128xf32>
    %c2_i32_167 = arith.constant 2 : i32
    %546 = tpu.dynamic_rotate %494 by %c2_i32_167 dim 1 : vector<16x128xf32>, i32 -> vector<16x128xf32>
    %547 = arith.mulf %546, %42 : vector<16x128xf32>
    %548 = arith.addf %545, %547 : vector<16x128xf32>
    %c3_i32_168 = arith.constant 3 : i32
    %549 = tpu.dynamic_rotate %494 by %c3_i32_168 dim 1 : vector<16x128xf32>, i32 -> vector<16x128xf32>
    %550 = arith.mulf %549, %49 : vector<16x128xf32>
    %551 = arith.addf %548, %550 : vector<16x128xf32>
    %552 = arith.subf %551, %64 : vector<16x128xf32>
    %cst_169 = arith.constant 0.000000e+00 : f32
    %553 = vector.broadcast %cst_169 : f32 to vector<16x128xf32>
    %554 = arith.maximumf %553, %552 : vector<16x128xf32>
    %cst_170 = arith.constant 1.960000e+01 : f32
    %555 = vector.broadcast %cst_170 : f32 to vector<16x128xf32>
    %556 = arith.mulf %555, %554 : vector<16x128xf32>
    %557 = math.sqrt %556 : vector<16x128xf32>
    %558 = arith.mulf %539, %557 : vector<16x128xf32>
    %559 = arith.mulf %554, %67 : vector<16x128xf32>
    %560 = arith.subf %559, %558 : vector<16x128xf32>
    %cst_171 = arith.constant 5.000000e-01 : f32
    %561 = vector.broadcast %cst_171 : f32 to vector<16x128xf32>
    %562 = arith.mulf %561, %560 : vector<16x128xf32>
    %563 = math.tanh %562 : vector<16x128xf32>
    %cst_172 = arith.constant 1.000000e+00 : f32
    %564 = vector.broadcast %cst_172 : f32 to vector<16x128xf32>
    %565 = arith.addf %563, %564 : vector<16x128xf32>
    %cst_173 = arith.constant 5.000000e-01 : f32
    %566 = vector.broadcast %cst_173 : f32 to vector<16x128xf32>
    %567 = arith.mulf %566, %565 : vector<16x128xf32>
    %568 = arith.mulf %558, %567 : vector<16x128xf32>
    %569 = arith.mulf %568, %67 : vector<16x128xf32>
    %cst_174 = arith.constant 0.000000e+00 : f32
    %570 = vector.broadcast %cst_174 : f32 to vector<16x128xf32>
    %571 = arith.mulf %569, %28 : vector<16x128xf32>
    %572 = arith.addf %570, %571 : vector<16x128xf32>
    %573 = arith.mulf %569, %35 : vector<16x128xf32>
    %c127_i32_175 = arith.constant 127 : i32
    %574 = tpu.dynamic_rotate %573 by %c127_i32_175 dim 1 : vector<16x128xf32>, i32 -> vector<16x128xf32>
    %575 = arith.addf %572, %574 : vector<16x128xf32>
    %576 = arith.mulf %569, %42 : vector<16x128xf32>
    %c126_i32_176 = arith.constant 126 : i32
    %577 = tpu.dynamic_rotate %576 by %c126_i32_176 dim 1 : vector<16x128xf32>, i32 -> vector<16x128xf32>
    %578 = arith.addf %575, %577 : vector<16x128xf32>
    %579 = arith.mulf %569, %49 : vector<16x128xf32>
    %c125_i32_177 = arith.constant 125 : i32
    %580 = tpu.dynamic_rotate %579 by %c125_i32_177 dim 1 : vector<16x128xf32>, i32 -> vector<16x128xf32>
    %581 = arith.addf %578, %580 : vector<16x128xf32>
    %cst_178 = arith.constant 0.000000e+00 : f32
    %582 = vector.broadcast %cst_178 : f32 to vector<16x128xf32>
    %583 = arith.mulf %569, %28 : vector<16x128xf32>
    %c1_i32_179 = arith.constant 1 : i32
    %584 = tpu.dynamic_rotate %583 by %c1_i32_179 dim 1 : vector<16x128xf32>, i32 -> vector<16x128xf32>
    %585 = arith.addf %582, %584 : vector<16x128xf32>
    %586 = arith.mulf %569, %35 : vector<16x128xf32>
    %587 = arith.addf %585, %586 : vector<16x128xf32>
    %588 = arith.mulf %569, %42 : vector<16x128xf32>
    %c127_i32_180 = arith.constant 127 : i32
    %589 = tpu.dynamic_rotate %588 by %c127_i32_180 dim 1 : vector<16x128xf32>, i32 -> vector<16x128xf32>
    %590 = arith.addf %587, %589 : vector<16x128xf32>
    %591 = arith.mulf %569, %49 : vector<16x128xf32>
    %c126_i32_181 = arith.constant 126 : i32
    %592 = tpu.dynamic_rotate %591 by %c126_i32_181 dim 1 : vector<16x128xf32>, i32 -> vector<16x128xf32>
    %593 = arith.addf %590, %592 : vector<16x128xf32>
    %594 = arith.mulf %593, %7 : vector<16x128xf32>
    %c0_182 = arith.constant 0 : index
    %c4 = arith.constant 4 : index
    %c0_183 = arith.constant 0 : index
    %c0_184 = arith.constant 0 : index
    %595 = vector.load %arg1[%c0_182, %c4, %c0_183, %c0_184] : memref<1x8x16x128xf32, #tpu.memory_space<vmem>>, vector<1x1x16x128xf32>
    %596 = vector.shape_cast %595 : vector<1x1x16x128xf32> to vector<16x128xf32>
    %597 = arith.addf %594, %596 : vector<16x128xf32>
    %598 = arith.addf %494, %597 : vector<16x128xf32>
    %599 = arith.subf %598, %581 : vector<16x128xf32>
    %600 = arith.mulf %569, %21 : vector<16x128xf32>
    %c124_i32 = arith.constant 124 : i32
    %601 = tpu.dynamic_rotate %600 by %c124_i32 dim 1 : vector<16x128xf32>, i32 -> vector<16x128xf32>
    %602 = arith.addf %497, %601 : vector<16x128xf32>
    %cst_185 = arith.constant 2.000000e-01 : f32
    %603 = vector.broadcast %cst_185 : f32 to vector<16x128xf32>
    %604 = arith.mulf %599, %603 : vector<16x128xf32>
    %605 = arith.truncf %604 : vector<16x128xf32> to vector<16x128xbf16>
    %606 = arith.extf %605 : vector<16x128xbf16> to vector<16x128xf32>
    %607 = arith.subf %604, %606 : vector<16x128xf32>
    %c32_i32_186 = arith.constant 32 : i32
    %608 = tpu.dynamic_rotate %607 by %c32_i32_186 dim 1 : vector<16x128xf32>, i32 -> vector<16x128xf32>
    %609 = arith.addf %604, %608 : vector<16x128xf32>
    %c64_i32_187 = arith.constant 64 : i32
    %610 = tpu.dynamic_rotate %604 by %c64_i32_187 dim 1 : vector<16x128xf32>, i32 -> vector<16x128xf32>
    %611 = arith.addf %609, %610 : vector<16x128xf32>
    %612 = arith.truncf %611 : vector<16x128xf32> to vector<16x128xbf16>
    %cst_188 = arith.constant dense<0.000000e+00> : vector<16x128xf32>
    %613 = tpu.matmul %612, %50, %cst_188 {dimension_numbers = #tpu.dot_dimension_numbers<[1], [0], [0], [1], [0, 0, 1, 1], [], []>} : vector<16x128xbf16>, vector<128x128xbf16>, vector<16x128xf32> -> vector<16x128xf32>
    %614 = arith.addf %613, %55 : vector<16x128xf32>
    %615 = math.tanh %614 : vector<16x128xf32>
    %616 = arith.truncf %615 : vector<16x128xf32> to vector<16x128xbf16>
    %617 = arith.extf %616 : vector<16x128xbf16> to vector<16x128xf32>
    %618 = arith.subf %615, %617 : vector<16x128xf32>
    %c32_i32_189 = arith.constant 32 : i32
    %619 = tpu.dynamic_rotate %618 by %c32_i32_189 dim 1 : vector<16x128xf32>, i32 -> vector<16x128xf32>
    %620 = arith.addf %615, %619 : vector<16x128xf32>
    %c64_i32_190 = arith.constant 64 : i32
    %621 = tpu.dynamic_rotate %615 by %c64_i32_190 dim 1 : vector<16x128xf32>, i32 -> vector<16x128xf32>
    %622 = arith.addf %620, %621 : vector<16x128xf32>
    %623 = arith.truncf %622 : vector<16x128xf32> to vector<16x128xbf16>
    %cst_191 = arith.constant dense<0.000000e+00> : vector<16x128xf32>
    %624 = tpu.matmul %623, %51, %cst_191 {dimension_numbers = #tpu.dot_dimension_numbers<[1], [0], [0], [1], [0, 0, 1, 1], [], []>} : vector<16x128xbf16>, vector<128x128xbf16>, vector<16x128xf32> -> vector<16x128xf32>
    %625 = arith.addf %624, %58 : vector<16x128xf32>
    %626 = math.tanh %625 : vector<16x128xf32>
    %627 = arith.truncf %626 : vector<16x128xf32> to vector<16x128xbf16>
    %628 = arith.extf %627 : vector<16x128xbf16> to vector<16x128xf32>
    %629 = arith.subf %626, %628 : vector<16x128xf32>
    %c32_i32_192 = arith.constant 32 : i32
    %630 = tpu.dynamic_rotate %629 by %c32_i32_192 dim 1 : vector<16x128xf32>, i32 -> vector<16x128xf32>
    %631 = arith.addf %626, %630 : vector<16x128xf32>
    %c64_i32_193 = arith.constant 64 : i32
    %632 = tpu.dynamic_rotate %626 by %c64_i32_193 dim 1 : vector<16x128xf32>, i32 -> vector<16x128xf32>
    %633 = arith.addf %631, %632 : vector<16x128xf32>
    %634 = arith.truncf %633 : vector<16x128xf32> to vector<16x128xbf16>
    %cst_194 = arith.constant dense<0.000000e+00> : vector<16x128xf32>
    %635 = tpu.matmul %634, %52, %cst_194 {dimension_numbers = #tpu.dot_dimension_numbers<[1], [0], [0], [1], [0, 0, 1, 1], [], []>} : vector<16x128xbf16>, vector<128x128xbf16>, vector<16x128xf32> -> vector<16x128xf32>
    %636 = arith.addf %635, %61 : vector<16x128xf32>
    %cst_195 = arith.constant 5.000000e-01 : f32
    %637 = vector.broadcast %cst_195 : f32 to vector<16x128xf32>
    %638 = arith.mulf %637, %636 : vector<16x128xf32>
    %639 = math.tanh %638 : vector<16x128xf32>
    %cst_196 = arith.constant 1.000000e+00 : f32
    %640 = vector.broadcast %cst_196 : f32 to vector<16x128xf32>
    %641 = arith.addf %639, %640 : vector<16x128xf32>
    %cst_197 = arith.constant 5.000000e-01 : f32
    %642 = vector.broadcast %cst_197 : f32 to vector<16x128xf32>
    %643 = arith.mulf %642, %641 : vector<16x128xf32>
    %644 = arith.mulf %643, %14 : vector<16x128xf32>
    %cst_198 = arith.constant 0.000000e+00 : f32
    %645 = vector.broadcast %cst_198 : f32 to vector<16x128xf32>
    %646 = arith.mulf %599, %28 : vector<16x128xf32>
    %647 = arith.addf %645, %646 : vector<16x128xf32>
    %c1_i32_199 = arith.constant 1 : i32
    %648 = tpu.dynamic_rotate %599 by %c1_i32_199 dim 1 : vector<16x128xf32>, i32 -> vector<16x128xf32>
    %649 = arith.mulf %648, %35 : vector<16x128xf32>
    %650 = arith.addf %647, %649 : vector<16x128xf32>
    %c2_i32_200 = arith.constant 2 : i32
    %651 = tpu.dynamic_rotate %599 by %c2_i32_200 dim 1 : vector<16x128xf32>, i32 -> vector<16x128xf32>
    %652 = arith.mulf %651, %42 : vector<16x128xf32>
    %653 = arith.addf %650, %652 : vector<16x128xf32>
    %c3_i32_201 = arith.constant 3 : i32
    %654 = tpu.dynamic_rotate %599 by %c3_i32_201 dim 1 : vector<16x128xf32>, i32 -> vector<16x128xf32>
    %655 = arith.mulf %654, %49 : vector<16x128xf32>
    %656 = arith.addf %653, %655 : vector<16x128xf32>
    %657 = arith.subf %656, %64 : vector<16x128xf32>
    %cst_202 = arith.constant 0.000000e+00 : f32
    %658 = vector.broadcast %cst_202 : f32 to vector<16x128xf32>
    %659 = arith.maximumf %658, %657 : vector<16x128xf32>
    %cst_203 = arith.constant 1.960000e+01 : f32
    %660 = vector.broadcast %cst_203 : f32 to vector<16x128xf32>
    %661 = arith.mulf %660, %659 : vector<16x128xf32>
    %662 = math.sqrt %661 : vector<16x128xf32>
    %663 = arith.mulf %644, %662 : vector<16x128xf32>
    %664 = arith.mulf %659, %67 : vector<16x128xf32>
    %665 = arith.subf %664, %663 : vector<16x128xf32>
    %cst_204 = arith.constant 5.000000e-01 : f32
    %666 = vector.broadcast %cst_204 : f32 to vector<16x128xf32>
    %667 = arith.mulf %666, %665 : vector<16x128xf32>
    %668 = math.tanh %667 : vector<16x128xf32>
    %cst_205 = arith.constant 1.000000e+00 : f32
    %669 = vector.broadcast %cst_205 : f32 to vector<16x128xf32>
    %670 = arith.addf %668, %669 : vector<16x128xf32>
    %cst_206 = arith.constant 5.000000e-01 : f32
    %671 = vector.broadcast %cst_206 : f32 to vector<16x128xf32>
    %672 = arith.mulf %671, %670 : vector<16x128xf32>
    %673 = arith.mulf %663, %672 : vector<16x128xf32>
    %674 = arith.mulf %673, %67 : vector<16x128xf32>
    %cst_207 = arith.constant 0.000000e+00 : f32
    %675 = vector.broadcast %cst_207 : f32 to vector<16x128xf32>
    %676 = arith.mulf %674, %28 : vector<16x128xf32>
    %677 = arith.addf %675, %676 : vector<16x128xf32>
    %678 = arith.mulf %674, %35 : vector<16x128xf32>
    %c127_i32_208 = arith.constant 127 : i32
    %679 = tpu.dynamic_rotate %678 by %c127_i32_208 dim 1 : vector<16x128xf32>, i32 -> vector<16x128xf32>
    %680 = arith.addf %677, %679 : vector<16x128xf32>
    %681 = arith.mulf %674, %42 : vector<16x128xf32>
    %c126_i32_209 = arith.constant 126 : i32
    %682 = tpu.dynamic_rotate %681 by %c126_i32_209 dim 1 : vector<16x128xf32>, i32 -> vector<16x128xf32>
    %683 = arith.addf %680, %682 : vector<16x128xf32>
    %684 = arith.mulf %674, %49 : vector<16x128xf32>
    %c125_i32_210 = arith.constant 125 : i32
    %685 = tpu.dynamic_rotate %684 by %c125_i32_210 dim 1 : vector<16x128xf32>, i32 -> vector<16x128xf32>
    %686 = arith.addf %683, %685 : vector<16x128xf32>
    %cst_211 = arith.constant 0.000000e+00 : f32
    %687 = vector.broadcast %cst_211 : f32 to vector<16x128xf32>
    %688 = arith.mulf %674, %28 : vector<16x128xf32>
    %c1_i32_212 = arith.constant 1 : i32
    %689 = tpu.dynamic_rotate %688 by %c1_i32_212 dim 1 : vector<16x128xf32>, i32 -> vector<16x128xf32>
    %690 = arith.addf %687, %689 : vector<16x128xf32>
    %691 = arith.mulf %674, %35 : vector<16x128xf32>
    %692 = arith.addf %690, %691 : vector<16x128xf32>
    %693 = arith.mulf %674, %42 : vector<16x128xf32>
    %c127_i32_213 = arith.constant 127 : i32
    %694 = tpu.dynamic_rotate %693 by %c127_i32_213 dim 1 : vector<16x128xf32>, i32 -> vector<16x128xf32>
    %695 = arith.addf %692, %694 : vector<16x128xf32>
    %696 = arith.mulf %674, %49 : vector<16x128xf32>
    %c126_i32_214 = arith.constant 126 : i32
    %697 = tpu.dynamic_rotate %696 by %c126_i32_214 dim 1 : vector<16x128xf32>, i32 -> vector<16x128xf32>
    %698 = arith.addf %695, %697 : vector<16x128xf32>
    %699 = arith.mulf %698, %7 : vector<16x128xf32>
    %c0_215 = arith.constant 0 : index
    %c5 = arith.constant 5 : index
    %c0_216 = arith.constant 0 : index
    %c0_217 = arith.constant 0 : index
    %700 = vector.load %arg1[%c0_215, %c5, %c0_216, %c0_217] : memref<1x8x16x128xf32, #tpu.memory_space<vmem>>, vector<1x1x16x128xf32>
    %701 = vector.shape_cast %700 : vector<1x1x16x128xf32> to vector<16x128xf32>
    %702 = arith.addf %699, %701 : vector<16x128xf32>
    %703 = arith.addf %599, %702 : vector<16x128xf32>
    %704 = arith.subf %703, %686 : vector<16x128xf32>
    %705 = arith.mulf %674, %21 : vector<16x128xf32>
    %c125_i32_218 = arith.constant 125 : i32
    %706 = tpu.dynamic_rotate %705 by %c125_i32_218 dim 1 : vector<16x128xf32>, i32 -> vector<16x128xf32>
    %707 = arith.addf %602, %706 : vector<16x128xf32>
    %cst_219 = arith.constant 2.000000e-01 : f32
    %708 = vector.broadcast %cst_219 : f32 to vector<16x128xf32>
    %709 = arith.mulf %704, %708 : vector<16x128xf32>
    %710 = arith.truncf %709 : vector<16x128xf32> to vector<16x128xbf16>
    %711 = arith.extf %710 : vector<16x128xbf16> to vector<16x128xf32>
    %712 = arith.subf %709, %711 : vector<16x128xf32>
    %c32_i32_220 = arith.constant 32 : i32
    %713 = tpu.dynamic_rotate %712 by %c32_i32_220 dim 1 : vector<16x128xf32>, i32 -> vector<16x128xf32>
    %714 = arith.addf %709, %713 : vector<16x128xf32>
    %c64_i32_221 = arith.constant 64 : i32
    %715 = tpu.dynamic_rotate %709 by %c64_i32_221 dim 1 : vector<16x128xf32>, i32 -> vector<16x128xf32>
    %716 = arith.addf %714, %715 : vector<16x128xf32>
    %717 = arith.truncf %716 : vector<16x128xf32> to vector<16x128xbf16>
    %cst_222 = arith.constant dense<0.000000e+00> : vector<16x128xf32>
    %718 = tpu.matmul %717, %50, %cst_222 {dimension_numbers = #tpu.dot_dimension_numbers<[1], [0], [0], [1], [0, 0, 1, 1], [], []>} : vector<16x128xbf16>, vector<128x128xbf16>, vector<16x128xf32> -> vector<16x128xf32>
    %719 = arith.addf %718, %55 : vector<16x128xf32>
    %720 = math.tanh %719 : vector<16x128xf32>
    %721 = arith.truncf %720 : vector<16x128xf32> to vector<16x128xbf16>
    %722 = arith.extf %721 : vector<16x128xbf16> to vector<16x128xf32>
    %723 = arith.subf %720, %722 : vector<16x128xf32>
    %c32_i32_223 = arith.constant 32 : i32
    %724 = tpu.dynamic_rotate %723 by %c32_i32_223 dim 1 : vector<16x128xf32>, i32 -> vector<16x128xf32>
    %725 = arith.addf %720, %724 : vector<16x128xf32>
    %c64_i32_224 = arith.constant 64 : i32
    %726 = tpu.dynamic_rotate %720 by %c64_i32_224 dim 1 : vector<16x128xf32>, i32 -> vector<16x128xf32>
    %727 = arith.addf %725, %726 : vector<16x128xf32>
    %728 = arith.truncf %727 : vector<16x128xf32> to vector<16x128xbf16>
    %cst_225 = arith.constant dense<0.000000e+00> : vector<16x128xf32>
    %729 = tpu.matmul %728, %51, %cst_225 {dimension_numbers = #tpu.dot_dimension_numbers<[1], [0], [0], [1], [0, 0, 1, 1], [], []>} : vector<16x128xbf16>, vector<128x128xbf16>, vector<16x128xf32> -> vector<16x128xf32>
    %730 = arith.addf %729, %58 : vector<16x128xf32>
    %731 = math.tanh %730 : vector<16x128xf32>
    %732 = arith.truncf %731 : vector<16x128xf32> to vector<16x128xbf16>
    %733 = arith.extf %732 : vector<16x128xbf16> to vector<16x128xf32>
    %734 = arith.subf %731, %733 : vector<16x128xf32>
    %c32_i32_226 = arith.constant 32 : i32
    %735 = tpu.dynamic_rotate %734 by %c32_i32_226 dim 1 : vector<16x128xf32>, i32 -> vector<16x128xf32>
    %736 = arith.addf %731, %735 : vector<16x128xf32>
    %c64_i32_227 = arith.constant 64 : i32
    %737 = tpu.dynamic_rotate %731 by %c64_i32_227 dim 1 : vector<16x128xf32>, i32 -> vector<16x128xf32>
    %738 = arith.addf %736, %737 : vector<16x128xf32>
    %739 = arith.truncf %738 : vector<16x128xf32> to vector<16x128xbf16>
    %cst_228 = arith.constant dense<0.000000e+00> : vector<16x128xf32>
    %740 = tpu.matmul %739, %52, %cst_228 {dimension_numbers = #tpu.dot_dimension_numbers<[1], [0], [0], [1], [0, 0, 1, 1], [], []>} : vector<16x128xbf16>, vector<128x128xbf16>, vector<16x128xf32> -> vector<16x128xf32>
    %741 = arith.addf %740, %61 : vector<16x128xf32>
    %cst_229 = arith.constant 5.000000e-01 : f32
    %742 = vector.broadcast %cst_229 : f32 to vector<16x128xf32>
    %743 = arith.mulf %742, %741 : vector<16x128xf32>
    %744 = math.tanh %743 : vector<16x128xf32>
    %cst_230 = arith.constant 1.000000e+00 : f32
    %745 = vector.broadcast %cst_230 : f32 to vector<16x128xf32>
    %746 = arith.addf %744, %745 : vector<16x128xf32>
    %cst_231 = arith.constant 5.000000e-01 : f32
    %747 = vector.broadcast %cst_231 : f32 to vector<16x128xf32>
    %748 = arith.mulf %747, %746 : vector<16x128xf32>
    %749 = arith.mulf %748, %14 : vector<16x128xf32>
    %cst_232 = arith.constant 0.000000e+00 : f32
    %750 = vector.broadcast %cst_232 : f32 to vector<16x128xf32>
    %751 = arith.mulf %704, %28 : vector<16x128xf32>
    %752 = arith.addf %750, %751 : vector<16x128xf32>
    %c1_i32_233 = arith.constant 1 : i32
    %753 = tpu.dynamic_rotate %704 by %c1_i32_233 dim 1 : vector<16x128xf32>, i32 -> vector<16x128xf32>
    %754 = arith.mulf %753, %35 : vector<16x128xf32>
    %755 = arith.addf %752, %754 : vector<16x128xf32>
    %c2_i32_234 = arith.constant 2 : i32
    %756 = tpu.dynamic_rotate %704 by %c2_i32_234 dim 1 : vector<16x128xf32>, i32 -> vector<16x128xf32>
    %757 = arith.mulf %756, %42 : vector<16x128xf32>
    %758 = arith.addf %755, %757 : vector<16x128xf32>
    %c3_i32_235 = arith.constant 3 : i32
    %759 = tpu.dynamic_rotate %704 by %c3_i32_235 dim 1 : vector<16x128xf32>, i32 -> vector<16x128xf32>
    %760 = arith.mulf %759, %49 : vector<16x128xf32>
    %761 = arith.addf %758, %760 : vector<16x128xf32>
    %762 = arith.subf %761, %64 : vector<16x128xf32>
    %cst_236 = arith.constant 0.000000e+00 : f32
    %763 = vector.broadcast %cst_236 : f32 to vector<16x128xf32>
    %764 = arith.maximumf %763, %762 : vector<16x128xf32>
    %cst_237 = arith.constant 1.960000e+01 : f32
    %765 = vector.broadcast %cst_237 : f32 to vector<16x128xf32>
    %766 = arith.mulf %765, %764 : vector<16x128xf32>
    %767 = math.sqrt %766 : vector<16x128xf32>
    %768 = arith.mulf %749, %767 : vector<16x128xf32>
    %769 = arith.mulf %764, %67 : vector<16x128xf32>
    %770 = arith.subf %769, %768 : vector<16x128xf32>
    %cst_238 = arith.constant 5.000000e-01 : f32
    %771 = vector.broadcast %cst_238 : f32 to vector<16x128xf32>
    %772 = arith.mulf %771, %770 : vector<16x128xf32>
    %773 = math.tanh %772 : vector<16x128xf32>
    %cst_239 = arith.constant 1.000000e+00 : f32
    %774 = vector.broadcast %cst_239 : f32 to vector<16x128xf32>
    %775 = arith.addf %773, %774 : vector<16x128xf32>
    %cst_240 = arith.constant 5.000000e-01 : f32
    %776 = vector.broadcast %cst_240 : f32 to vector<16x128xf32>
    %777 = arith.mulf %776, %775 : vector<16x128xf32>
    %778 = arith.mulf %768, %777 : vector<16x128xf32>
    %779 = arith.mulf %778, %67 : vector<16x128xf32>
    %cst_241 = arith.constant 0.000000e+00 : f32
    %780 = vector.broadcast %cst_241 : f32 to vector<16x128xf32>
    %781 = arith.mulf %779, %28 : vector<16x128xf32>
    %782 = arith.addf %780, %781 : vector<16x128xf32>
    %783 = arith.mulf %779, %35 : vector<16x128xf32>
    %c127_i32_242 = arith.constant 127 : i32
    %784 = tpu.dynamic_rotate %783 by %c127_i32_242 dim 1 : vector<16x128xf32>, i32 -> vector<16x128xf32>
    %785 = arith.addf %782, %784 : vector<16x128xf32>
    %786 = arith.mulf %779, %42 : vector<16x128xf32>
    %c126_i32_243 = arith.constant 126 : i32
    %787 = tpu.dynamic_rotate %786 by %c126_i32_243 dim 1 : vector<16x128xf32>, i32 -> vector<16x128xf32>
    %788 = arith.addf %785, %787 : vector<16x128xf32>
    %789 = arith.mulf %779, %49 : vector<16x128xf32>
    %c125_i32_244 = arith.constant 125 : i32
    %790 = tpu.dynamic_rotate %789 by %c125_i32_244 dim 1 : vector<16x128xf32>, i32 -> vector<16x128xf32>
    %791 = arith.addf %788, %790 : vector<16x128xf32>
    %cst_245 = arith.constant 0.000000e+00 : f32
    %792 = vector.broadcast %cst_245 : f32 to vector<16x128xf32>
    %793 = arith.mulf %779, %28 : vector<16x128xf32>
    %c1_i32_246 = arith.constant 1 : i32
    %794 = tpu.dynamic_rotate %793 by %c1_i32_246 dim 1 : vector<16x128xf32>, i32 -> vector<16x128xf32>
    %795 = arith.addf %792, %794 : vector<16x128xf32>
    %796 = arith.mulf %779, %35 : vector<16x128xf32>
    %797 = arith.addf %795, %796 : vector<16x128xf32>
    %798 = arith.mulf %779, %42 : vector<16x128xf32>
    %c127_i32_247 = arith.constant 127 : i32
    %799 = tpu.dynamic_rotate %798 by %c127_i32_247 dim 1 : vector<16x128xf32>, i32 -> vector<16x128xf32>
    %800 = arith.addf %797, %799 : vector<16x128xf32>
    %801 = arith.mulf %779, %49 : vector<16x128xf32>
    %c126_i32_248 = arith.constant 126 : i32
    %802 = tpu.dynamic_rotate %801 by %c126_i32_248 dim 1 : vector<16x128xf32>, i32 -> vector<16x128xf32>
    %803 = arith.addf %800, %802 : vector<16x128xf32>
    %804 = arith.mulf %803, %7 : vector<16x128xf32>
    %c0_249 = arith.constant 0 : index
    %c6 = arith.constant 6 : index
    %c0_250 = arith.constant 0 : index
    %c0_251 = arith.constant 0 : index
    %805 = vector.load %arg1[%c0_249, %c6, %c0_250, %c0_251] : memref<1x8x16x128xf32, #tpu.memory_space<vmem>>, vector<1x1x16x128xf32>
    %806 = vector.shape_cast %805 : vector<1x1x16x128xf32> to vector<16x128xf32>
    %807 = arith.addf %804, %806 : vector<16x128xf32>
    %808 = arith.addf %704, %807 : vector<16x128xf32>
    %809 = arith.subf %808, %791 : vector<16x128xf32>
    %810 = arith.mulf %779, %21 : vector<16x128xf32>
    %c126_i32_252 = arith.constant 126 : i32
    %811 = tpu.dynamic_rotate %810 by %c126_i32_252 dim 1 : vector<16x128xf32>, i32 -> vector<16x128xf32>
    %812 = arith.addf %707, %811 : vector<16x128xf32>
    %cst_253 = arith.constant 2.000000e-01 : f32
    %813 = vector.broadcast %cst_253 : f32 to vector<16x128xf32>
    %814 = arith.mulf %809, %813 : vector<16x128xf32>
    %815 = arith.truncf %814 : vector<16x128xf32> to vector<16x128xbf16>
    %816 = arith.extf %815 : vector<16x128xbf16> to vector<16x128xf32>
    %817 = arith.subf %814, %816 : vector<16x128xf32>
    %c32_i32_254 = arith.constant 32 : i32
    %818 = tpu.dynamic_rotate %817 by %c32_i32_254 dim 1 : vector<16x128xf32>, i32 -> vector<16x128xf32>
    %819 = arith.addf %814, %818 : vector<16x128xf32>
    %c64_i32_255 = arith.constant 64 : i32
    %820 = tpu.dynamic_rotate %814 by %c64_i32_255 dim 1 : vector<16x128xf32>, i32 -> vector<16x128xf32>
    %821 = arith.addf %819, %820 : vector<16x128xf32>
    %822 = arith.truncf %821 : vector<16x128xf32> to vector<16x128xbf16>
    %cst_256 = arith.constant dense<0.000000e+00> : vector<16x128xf32>
    %823 = tpu.matmul %822, %50, %cst_256 {dimension_numbers = #tpu.dot_dimension_numbers<[1], [0], [0], [1], [0, 0, 1, 1], [], []>} : vector<16x128xbf16>, vector<128x128xbf16>, vector<16x128xf32> -> vector<16x128xf32>
    %824 = arith.addf %823, %55 : vector<16x128xf32>
    %825 = math.tanh %824 : vector<16x128xf32>
    %826 = arith.truncf %825 : vector<16x128xf32> to vector<16x128xbf16>
    %827 = arith.extf %826 : vector<16x128xbf16> to vector<16x128xf32>
    %828 = arith.subf %825, %827 : vector<16x128xf32>
    %c32_i32_257 = arith.constant 32 : i32
    %829 = tpu.dynamic_rotate %828 by %c32_i32_257 dim 1 : vector<16x128xf32>, i32 -> vector<16x128xf32>
    %830 = arith.addf %825, %829 : vector<16x128xf32>
    %c64_i32_258 = arith.constant 64 : i32
    %831 = tpu.dynamic_rotate %825 by %c64_i32_258 dim 1 : vector<16x128xf32>, i32 -> vector<16x128xf32>
    %832 = arith.addf %830, %831 : vector<16x128xf32>
    %833 = arith.truncf %832 : vector<16x128xf32> to vector<16x128xbf16>
    %cst_259 = arith.constant dense<0.000000e+00> : vector<16x128xf32>
    %834 = tpu.matmul %833, %51, %cst_259 {dimension_numbers = #tpu.dot_dimension_numbers<[1], [0], [0], [1], [0, 0, 1, 1], [], []>} : vector<16x128xbf16>, vector<128x128xbf16>, vector<16x128xf32> -> vector<16x128xf32>
    %835 = arith.addf %834, %58 : vector<16x128xf32>
    %836 = math.tanh %835 : vector<16x128xf32>
    %837 = arith.truncf %836 : vector<16x128xf32> to vector<16x128xbf16>
    %838 = arith.extf %837 : vector<16x128xbf16> to vector<16x128xf32>
    %839 = arith.subf %836, %838 : vector<16x128xf32>
    %c32_i32_260 = arith.constant 32 : i32
    %840 = tpu.dynamic_rotate %839 by %c32_i32_260 dim 1 : vector<16x128xf32>, i32 -> vector<16x128xf32>
    %841 = arith.addf %836, %840 : vector<16x128xf32>
    %c64_i32_261 = arith.constant 64 : i32
    %842 = tpu.dynamic_rotate %836 by %c64_i32_261 dim 1 : vector<16x128xf32>, i32 -> vector<16x128xf32>
    %843 = arith.addf %841, %842 : vector<16x128xf32>
    %844 = arith.truncf %843 : vector<16x128xf32> to vector<16x128xbf16>
    %cst_262 = arith.constant dense<0.000000e+00> : vector<16x128xf32>
    %845 = tpu.matmul %844, %52, %cst_262 {dimension_numbers = #tpu.dot_dimension_numbers<[1], [0], [0], [1], [0, 0, 1, 1], [], []>} : vector<16x128xbf16>, vector<128x128xbf16>, vector<16x128xf32> -> vector<16x128xf32>
    %846 = arith.addf %845, %61 : vector<16x128xf32>
    %cst_263 = arith.constant 5.000000e-01 : f32
    %847 = vector.broadcast %cst_263 : f32 to vector<16x128xf32>
    %848 = arith.mulf %847, %846 : vector<16x128xf32>
    %849 = math.tanh %848 : vector<16x128xf32>
    %cst_264 = arith.constant 1.000000e+00 : f32
    %850 = vector.broadcast %cst_264 : f32 to vector<16x128xf32>
    %851 = arith.addf %849, %850 : vector<16x128xf32>
    %cst_265 = arith.constant 5.000000e-01 : f32
    %852 = vector.broadcast %cst_265 : f32 to vector<16x128xf32>
    %853 = arith.mulf %852, %851 : vector<16x128xf32>
    %854 = arith.mulf %853, %14 : vector<16x128xf32>
    %cst_266 = arith.constant 0.000000e+00 : f32
    %855 = vector.broadcast %cst_266 : f32 to vector<16x128xf32>
    %856 = arith.mulf %809, %28 : vector<16x128xf32>
    %857 = arith.addf %855, %856 : vector<16x128xf32>
    %c1_i32_267 = arith.constant 1 : i32
    %858 = tpu.dynamic_rotate %809 by %c1_i32_267 dim 1 : vector<16x128xf32>, i32 -> vector<16x128xf32>
    %859 = arith.mulf %858, %35 : vector<16x128xf32>
    %860 = arith.addf %857, %859 : vector<16x128xf32>
    %c2_i32_268 = arith.constant 2 : i32
    %861 = tpu.dynamic_rotate %809 by %c2_i32_268 dim 1 : vector<16x128xf32>, i32 -> vector<16x128xf32>
    %862 = arith.mulf %861, %42 : vector<16x128xf32>
    %863 = arith.addf %860, %862 : vector<16x128xf32>
    %c3_i32_269 = arith.constant 3 : i32
    %864 = tpu.dynamic_rotate %809 by %c3_i32_269 dim 1 : vector<16x128xf32>, i32 -> vector<16x128xf32>
    %865 = arith.mulf %864, %49 : vector<16x128xf32>
    %866 = arith.addf %863, %865 : vector<16x128xf32>
    %867 = arith.subf %866, %64 : vector<16x128xf32>
    %cst_270 = arith.constant 0.000000e+00 : f32
    %868 = vector.broadcast %cst_270 : f32 to vector<16x128xf32>
    %869 = arith.maximumf %868, %867 : vector<16x128xf32>
    %cst_271 = arith.constant 1.960000e+01 : f32
    %870 = vector.broadcast %cst_271 : f32 to vector<16x128xf32>
    %871 = arith.mulf %870, %869 : vector<16x128xf32>
    %872 = math.sqrt %871 : vector<16x128xf32>
    %873 = arith.mulf %854, %872 : vector<16x128xf32>
    %874 = arith.mulf %869, %67 : vector<16x128xf32>
    %875 = arith.subf %874, %873 : vector<16x128xf32>
    %cst_272 = arith.constant 5.000000e-01 : f32
    %876 = vector.broadcast %cst_272 : f32 to vector<16x128xf32>
    %877 = arith.mulf %876, %875 : vector<16x128xf32>
    %878 = math.tanh %877 : vector<16x128xf32>
    %cst_273 = arith.constant 1.000000e+00 : f32
    %879 = vector.broadcast %cst_273 : f32 to vector<16x128xf32>
    %880 = arith.addf %878, %879 : vector<16x128xf32>
    %cst_274 = arith.constant 5.000000e-01 : f32
    %881 = vector.broadcast %cst_274 : f32 to vector<16x128xf32>
    %882 = arith.mulf %881, %880 : vector<16x128xf32>
    %883 = arith.mulf %873, %882 : vector<16x128xf32>
    %884 = arith.mulf %883, %67 : vector<16x128xf32>
    %885 = arith.mulf %884, %21 : vector<16x128xf32>
    %c127_i32_275 = arith.constant 127 : i32
    %886 = tpu.dynamic_rotate %885 by %c127_i32_275 dim 1 : vector<16x128xf32>, i32 -> vector<16x128xf32>
    %887 = arith.addf %812, %886 : vector<16x128xf32>
    %c0_276 = arith.constant 0 : index
    %c0_277 = arith.constant 0 : index
    %c0_278 = arith.constant 0 : index
    %888 = vector.load %arg10[%c0_276, %c0_277, %c0_278] : memref<1x16x128xf32, #tpu.memory_space<vmem>>, vector<1x16x128xf32>
    %889 = vector.shape_cast %888 : vector<1x16x128xf32> to vector<16x128xf32>
    %890 = vector.shape_cast %887 : vector<16x128xf32> to vector<1x16x128xf32>
    tpu.vector_store %arg10[%c0_276, %c0_277, %c0_278], %890 {strides = array<i32>} : memref<1x16x128xf32, #tpu.memory_space<vmem>>, vector<1x16x128xf32>,
    return
  }
  func.func @transform_0(%arg0: i32) -> (i32, i32, i32, i32) {
    %c0_i32 = arith.constant 0 : i32
    %c0_i32_0 = arith.constant 0 : i32
    %c0_i32_1 = arith.constant 0 : i32
    %c0_i32_2 = arith.constant 0 : i32
    return %arg0, %c0_i32, %c0_i32_0, %c0_i32_1 : i32, i32, i32, i32
  }
  func.func @transform_1(%arg0: i32) -> (i32, i32) {
    %c0_i32 = arith.constant 0 : i32
    %c0_i32_0 = arith.constant 0 : i32
    %c0_i32_1 = arith.constant 0 : i32
    return %c0_i32, %c0_i32_0 : i32, i32
  }
  func.func @transform_2(%arg0: i32) -> (i32, i32) {
    %c0_i32 = arith.constant 0 : i32
    %c0_i32_0 = arith.constant 0 : i32
    %c0_i32_1 = arith.constant 0 : i32
    return %c0_i32, %c0_i32_0 : i32, i32
  }
  func.func @transform_3(%arg0: i32) -> (i32, i32) {
    %c0_i32 = arith.constant 0 : i32
    %c0_i32_0 = arith.constant 0 : i32
    %c0_i32_1 = arith.constant 0 : i32
    return %c0_i32, %c0_i32_0 : i32, i32
  }
  func.func @transform_4(%arg0: i32) -> (i32, i32) {
    %c0_i32 = arith.constant 0 : i32
    %c0_i32_0 = arith.constant 0 : i32
    %c0_i32_1 = arith.constant 0 : i32
    return %c0_i32, %c0_i32_0 : i32, i32
  }
  func.func @transform_5(%arg0: i32) -> (i32, i32) {
    %c0_i32 = arith.constant 0 : i32
    %c0_i32_0 = arith.constant 0 : i32
    %c0_i32_1 = arith.constant 0 : i32
    return %c0_i32, %c0_i32_0 : i32, i32
  }
  func.func @transform_6(%arg0: i32) -> (i32, i32) {
    %c0_i32 = arith.constant 0 : i32
    %c0_i32_0 = arith.constant 0 : i32
    %c0_i32_1 = arith.constant 0 : i32
    return %c0_i32, %c0_i32_0 : i32, i32
  }
  func.func @transform_7(%arg0: i32) -> (i32, i32) {
    %c0_i32 = arith.constant 0 : i32
    %c0_i32_0 = arith.constant 0 : i32
    %c0_i32_1 = arith.constant 0 : i32
    return %c0_i32, %c0_i32_0 : i32, i32
  }
  func.func @transform_8(%arg0: i32) -> (i32, i32) {
    %c0_i32 = arith.constant 0 : i32
    %c0_i32_0 = arith.constant 0 : i32
    %c0_i32_1 = arith.constant 0 : i32
    return %c0_i32, %c0_i32_0 : i32, i32
  }
  func.func @transform_9(%arg0: i32) -> (i32, i32, i32) {
    %c0_i32 = arith.constant 0 : i32
    %c0_i32_0 = arith.constant 0 : i32
    %c0_i32_1 = arith.constant 0 : i32
    return %arg0, %c0_i32, %c0_i32_0 : i32, i32, i32
  }
}

</mosaic_0001>

<bundles_post_ra>
// kernel: tpu_custom_call.1
= control target key start
LH: loop header
LB: loop body
LE: loop exit
PB: predicated region body
PF: predicated region fallthrough
CT: control target
= control target key end

     0   :  { %s4729_s0 = inlined_call_operand.hbm [shape: f32[2,8,16,128], index: 0, kind: input, shape index: {}]   ;;  %s4730_s1 = inlined_call_operand.hbm [shape: bf16[128,128], index: 1, kind: input, shape index: {}]   ;;  %s4731_s2 = inlined_call_operand.vmem [shape: f32[1,128], index: 2, kind: input, shape index: {}]   ;;  %s4732_s3 = inlined_call_operand.hbm [shape: bf16[128,128], index: 3, kind: input, shape index: {}]   ;;  %s4733_s4 = inlined_call_operand.vmem [shape: f32[1,128], index: 4, kind: input, shape index: {}]   ;;  %s4734_s5 = inlined_call_operand.hbm [shape: bf16[128,128], index: 5, kind: input, shape index: {}]   ;;  %s4735_s6 = inlined_call_operand.vmem [shape: f32[1,128], index: 6, kind: input, shape index: {}]   ;;  %s4736_s7 = inlined_call_operand.vmem [shape: f32[1,128], index: 7, kind: input, shape index: {}]   ;;  %s4737_s8 = inlined_call_operand.vmem [shape: f32[1,128], index: 8, kind: input, shape index: {}]   ;;  %s4738_s9 = inlined_call_operand.hbm [shape: f32[2,16,128], index: 9, kind: output, shape index: {}]  }
   0x1   :  { %4745 = sst [smem:[#allocation21_spill]] %s4730_s1 }
   0x2   :  { %4746 = sst [smem:[#allocation22_spill]] %s4732_s3 }
   0x3   :  { %4747 = sst [smem:[#allocation23_spill]] %s4734_s5 }
   0x4   :  { %14 = vsyncpa [#allocation3], 0 }
   0x5   :  { %16 = vsyncpa [#allocation3 + $0x1], 0 }
   0x6   :  { %17 = vsyncpa [#allocation6], 0 }
   0x7   :  { %18 = vsyncpa [#allocation9], 0 }
   0x8   :  { %19 = vsyncpa [#allocation4], 0 }
   0x9   :  { %21 = vsyncpa [#allocation4 + $0x1], 0  ;;  %s3462_s30 = smov 0   ;;  %s3464_s10 = smov 0  }
   0xa   :  { %s3466_s11 = smov 0   ;;  %s3468_s12 = smov 0  }
   0xb LB: > { %s3483_s13 = sadd.s32 4294967295, %s3387_s12   ;;  %s2736_s14 = sadd.s32 4294967294, %s3387_s12   ;;  %s3387_s12 = sphi %s3468_s12, %s4773_s12   ;;  %s3383_s11 = sphi %s3466_s11, %s4772_s11   ;;  %s3379_s10 = sphi %s3464_s10, %s4771_s10   ;;  %s3375_s30 = sphi %s3462_s30, %s4770_s30  }
   0xc   : > { %p47_p0 = scmp.ne.s32.totalorder %s3379_s10, %s3375_s30  ;;  %p48_p1 = scmp.eq.s32.totalorder %s3483_s13, 0 }
   0xd   : > { %p239_p2 = scmp.eq.s32.totalorder %s3483_s13, 1  ;;  %p245_p3 = scmp.eq.s32.totalorder %s2736_s14, 1 }
   0xe   : > { %p3492_p4 = por %p48_p1, %p47_p0  ;;  %p2737_p5 = scmp.ge.s32.totalorder %s3387_s12, 1 }
   0xf   : > { %p3497_p6 = por %p245_p3, %p47_p0  ;;  %p252_p7 = scmp.lt.s32.totalorder %s3387_s12, 3 }
  0x10   : > { %s4750_s1 = sld [smem:[#allocation21_spill]]  ;;  %s3389_s21 = smov [#allocation5]  }
  0x11   : > { %p3505_p8 = pnand %p2737_p5, %p252_p7  ;;  %s265_s22 = sshll.u32 %s3389_s21, 4  ;;  %s266_s22 = int_to_ptr.vmem [resolvable:$true] %s265_s22 }
  0x12   : > { %s4753_s3 = sld [smem:[#allocation22_spill]]  ;;  %s3390_s27 = smov 64  }
  0x13   : > { %p2914_p9 = pneg %p3505_p8  ;;  %s3391_s28 = smov 4  }
  0x14   : > { %s3392_s29 = smov [#allocation7]   ;;  %s4754_s5 = sld [smem:[#allocation23_spill]] }
  0x15   : > { %p3513_p10 = pnand %p2914_p9, %p48_p1  ;;  %s282_s14 = sshll.u32 %s3392_s29, 4  ;;  %s283_s14 = int_to_ptr.vmem [resolvable:$true] %s282_s14 }
  0x16   : > { %s263_s19 = sshll.u32 %s4750_s1, 4  ;;  %s3393_s24 = smov [#allocation8]   ;;  %s264_s19 = int_to_ptr.hbm [resolvable:$true] %s263_s19 }
  0x17   : > { %2917 = dma.hbm_to_vmem [thread:$0]  (!%p3513_p10), %s264_s19, 1024, %s266_s22, [#allocation6], %s3390_s27, %s3390_s27, %s3391_s28  }
  0x18   : > { %s280_s26 = sshll.u32 %s4753_s3, 4  ;;  %s299_s25 = sshll.u32 %s3393_s24, 4  ;;  %s281_s26 = int_to_ptr.hbm [resolvable:$true] %s280_s26  ;;  %s300_s25 = int_to_ptr.vmem [resolvable:$true] %s299_s25 }
  0x19   : > { %2920 = dma.hbm_to_vmem [thread:$0]  (!%p3513_p10), %s281_s26, 1024, %s283_s14, [#allocation6], %s3390_s27, %s3390_s27, %s3391_s28  }
  0x1a   : > { %s297_s21 = sshll.u32 %s4754_s5, 4  ;;  %s3529_s19 = sadd.s32 1, %s3387_s12   ;;  %s298_s21 = int_to_ptr.hbm [resolvable:$true] %s297_s21 }
  0x1b   : > { %2923 = dma.hbm_to_vmem [thread:$0]  (!%p3513_p10), %s298_s21, 1024, %s300_s25, [#allocation9], %s3390_s27, %s3390_s27, %s3391_s28  }
  0x1c   : > { %s31_s22 = ssub.s32 %s3387_s12, %s3529_s19  ;;  %s34_s29 = sadd.s32 1, %s3383_s11 }
  0x1d   : > { %p32_p12 = scmp.eq.s32.totalorder %s31_s22, 0  ;;  %p41_p13 = scmp.ne.s32.totalorder %s3383_s11, %s3379_s10 }
  0x1e   : > { %p42_p0 = scmp.eq.s32.totalorder %s3387_s12, 0  ;;  %p2935_p3 = scmp.lt.s32.totalorder %s3387_s12, 2 }
  0x1f   : > { %s3541_s17 = scalar_select %p32_p12, %s3383_s11, %s34_s29  }
  0x20   : > { %p43_p5 = por %p42_p0, %p41_p13  ;;  %p3545_p7 = por %p239_p2, %p41_p13 }
  0x21   : > { %s322_s14 = sand.u32 1, %s3383_s11   ;;  %s2872_s18 = sshll.u32 %s3387_s12, 7 }
  0x22   : > { %s2742_s23 = sshll.u32 %s322_s14, 7  ;;  %s331_s28 = scalar_lea.hbm %s4729_s0, %s2872_s18 }
  0x23   : > { %s332_s21 = sshll.u32 %s331_s28, 4  ;;  %s326_s25 = scalar_lea.vmem [#allocation2], %s2742_s23  ;;  %s333_s21 = int_to_ptr.hbm [resolvable:$true] %s332_s21 }
  0x24   : > { %s334_s22 = sshll.u32 %s326_s25, 4  ;;  %p3556_p9 = pnand %p2935_p3, %p43_p5  ;;  %s335_s22 = int_to_ptr.vmem [resolvable:$true] %s334_s22 }
  0x25   : > { %s323_s1 = scalar_lea.sflag [#allocation3], %s322_s14  ;;  %s3283_s3 = sshra.s32 %s333_s21, 4  ;;  %s3284_s3 = int_to_ptr.hbm [resolvable:$true] %s3283_s3 }
  0x26   : > { %s3285_s5 = scalar_lea.hbm %s3284_s3, 128  ;;  %p3287_p10 = pneg %p3556_p9 }
  0x27   : > { %p3286_p2 = scmp.ne.s32.totalorder %s3284_s3, %s3285_s5  ;;  %s3290_s24 = scalar_lea.hbm %s4729_s0, 256 }
  0x28   : > { %p3291_p0 = scmp.lt.s32.totalorder %s3284_s3, %s4729_s0  ;;  %p3292_p3 = scmp.lt.s32.totalorder %s3290_s24, %s3285_s5 }
  0x29   : > { %p3288_p12 = pnand %p3287_p10, %p3286_p2 }
  0x2a   : > { %p3293_p5 = por %p3292_p3, %p3291_p0 }
  0x2b   : > { %p3289_p13 = pneg %p3288_p12 }
  0x2d   : > { %p3294_p11 = pnand %p3293_p5, %p3289_p13 }
  0x2f   : > { %3297 = shalt.err (!%p3294_p11)
}
  0x30   : > { %s3394_s14 = smov 128   ;;  %s3395_s25 = smov 8  }
  0x31   : > { %2927 = dma.hbm_to_vmem [thread:$0]  (!%p3556_p9), %s333_s21, 2048, %s335_s22, %s323_s1, %s3394_s14, %s3394_s14, %s3395_s25  }
  0x32   : > { %346 = sbr.rel (%p3505_p8) target bundleno = 7923 (0x1ef3), region = 56 }
  0x37   : > { %s3573_s18 = sand.u32 1, %s3379_s10  }
  0x38   : > { %s2746_s23 = sshll.u32 %s3573_s18, 7  ;;  %s349_s3 = scalar_lea.sflag [#allocation3], %s3573_s18 }
  0x39   : > { %s3577_s5 = scalar_lea.vmem [#allocation2], %s2746_s23 }
  0x3a   : > { %3358 = dma.done.wait (%p3492_p4), %s349_s3, 2048  }
  0x3b   : > { %3360 = vsyncadd (%p3492_p4), %s349_s3, 4294965248 }
  0x3c   : > { %3362 = dma.done.wait (%p48_p1), [#allocation6], 2048  }
  0x3d   : > { %3364 = vsyncadd (%p48_p1), [#allocation6], 4294965248  ;;  %v403_v0 = vlaneseq }
  0x3e   : > { %3366 = dma.done.wait (%p48_p1), [#allocation9], 1024  }
  0x3f   : > { %3368 = vsyncadd (%p48_p1), [#allocation9], 4294966272  ;;  %v404_v1 = vand.u32 127, %v403_v0  ;;  %v3396_v2 = vmov 0.0   ;;  %v3602_v8 = vld [vmem:[#allocation5 + $0x38] sm:$0xff]  ;;  %v3612_v12 = vld [vmem:[#allocation5 + $0x30] sm:$0xff] }
  0x40   : > { %567 = vmatpush.bf16.msra.mxu0 %v3602_v8  ;;  %890 = vmatpush.bf16.msra.mxu3 %v3602_v8  ;;  %v3620_v17 = vld [vmem:[#allocation5 + $0x28] sm:$0xff]  ;;  %s3397_s1 = smov 32   ;;  %v3625_v19 = vld [vmem:[#allocation5 + $0x20] sm:$0xff]  ;;  %v3629_v20 = vld [vmem:[#allocation5 + $0x18] sm:$0xff]  ;;  %s3398_s15 = smov 64  }
  0x41   : > { %vm406_vm0 = vcmp.lt.s32.totalorder %v404_v1, 6  ;;  %vm411_vm1 = vcmp.lt.s32.totalorder %v404_v1, 9  ;;  %vm415_vm2 = vcmp.ge.s32.totalorder %v404_v1, 8  ;;  %vm419_vm3 = vcmp.lt.s32.totalorder %v404_v1, 1  ;;  %v3635_v21 = vld [vmem:[#allocation5 + $0x10] sm:$0xff]  ;;  %v3638_v22 = vld [vmem:[#allocation5 + $0x8] sm:$0xff] }
  0x42   : > { %v3592_v3 = vsel %vm411_vm1, 1.0, %v3396_v2  ;;  %vm416_vm4 = vmand %vm415_vm2, %vm411_vm1  ;;  %v3595_v4 = vsel %vm419_vm3, 1.0, %v3396_v2  ;;  %vm427_vm5 = vcmp.ge.s32.totalorder %v404_v1, 3  ;;  %vm428_vm6 = vcmp.lt.s32.totalorder %v404_v1, 5  ;;  %v3643_v23 = vld [vmem:[#allocation5] sm:$0xff]  ;;  %v3658_v42 = vld [vmem:[#allocation7 + $0x38] sm:$0xff] }
  0x43   : > { %v3597_v5 = vsel %vm416_vm4, 1.0, %v3396_v2  ;;  %vm432_vm7 = vcmp.ge.s32.totalorder %v404_v1, 5  ;;  %v2758_v6 = vsel %vm406_vm0, 1.0, %v3396_v2  ;;  %vm423_vm8 = vcmp.lt.s32.totalorder %v404_v1, 3  ;;  %vm429_vm9 = vmand %vm427_vm5, %vm428_vm6  ;;  %v3650_v29 = vld [vmem:[%s4731_s2] ss:$0 sm:$0xff]  ;;  %650 = vmatpush.bf16.msra.mxu1 %v3658_v42 }
  0x44   : > { %v3600_v7 = vmul.f32 5.0, %v2758_v6  ;;  %vm405_vm10 = vcmp.ge.s32.totalorder %v404_v1, 1  ;;  %v3604_v9 = vsel %vm429_vm9, 1.0, %v3396_v2  ;;  %vm433_vm11 = vmand %vm432_vm7, %vm411_vm1  ;;  %568 = vmatpush.bf16.msra.mxu0 %v3612_v12  ;;  %891 = vmatpush.bf16.msra.mxu3 %v3612_v12  ;;  %v3661_v43 = vld [vmem:[#allocation7 + $0x30] sm:$0xff]  ;;  %v3666_v44 = vld [vmem:[#allocation7 + $0x28] sm:$0xff]  ;;  %s3399_s24 = smov 2  }
  0x45   : > { %v3607_v10 = vsel %vm433_vm11, 1.0, %v3396_v2  ;;  %vm407_vm12 = vmand %vm405_vm10, %vm406_vm0  ;;  %v3671_v45 = vld [vmem:[#allocation7 + $0x20] sm:$0xff]  ;;  %v3676_v46 = vld [vmem:[#allocation7 + $0x18] sm:$0xff]  ;;  %s3400_s27 = smov 1   ;;  %s3401_s28 = smov 3  }
  0x46   : > { %v508_v11 = vmul.f32 0.2, %v3600_v7  ;;  %v3615_v13 = vsel %vm407_vm12, 1.0, %v3396_v2  ;;  %vm424_vm13 = vmand %vm405_vm10, %vm423_vm8  ;;  %v3683_v47 = vld [vmem:[#allocation7 + $0x10] sm:$0xff]  ;;  %v3686_v48 = vld [vmem:[#allocation7 + $0x8] sm:$0xff]  ;;  %s3402_s22 = smov 126  }
  0x47   : > { %v3617_v15 = vsel %vm424_vm13, 1.0, %v3396_v2  ;;  %651 = vmatpush.bf16.msra.mxu1 %v3661_v43  ;;  %v3693_v49 = vld [vmem:[#allocation7] sm:$0xff]  ;;  %s3403_s29 = smov 127   ;;  %s3404_s14 = smov 125  }
  0x48   : > { %v509_v14 = vpack.c.bf16 %v508_v11, %v508_v11  ;;  %569 = vmatpush.bf16.msra.mxu0 %v3620_v17  ;;  %892 = vmatpush.bf16.msra.mxu3 %v3620_v17  ;;  %v3701_v59 = vld [vmem:[%s4733_s4] ss:$0 sm:$0xff] }
  0x4a   : > { %v510_v16 = vunpack.c.l.bf16 %v509_v14 }
  0x4b   : > { %652 = vmatpush.bf16.msra.mxu1 %v3666_v44 }
  0x4c   : > { %v511_v18 = vsub.f32 %v508_v11, %v510_v16  ;;  %570 = vmatpush.bf16.msra.mxu0 %v3625_v19  ;;  %893 = vmatpush.bf16.msra.mxu3 %v3625_v19 }
  0x4e   : > { %512 = vrot.lane.b32.xlu0 %v511_v18, %s3397_s1 }
  0x4f   : > { %653 = vmatpush.bf16.msra.mxu1 %v3671_v45 }
  0x50   : > { %571 = vmatpush.bf16.msra.mxu0 %v3629_v20  ;;  %894 = vmatpush.bf16.msra.mxu3 %v3629_v20 }
  0x53   : > { %654 = vmatpush.bf16.msra.mxu1 %v3676_v46 }
  0x54   : > { %572 = vmatpush.bf16.msra.mxu0 %v3635_v21  ;;  %895 = vmatpush.bf16.msra.mxu3 %v3635_v21 }
  0x56   : > { %515 = vrot.lane.b32.xlu0 %v508_v11, %s3398_s15 }
  0x57   : > { %655 = vmatpush.bf16.msra.mxu1 %v3683_v47 }
  0x58   : > { %573 = vmatpush.bf16.msra.mxu0 %v3638_v22  ;;  %896 = vmatpush.bf16.msra.mxu3 %v3638_v22 }
  0x5b   : > { %656 = vmatpush.bf16.msra.mxu1 %v3686_v48 }
  0x5c   : > { %574 = vmatpush.bf16.msra.mxu0 %v3643_v23  ;;  %897 = vmatpush.bf16.msra.mxu3 %v3643_v23 }
  0x5f   : > { %657 = vmatpush.bf16.msra.mxu1 %v3693_v49 }
  0x60   : > { %925 = vmatpush.bf16.msrb.mxu0 %v3658_v42  ;;  %1183 = vmatpush.bf16.msrb.mxu3 %v3658_v42 }
  0x64   : > { %926 = vmatpush.bf16.msrb.mxu0 %v3661_v43  ;;  %1184 = vmatpush.bf16.msrb.mxu3 %v3661_v43 }
  0x68   : > { %927 = vmatpush.bf16.msrb.mxu0 %v3666_v44  ;;  %1185 = vmatpush.bf16.msrb.mxu3 %v3666_v44 }
  0x6c   : > { %928 = vmatpush.bf16.msrb.mxu0 %v3671_v45  ;;  %1186 = vmatpush.bf16.msrb.mxu3 %v3671_v45 }
  0x70   : > { %929 = vmatpush.bf16.msrb.mxu0 %v3676_v46  ;;  %1187 = vmatpush.bf16.msrb.mxu3 %v3676_v46 }
  0x74   : > { %930 = vmatpush.bf16.msrb.mxu0 %v3683_v47  ;;  %1188 = vmatpush.bf16.msrb.mxu3 %v3683_v47 }
  0x78   : > { %931 = vmatpush.bf16.msrb.mxu0 %v3686_v48  ;;  %1189 = vmatpush.bf16.msrb.mxu3 %v3686_v48 }
  0x7c   : > { %932 = vmatpush.bf16.msrb.mxu0 %v3693_v49  ;;  %1190 = vmatpush.bf16.msrb.mxu3 %v3693_v49 }
  0xc0   : > { %v513_v24 = vpop.permute.xlu0 %512 }
  0xc1   : > { %v514_v25 = vadd.f32 %v513_v24, %v508_v11  ;;  %v3721_v24 = vld [vmem:[#allocation8 + $0x38] sm:$0xff] }
  0xc2   : > { %733 = vmatpush.bf16.msra.mxu2 %v3721_v24  ;;  %960 = vmatpush.bf16.msrb.mxu1 %v3721_v24 }
  0xc8   : > { %v516_v26 = vpop.permute.xlu0 %515 }
  0xc9   : > { %v517_v27 = vadd.f32 %v516_v26, %v514_v25  ;;  %v3724_v25 = vld [vmem:[#allocation8 + $0x30] sm:$0xff]  ;;  %v3729_v26 = vld [vmem:[#allocation8 + $0x28] sm:$0xff] }
  0xca   : > { %734 = vmatpush.bf16.msra.mxu2 %v3724_v25  ;;  %961 = vmatpush.bf16.msrb.mxu1 %v3724_v25 }
  0xcb   : > { %v518_v28 = vpack.c.bf16 %v517_v27, %v517_v27  ;;  %v3734_v27 = vld [vmem:[#allocation8 + $0x20] sm:$0xff] }
  0xcd   : > { %575 = vmatmul.bf16.vlgmr.msra.gmra.mxu0 %v518_v28  ;;  %v3739_v28 = vld [vmem:[#allocation8 + $0x18] sm:$0xff] }
  0xce   : > { %1218 = vmatpush.bf16.msra.mxu0 %v3721_v24  ;;  %735 = vmatpush.bf16.msra.mxu2 %v3729_v26 }
  0xcf   : > { %962 = vmatpush.bf16.msrb.mxu1 %v3729_v26 }
  0xd2   : > { %1219 = vmatpush.bf16.msra.mxu0 %v3724_v25  ;;  %736 = vmatpush.bf16.msra.mxu2 %v3734_v27 }
  0xd3   : > { %963 = vmatpush.bf16.msrb.mxu1 %v3734_v27 }
  0xd6   : > { %1220 = vmatpush.bf16.msra.mxu0 %v3729_v26  ;;  %737 = vmatpush.bf16.msra.mxu2 %v3739_v28 }
  0xd7   : > { %964 = vmatpush.bf16.msrb.mxu1 %v3739_v28 }
  0xda   : > { %1221 = vmatpush.bf16.msra.mxu0 %v3734_v27 }
  0xde   : > { %1222 = vmatpush.bf16.msra.mxu0 %v3739_v28 }
 0x14a   : > { %v576_v30 = vpop.f32.mrf.mxu0 }
 0x14b   : > { %v577_v31 = vadd.f32 %v3650_v29, %v576_v30  ;;  %v3746_v30 = vld [vmem:[#allocation8 + $0x10] sm:$0xff] }
 0x14c   : > { %738 = vmatpush.bf16.msra.mxu2 %v3746_v30  ;;  %965 = vmatpush.bf16.msrb.mxu1 %v3746_v30 }
 0x14d   : > { %3000 = vtanh.f32 %v577_v31  ;;  %v3749_v31 = vld [vmem:[#allocation8 + $0x8] sm:$0xff]  ;;  %1223 = vmatpush.bf16.msra.mxu0 %v3746_v30 }
 0x150   : > { %739 = vmatpush.bf16.msra.mxu2 %v3749_v31  ;;  %966 = vmatpush.bf16.msrb.mxu1 %v3749_v31 }
 0x151   : > { %1224 = vmatpush.bf16.msra.mxu0 %v3749_v31 }
 0x152   : > { %v578_v32 = vpop.f32.mrf.mxu0 }
 0x153   : > { %v3001_v33 = vpop.eup %3000  ;;  %v579_v34 = vadd.f32 %v3650_v29, %v578_v32  ;;  %v3756_v32 = vld [vmem:[#allocation8] sm:$0xff] }
 0x154   : > { %595 = vrot.lane.b32.xlu2 %v3001_v33, %s3398_s15  ;;  %v583_v35 = vpack.c.bf16 %v3001_v33, %v3001_v33  ;;  %740 = vmatpush.bf16.msra.mxu2 %v3756_v32 }
 0x155   : > { %3002 = vtanh.f32 %v579_v34  ;;  %967 = vmatpush.bf16.msrb.mxu1 %v3756_v32  ;;  %1225 = vmatpush.bf16.msra.mxu0 %v3756_v32 }
 0x156   : > { %v585_v36 = vunpack.c.l.bf16 %v583_v35 }
 0x158   : > { %v587_v37 = vsub.f32 %v3001_v33, %v585_v36  ;;  %1148 = vmatpush.bf16.msrb.mxu2 %v3602_v8 }
 0x15a   : > { %589 = vrot.lane.b32.xlu1 %v587_v37, %s3397_s1 }
 0x15b   : > { %v3003_v38 = vpop.eup %3002 }
 0x15c   : > { %597 = vrot.lane.b32.xlu2 %v3003_v38, %s3398_s15  ;;  %v584_v39 = vpack.c.bf16 %v3003_v38, %v3003_v38  ;;  %1149 = vmatpush.bf16.msrb.mxu2 %v3612_v12 }
 0x15e   : > { %v586_v40 = vunpack.c.l.bf16 %v584_v39 }
 0x160   : > { %v588_v41 = vsub.f32 %v3003_v38, %v586_v40  ;;  %1150 = vmatpush.bf16.msrb.mxu2 %v3620_v17 }
 0x162   : > { %591 = vrot.lane.b32.xlu1 %v588_v41, %s3397_s1 }
 0x164   : > { %1151 = vmatpush.bf16.msrb.mxu2 %v3625_v19 }
 0x168   : > { %1152 = vmatpush.bf16.msrb.mxu2 %v3629_v20 }
 0x16c   : > { %1153 = vmatpush.bf16.msrb.mxu2 %v3635_v21 }
 0x170   : > { %1154 = vmatpush.bf16.msrb.mxu2 %v3638_v22 }
 0x174   : > { %1155 = vmatpush.bf16.msrb.mxu2 %v3643_v23 }
 0x1ae   : > { %v596_v50 = vpop.permute.xlu2 %595 }
 0x1b6   : > { %v598_v55 = vpop.permute.xlu2 %597 }
 0x1cc   : > { %v590_v51 = vpop.permute.xlu1 %589 }
 0x1cd   : > { %v593_v52 = vadd.f32 %v3001_v33, %v590_v51  ;;  %v757_v51 = vmul.f32 %v3595_v4, %v3600_v7 }
 0x1cf   : > { %v599_v56 = vadd.f32 %v596_v50, %v593_v52 }
 0x1d4   : > { %v592_v53 = vpop.permute.xlu1 %591 }
 0x1d5   : > { %v594_v54 = vadd.f32 %v3003_v38, %v592_v53 }
 0x1d7   : > { %v600_v57 = vadd.f32 %v598_v55, %v594_v54 }
 0x1d9   : > { %v601_v58 = vpack.c.bf16 %v600_v57, %v599_v56 }
 0x1db   : > { %658 = vmatmul.bf16.vlgmr.msra.gmra.mxu1 %v601_v58 }
 0x1dc   : > { %1406 = vmatpush.bf16.msra.mxu1 %v3602_v8 }
 0x1e0   : > { %1407 = vmatpush.bf16.msra.mxu1 %v3612_v12 }
 0x1e4   : > { %1408 = vmatpush.bf16.msra.mxu1 %v3620_v17 }
 0x1e8   : > { %1409 = vmatpush.bf16.msra.mxu1 %v3625_v19 }
 0x1ec   : > { %1410 = vmatpush.bf16.msra.mxu1 %v3629_v20 }
 0x1f0   : > { %1411 = vmatpush.bf16.msra.mxu1 %v3635_v21 }
 0x1f4   : > { %1412 = vmatpush.bf16.msra.mxu1 %v3638_v22 }
 0x1f8   : > { %1413 = vmatpush.bf16.msra.mxu1 %v3643_v23 }
 0x258   : > { %v659_v60 = vpop.f32.mrf.mxu1 }
 0x259   : > { %v660_v61 = vadd.f32 %v3701_v59, %v659_v60  ;;  %v3794_v60 = vld [vmem:[%s4736_s7] ss:$0 sm:$0xff] }
 0x25b   : > { %3004 = vtanh.f32 %v660_v61 }
 0x260   : > { %v661_v62 = vpop.f32.mrf.mxu1 }
 0x261   : > { %v3704_v63 = vpop.eup %3004  ;;  %v662_v0 = vadd.f32 %v3701_v59, %v661_v62 }
 0x262   : > { %678 = vrot.lane.b32.xlu2 %v3704_v63, %s3398_s15  ;;  %v666_v1 = vpack.c.bf16 %v3704_v63, %v3704_v63 }
 0x263   : > { %3006 = vtanh.f32 %v662_v0 }
 0x264   : > { %v668_v2 = vunpack.c.l.bf16 %v666_v1 }
 0x266   : > { %v670_v6 = vsub.f32 %v3704_v63, %v668_v2 }
 0x268   : > { %672 = vrot.lane.b32.xlu0 %v670_v6, %s3397_s1 }
 0x269   : > { %v3007_v11 = vpop.eup %3006 }
 0x26a   : > { %v667_v14 = vpack.c.bf16 %v3007_v11, %v3007_v11  ;;  %763 = vrot.lane.b32.xlu2 %v3600_v7, %s3399_s24 }
 0x26c   : > { %v669_v16 = vunpack.c.l.bf16 %v667_v14 }
 0x26e   : > { %v671_v18 = vsub.f32 %v3007_v11, %v669_v16 }
 0x270   : > { %674 = vrot.lane.b32.xlu1 %v671_v18, %s3397_s1  ;;  %680 = vrot.lane.b32.xlu0 %v3007_v11, %s3398_s15 }
 0x278   : > { %759 = vrot.lane.b32.xlu1 %v3600_v7, %s3400_s27  ;;  %767 = vrot.lane.b32.xlu0 %v3600_v7, %s3401_s28 }
 0x2bc   : > { %v679_v37 = vpop.permute.xlu2 %678 }
 0x2c4   : > { %v764_v53 = vpop.permute.xlu2 %763 }
 0x2c5   : > { %v765_v55 = vmul.f32 %v3604_v9, %v764_v53 }
 0x2da   : > { %v673_v33 = vpop.permute.xlu0 %672 }
 0x2db   : > { %v676_v34 = vadd.f32 %v3704_v63, %v673_v33 }
 0x2dd   : > { %v682_v40 = vadd.f32 %v679_v37, %v676_v34 }
 0x2e2   : > { %v675_v35 = vpop.permute.xlu1 %674  ;;  %v681_v38 = vpop.permute.xlu0 %680 }
 0x2e3   : > { %v677_v36 = vadd.f32 %v3007_v11, %v675_v35  ;;  %v3800_v11 = vld [vmem:[%s4735_s6] ss:$0 sm:$0xff] }
 0x2e5   : > { %v683_v39 = vadd.f32 %v681_v38, %v677_v36 }
 0x2e7   : > { %v684_v41 = vpack.c.bf16 %v683_v39, %v682_v40 }
 0x2e9   : > { %741 = vmatmul.bf16.vlgmr.msra.gmra.mxu2 %v684_v41 }
 0x2ea   : > { %1441 = vmatpush.bf16.msra.mxu2 %v3658_v42  ;;  %v760_v50 = vpop.permute.xlu1 %759  ;;  %v768_v56 = vpop.permute.xlu0 %767 }
 0x2eb   : > { %v761_v52 = vmul.f32 %v3617_v15, %v760_v50  ;;  %v769_v58 = vmul.f32 %v3607_v10, %v768_v56 }
 0x2ed   : > { %v762_v54 = vadd.f32 %v761_v52, %v757_v51  ;;  %v3807_v51 = vld [vmem:[%s4737_s8] ss:$0 sm:$0xff] }
 0x2ee   : > { %1442 = vmatpush.bf16.msra.mxu2 %v3661_v43 }
 0x2ef   : > { %v766_v57 = vadd.f32 %v765_v55, %v762_v54 }
 0x2f1   : > { %v770_v61 = vadd.f32 %v769_v58, %v766_v57 }
 0x2f2   : > { %1443 = vmatpush.bf16.msra.mxu2 %v3666_v44 }
 0x2f3   : > { %v771_v62 = vsub.f32 %v770_v61, %v3794_v60 }
 0x2f5   : > { %v772_v63 = vmax.f32 %v771_v62, 0.0 }
 0x2f6   : > { %1444 = vmatpush.bf16.msra.mxu2 %v3671_v45 }
 0x2f7   : > { %v773_v0 = vmul.f32 19.6, %v772_v63  ;;  %v788_v56 = vmul.f32 %v3807_v51, %v772_v63 }
 0x2f9   : > { %3008 = vrsqrt.f32 %v773_v0  ;;  %vm781_vm14 = vcmp.eq.f32.partialorder %v773_v0, inf  ;;  %v784_v50 = vand.u32 2147483648, %v773_v0  ;;  %vm783_vm15 = vcmp.eq.f32.partialorder %v773_v0, 0.0 }
 0x2fa   : > { %1445 = vmatpush.bf16.msra.mxu2 %v3676_v46 }
 0x2fe   : > { %1446 = vmatpush.bf16.msra.mxu2 %v3683_v47 }
 0x2ff   : > { %v3009_v1 = vpop.eup %3008 }
 0x300   : > { %v775_v2 = vmul.f32 %v3009_v1, %v773_v0 }
 0x302   : > { %1447 = vmatpush.bf16.msra.mxu2 %v3686_v48  ;;  %v776_v6 = vmul.f32 %v3009_v1, %v775_v2 }
 0x304   : > { %v777_v14 = vmul.f32 0.5, %v776_v6 }
 0x306   : > { %1448 = vmatpush.bf16.msra.mxu2 %v3693_v49  ;;  %v778_v33 = vsub.f32 1.5, %v777_v14 }
 0x308   : > { %v779_v35 = vmul.f32 %v3009_v1, %v778_v33 }
 0x30a   : > { %v780_v38 = vmul.f32 %v779_v35, %v773_v0 }
 0x30c   : > { %v782_v53 = vsel %vm781_vm14, %v773_v0, %v780_v38 }
 0x30d   : > { %v785_v55 = vsel %vm783_vm15, %v784_v50, %v782_v53 }
 0x36c   : > { %v742_v16 = vpop.f32.mrf.mxu2 }
 0x36d   : > { %v743_v18 = vadd.f32 %v3800_v11, %v742_v16 }
 0x36f   : > { %v747_v34 = vmul.f32 0.5, %v743_v18 }
 0x371   : > { %3010 = vtanh.f32 %v747_v34 }
 0x374   : > { %v744_v36 = vpop.f32.mrf.mxu2 }
 0x375   : > { %v745_v37 = vadd.f32 %v3800_v11, %v744_v36 }
 0x377   : > { %v3011_v39 = vpop.eup %3010  ;;  %v748_v40 = vmul.f32 0.5, %v745_v37 }
 0x378   : > { %v751_v41 = vadd.f32 1.0, %v3011_v39 }
 0x379   : > { %3012 = vtanh.f32 %v748_v40 }
 0x37a   : > { %v753_v52 = vmul.f32 0.5, %v751_v41 }
 0x37c   : > { %v755_v54 = vmul.f32 %v3592_v3, %v753_v52 }
 0x37e   : > { %v786_v57 = vmul.f32 %v785_v55, %v755_v54 }
 0x37f   : > { %v3013_v58 = vpop.eup %3012 }
 0x380   : > { %v789_v61 = vsub.f32 %v788_v56, %v786_v57  ;;  %v752_v62 = vadd.f32 1.0, %v3013_v58 }
 0x382   : > { %v791_v1 = vmul.f32 0.5, %v789_v61  ;;  %v754_v2 = vmul.f32 0.5, %v752_v62 }
 0x384   : > { %3014 = vtanh.f32 %v791_v1  ;;  %v756_v6 = vmul.f32 %v3592_v3, %v754_v2 }
 0x386   : > { %v787_v14 = vmul.f32 %v785_v55, %v756_v6 }
 0x388   : > { %v790_v16 = vsub.f32 %v788_v56, %v787_v14 }
 0x38a   : > { %v3015_v18 = vpop.eup %3014  ;;  %v792_v33 = vmul.f32 0.5, %v790_v16 }
 0x38b   : > { %v795_v34 = vadd.f32 1.0, %v3015_v18  ;;  %v853_v18 = vld [vmem:[%s3577_s5] sm:$0xff] }
 0x38c   : > { %3016 = vtanh.f32 %v792_v33 }
 0x38d   : > { %v797_v0 = vmul.f32 0.5, %v795_v34 }
 0x38f   : > { %v799_v35 = vmul.f32 %v797_v0, %v786_v57 }
 0x391   : > { %v3813_v36 = vmul.f32 %v3807_v51, %v799_v35 }
 0x392   : > { %v3017_v63 = vpop.eup %3016 }
 0x393   : > { %4757 = vst [vmem:[#allocation15_spill] sm:$0xff] %v3813_v36  ;;  %v796_v37 = vadd.f32 1.0, %v3017_v63  ;;  %v823_v38 = vmul.f32 %v3607_v10, %v3813_v36  ;;  %v815_v39 = vmul.f32 %v3604_v9, %v3813_v36  ;;  %v803_v40 = vmul.f32 %v3595_v4, %v3813_v36 }
 0x394   : > { %v807_v54 = vmul.f32 %v3617_v15, %v3813_v36 }
 0x395   : > { %v798_v41 = vmul.f32 0.5, %v796_v37  ;;  %845 = vrot.lane.b32.xlu2 %v823_v38, %s3402_s22  ;;  %839 = vrot.lane.b32.xlu0 %v815_v39, %s3403_s29 }
 0x396   : > { %831 = vrot.lane.b32.xlu1 %v803_v40, %s3400_s27 }
 0x397   : > { %v800_v50 = vmul.f32 %v798_v41, %v787_v14 }
 0x399   : > { %v3825_v52 = vmul.f32 %v3807_v51, %v800_v50 }
 0x39b   : > { %v804_v53 = vmul.f32 %v3595_v4, %v3825_v52  ;;  %v808_v55 = vmul.f32 %v3617_v15, %v3825_v52  ;;  %v824_v56 = vmul.f32 %v3607_v10, %v3825_v52  ;;  %v816_v57 = vmul.f32 %v3604_v9, %v3825_v52 }
 0x39d   : > { %833 = vrot.lane.b32.xlu2 %v804_v53, %s3400_s27  ;;  %817 = vrot.lane.b32.xlu0 %v815_v39, %s3402_s22 }
 0x39e   : > { %809 = vrot.lane.b32.xlu1 %v807_v54, %s3403_s29 }
 0x3a5   : > { %811 = vrot.lane.b32.xlu2 %v808_v55, %s3403_s29  ;;  %847 = vrot.lane.b32.xlu0 %v824_v56, %s3402_s22 }
 0x3a6   : > { %841 = vrot.lane.b32.xlu1 %v816_v57, %s3403_s29 }
 0x3ad   : > { %825 = vrot.lane.b32.xlu2 %v823_v38, %s3404_s14  ;;  %827 = vrot.lane.b32.xlu0 %v824_v56, %s3404_s14 }
 0x3ae   : > { %819 = vrot.lane.b32.xlu1 %v816_v57, %s3402_s22 }
 0x3ef   : > { %v846_v58 = vpop.permute.xlu2 %845 }
 0x3f7   : > { %v834_v61 = vpop.permute.xlu2 %833 }
 0x3f8   : > { %v838_v50 = vadd.f32 %v834_v61, %v808_v55 }
 0x3ff   : > { %v812_v6 = vpop.permute.xlu2 %811 }
 0x407   : > { %v840_v62 = vpop.permute.xlu0 %839  ;;  %v826_v38 = vpop.permute.xlu2 %825 }
 0x408   : > { %v832_v1 = vpop.permute.xlu1 %831 }
 0x409   : > { %v837_v2 = vadd.f32 %v832_v1, %v807_v54 }
 0x40b   : > { %v843_v14 = vadd.f32 %v840_v62, %v837_v2 }
 0x40d   : > { %v849_v16 = vadd.f32 %v846_v58, %v843_v14  ;;  %v854_v14 = vld [vmem:[%s3577_s5 + $0x8] sm:$0xff] }
 0x40f   : > { %v851_v33 = vmul.f32 %v3615_v13, %v849_v16  ;;  %v818_v34 = vpop.permute.xlu0 %817 }
 0x410   : > { %v810_v0 = vpop.permute.xlu1 %809 }
 0x411   : > { %v855_v35 = vadd.f32 %v853_v18, %v851_v33  ;;  %v813_v63 = vadd.f32 %v810_v0, %v803_v40  ;;  %v814_v18 = vadd.f32 %v812_v6, %v804_v53 }
 0x413   : > { %v821_v37 = vadd.f32 %v818_v34, %v813_v63  ;;  %v857_v39 = vadd.f32 %v855_v35, %v3600_v7 }
 0x415   : > { %v829_v41 = vadd.f32 %v826_v38, %v821_v37 }
 0x417   : > { %v3849_v56 = vsub.f32 %v857_v39, %v829_v41  ;;  %v848_v54 = vpop.permute.xlu0 %847 }
 0x418   : > { %v842_v57 = vpop.permute.xlu1 %841 }
 0x419   : > { %v844_v62 = vadd.f32 %v842_v57, %v838_v50  ;;  %v869_v58 = vmul.f32 0.2, %v3849_v56 }
 0x41b   : > { %v850_v1 = vadd.f32 %v848_v54, %v844_v62  ;;  %883 = vrot.lane.b32.xlu0 %v869_v58, %s3398_s15  ;;  %v871_v2 = vpack.c.bf16 %v869_v58, %v869_v58 }
 0x41d   : > { %v852_v40 = vmul.f32 %v3615_v13, %v850_v1  ;;  %v873_v16 = vunpack.c.l.bf16 %v871_v2 }
 0x41f   : > { %v856_v33 = vadd.f32 %v854_v14, %v852_v40  ;;  %v875_v34 = vsub.f32 %v869_v58, %v873_v16  ;;  %v828_v61 = vpop.permute.xlu0 %827 }
 0x420   : > { %v820_v0 = vpop.permute.xlu1 %819 }
 0x421   : > { %v822_v55 = vadd.f32 %v820_v0, %v814_v18  ;;  %877 = vrot.lane.b32.xlu1 %v875_v34, %s3397_s1  ;;  %v858_v35 = vadd.f32 %v856_v33, %v3600_v7 }
 0x423   : > { %v830_v63 = vadd.f32 %v828_v61, %v822_v55 }
 0x425   : > { %v3857_v37 = vsub.f32 %v858_v35, %v830_v63 }
 0x427   : > { %v870_v38 = vmul.f32 0.2, %v3857_v37 }
 0x429   : > { %885 = vrot.lane.b32.xlu1 %v870_v38, %s3398_s15  ;;  %v872_v39 = vpack.c.bf16 %v870_v38, %v870_v38 }
 0x42b   : > { %v874_v41 = vunpack.c.l.bf16 %v872_v39 }
 0x42d   : > { %v876_v50 = vsub.f32 %v870_v38, %v874_v41 }
 0x42f   : > { %879 = vrot.lane.b32.xlu2 %v876_v50, %s3397_s1 }
 0x489   : > { %v880_v6 = vpop.permute.xlu2 %879 }
 0x48a   : > { %v882_v57 = vadd.f32 %v880_v6, %v870_v38 }
 0x48d   : > { %v884_v62 = vpop.permute.xlu0 %883 }
 0x493   : > { %v878_v53 = vpop.permute.xlu1 %877 }
 0x494   : > { %v881_v54 = vadd.f32 %v878_v53, %v869_v58 }
 0x496   : > { %v887_v7 = vadd.f32 %v884_v62, %v881_v54 }
 0x49b   : > { %v886_v1 = vpop.permute.xlu1 %885 }
 0x49c   : > { %v888_v2 = vadd.f32 %v886_v1, %v882_v57 }
 0x49e   : > { %v889_v14 = vpack.c.bf16 %v888_v2, %v887_v7 }
 0x4a0   : > { %898 = vmatmul.bf16.vlgmr.msra.gmra.mxu3 %v889_v14 }
 0x4a1   : > { %1476 = vmatpush.bf16.msra.mxu3 %v3721_v24 }
 0x4a5   : > { %1477 = vmatpush.bf16.msra.mxu3 %v3724_v25 }
 0x4a9   : > { %1478 = vmatpush.bf16.msra.mxu3 %v3729_v26 }
 0x4ad   : > { %1479 = vmatpush.bf16.msra.mxu3 %v3734_v27 }
 0x4b1   : > { %1480 = vmatpush.bf16.msra.mxu3 %v3739_v28 }
 0x4b5   : > { %1481 = vmatpush.bf16.msra.mxu3 %v3746_v30 }
 0x4b9   : > { %1482 = vmatpush.bf16.msra.mxu3 %v3749_v31 }
 0x4bd   : > { %1483 = vmatpush.bf16.msra.mxu3 %v3756_v32 }
 0x523   : > { %v899_v58 = vpop.f32.mrf.mxu3 }
 0x524   : > { %v900_v40 = vadd.f32 %v3650_v29, %v899_v58 }
 0x526   : > { %3018 = vtanh.f32 %v900_v40 }
 0x52b   : > { %v901_v16 = vpop.f32.mrf.mxu3 }
 0x52c   : > { %v3019_v18 = vpop.eup %3018  ;;  %v902_v33 = vadd.f32 %v3650_v29, %v901_v16 }
 0x52d   : > { %918 = vrot.lane.b32.xlu1 %v3019_v18, %s3398_s15  ;;  %v906_v34 = vpack.c.bf16 %v3019_v18, %v3019_v18 }
 0x52e   : > { %3020 = vtanh.f32 %v902_v33 }
 0x52f   : > { %v908_v0 = vunpack.c.l.bf16 %v906_v34 }
 0x531   : > { %v910_v55 = vsub.f32 %v3019_v18, %v908_v0 }
 0x533   : > { %912 = vrot.lane.b32.xlu2 %v910_v55, %s3397_s1 }
 0x534   : > { %v3021_v61 = vpop.eup %3020 }
 0x535   : > { %v907_v35 = vpack.c.bf16 %v3021_v61, %v3021_v61 }
 0x537   : > { %v909_v63 = vunpack.c.l.bf16 %v907_v35 }
 0x539   : > { %v911_v38 = vsub.f32 %v3021_v61, %v909_v63 }
 0x53b   : > { %914 = vrot.lane.b32.xlu0 %v911_v38, %s3397_s1  ;;  %920 = vrot.lane.b32.xlu2 %v3021_v61, %s3398_s15 }
 0x58d   : > { %v913_v39 = vpop.permute.xlu2 %912 }
 0x58e   : > { %v916_v29 = vadd.f32 %v3019_v18, %v913_v39 }
 0x595   : > { %v921_v6 = vpop.permute.xlu2 %920 }
 0x59f   : > { %v919_v41 = vpop.permute.xlu1 %918 }
 0x5a0   : > { %v922_v54 = vadd.f32 %v919_v41, %v916_v29 }
 0x5ad   : > { %v915_v50 = vpop.permute.xlu0 %914 }
 0x5ae   : > { %v917_v53 = vadd.f32 %v3021_v61, %v915_v50 }
 0x5b0   : > { %v923_v57 = vadd.f32 %v921_v6, %v917_v53 }
 0x5b2   : > { %v924_v62 = vpack.c.bf16 %v923_v57, %v922_v54 }
 0x5b4   : > { %933 = vmatmul.bf16.vlgmr.msrb.gmra.mxu0 %v924_v62 }
 0x5b5   : > { %1664 = vmatpush.bf16.msrb.mxu0 %v3602_v8 }
 0x5b9   : > { %1665 = vmatpush.bf16.msrb.mxu0 %v3612_v12 }
 0x5bd   : > { %1666 = vmatpush.bf16.msrb.mxu0 %v3620_v17 }
 0x5c1   : > { %1667 = vmatpush.bf16.msrb.mxu0 %v3625_v19 }
 0x5c5   : > { %1668 = vmatpush.bf16.msrb.mxu0 %v3629_v20 }
 0x5c9   : > { %1669 = vmatpush.bf16.msrb.mxu0 %v3635_v21 }
 0x5cd   : > { %1670 = vmatpush.bf16.msrb.mxu0 %v3638_v22 }
 0x5d1   : > { %1671 = vmatpush.bf16.msrb.mxu0 %v3643_v23 }
 0x631   : > { %v934_v1 = vpop.f32.mrf.mxu0 }
 0x632   : > { %v935_v2 = vadd.f32 %v3701_v59, %v934_v1 }
 0x634   : > { %3022 = vtanh.f32 %v935_v2 }
 0x639   : > { %v936_v7 = vpop.f32.mrf.mxu0 }
 0x63a   : > { %v3023_v8 = vpop.eup %3022  ;;  %v937_v12 = vadd.f32 %v3701_v59, %v936_v7 }
 0x63b   : > { %953 = vrot.lane.b32.xlu2 %v3023_v8, %s3398_s15  ;;  %v941_v17 = vpack.c.bf16 %v3023_v8, %v3023_v8 }
 0x63c   : > { %3024 = vtanh.f32 %v937_v12 }
 0x63d   : > { %v943_v19 = vunpack.c.l.bf16 %v941_v17 }
 0x63f   : > { %v945_v20 = vsub.f32 %v3023_v8, %v943_v19 }
 0x641   : > { %947 = vrot.lane.b32.xlu0 %v945_v20, %s3397_s1 }
 0x642   : > { %v3025_v21 = vpop.eup %3024 }
 0x643   : > { %990 = vrot.lane.b32.xlu2 %v3857_v37, %s3400_s27  ;;  %v942_v22 = vpack.c.bf16 %v3025_v21, %v3025_v21 }
 0x645   : > { %v944_v23 = vunpack.c.l.bf16 %v942_v22 }
 0x647   : > { %v946_v14 = vsub.f32 %v3025_v21, %v944_v23 }
 0x649   : > { %949 = vrot.lane.b32.xlu1 %v946_v14, %s3397_s1  ;;  %955 = vrot.lane.b32.xlu0 %v3025_v21, %s3398_s15 }
 0x64b   : > { %1004 = vrot.lane.b32.xlu2 %v3849_v56, %s3401_s28 }
 0x651   : > { %988 = vrot.lane.b32.xlu1 %v3849_v56, %s3400_s27  ;;  %996 = vrot.lane.b32.xlu0 %v3849_v56, %s3399_s24 }
 0x659   : > { %998 = vrot.lane.b32.xlu1 %v3857_v37, %s3399_s24  ;;  %1006 = vrot.lane.b32.xlu0 %v3857_v37, %s3401_s28 }
 0x695   : > { %v954_v18 = vpop.permute.xlu2 %953 }
 0x69d   : > { %v991_v61 = vpop.permute.xlu2 %990 }
 0x6b3   : > { %v948_v59 = vpop.permute.xlu0 %947 }
 0x6b4   : > { %v951_v58 = vadd.f32 %v3023_v8, %v948_v59 }
 0x6b6   : > { %v957_v34 = vadd.f32 %v954_v18, %v951_v58 }
 0x6bb   : > { %v950_v40 = vpop.permute.xlu1 %949  ;;  %v956_v33 = vpop.permute.xlu0 %955 }
 0x6bc   : > { %v952_v16 = vadd.f32 %v3025_v21, %v950_v40 }
 0x6be   : > { %v958_v0 = vadd.f32 %v956_v33, %v952_v16 }
 0x6c0   : > { %v959_v55 = vpack.c.bf16 %v958_v0, %v957_v34 }
 0x6c2   : > { %968 = vmatmul.bf16.vlgmr.msrb.gmra.mxu1 %v959_v55 }
 0x6c3   : > { %1699 = vmatpush.bf16.msrb.mxu1 %v3658_v42  ;;  %v989_v35 = vpop.permute.xlu1 %988  ;;  %v984_v42 = vmul.f32 %v3595_v4, %v3849_v56 }
 0x6c4   : > { %v992_v63 = vmul.f32 %v3617_v15, %v989_v35 }
 0x6c6   : > { %v994_v38 = vadd.f32 %v992_v63, %v984_v42 }
 0x6c7   : > { %1700 = vmatpush.bf16.msrb.mxu1 %v3661_v43  ;;  %v997_v43 = vpop.permute.xlu0 %996 }
 0x6cb   : > { %1701 = vmatpush.bf16.msrb.mxu1 %v3666_v44  ;;  %v1000_v44 = vmul.f32 %v3604_v9, %v997_v43 }
 0x6cd   : > { %v1002_v39 = vadd.f32 %v1000_v44, %v994_v38 }
 0x6cf   : > { %1702 = vmatpush.bf16.msrb.mxu1 %v3671_v45  ;;  %v1005_v45 = vpop.permute.xlu2 %1004  ;;  %v1007_v53 = vpop.permute.xlu0 %1006 }
 0x6d0   : > { %v1009_v57 = vmul.f32 %v3607_v10, %v1007_v53 }
 0x6d3   : > { %1703 = vmatpush.bf16.msrb.mxu1 %v3676_v46  ;;  %v999_v46 = vpop.permute.xlu1 %998 }
 0x6d4   : > { %v1001_v50 = vmul.f32 %v3604_v9, %v999_v46 }
 0x6d7   : > { %1704 = vmatpush.bf16.msrb.mxu1 %v3683_v47  ;;  %v993_v47 = vmul.f32 %v3617_v15, %v991_v61 }
 0x6db   : > { %1705 = vmatpush.bf16.msrb.mxu1 %v3686_v48  ;;  %v1008_v48 = vmul.f32 %v3607_v10, %v1005_v45 }
 0x6dd   : > { %v1010_v41 = vadd.f32 %v1008_v48, %v1002_v39 }
 0x6df   : > { %1706 = vmatpush.bf16.msrb.mxu1 %v3693_v49  ;;  %v985_v49 = vmul.f32 %v3595_v4, %v3857_v37  ;;  %v1012_v6 = vsub.f32 %v1010_v41, %v3794_v60 }
 0x6e1   : > { %v995_v29 = vadd.f32 %v993_v47, %v985_v49  ;;  %v1014_v62 = vmax.f32 %v1012_v6, 0.0 }
 0x6e3   : > { %v1003_v54 = vadd.f32 %v1001_v50, %v995_v29  ;;  %v1016_v2 = vmul.f32 19.6, %v1014_v62  ;;  %v1044_v47 = vmul.f32 %v3807_v51, %v1014_v62 }
 0x6e5   : > { %v1011_v1 = vadd.f32 %v1009_v57, %v1003_v54  ;;  %3026 = vrsqrt.f32 %v1016_v2  ;;  %vm1025_vm0 = vcmp.eq.f32.partialorder %v1016_v2, inf  ;;  %v1028_v45 = vand.u32 2147483648, %v1016_v2 }
 0x6e6   : > { %vm1027_vm1 = vcmp.eq.f32.partialorder %v1016_v2, 0.0 }
 0x6e7   : > { %v1013_v7 = vsub.f32 %v1011_v1, %v3794_v60 }
 0x6e9   : > { %v1015_v8 = vmax.f32 %v1013_v7, 0.0 }
 0x6eb   : > { %v1017_v12 = vmul.f32 19.6, %v1015_v8  ;;  %v3027_v17 = vpop.eup %3026 }
 0x6ec   : > { %v1019_v19 = vmul.f32 %v3027_v17, %v1016_v2 }
 0x6ed   : > { %3028 = vrsqrt.f32 %v1017_v12  ;;  %vm1037_vm2 = vcmp.eq.f32.partialorder %v1017_v12, inf  ;;  %v1040_v57 = vand.u32 2147483648, %v1017_v12  ;;  %vm1039_vm3 = vcmp.eq.f32.partialorder %v1017_v12, 0.0 }
 0x6ee   : > { %v1020_v20 = vmul.f32 %v3027_v17, %v1019_v19 }
 0x6f0   : > { %v1021_v22 = vmul.f32 0.5, %v1020_v20 }
 0x6f2   : > { %v1022_v58 = vsub.f32 1.5, %v1021_v22 }
 0x6f3   : > { %v3029_v21 = vpop.eup %3028 }
 0x6f4   : > { %v1031_v23 = vmul.f32 %v3029_v21, %v1017_v12  ;;  %v1023_v18 = vmul.f32 %v3027_v17, %v1022_v58 }
 0x6f6   : > { %v1032_v40 = vmul.f32 %v3029_v21, %v1031_v23  ;;  %v1024_v55 = vmul.f32 %v1023_v18, %v1016_v2 }
 0x6f8   : > { %v1033_v33 = vmul.f32 0.5, %v1032_v40  ;;  %v1026_v38 = vsel %vm1025_vm0, %v1016_v2, %v1024_v55  ;;  %v1045_v2 = vmul.f32 %v3807_v51, %v1015_v8 }
 0x6f9   : > { %v1029_v46 = vsel %vm1027_vm1, %v1028_v45, %v1026_v38 }
 0x6fa   : > { %v1034_v61 = vsub.f32 1.5, %v1033_v33 }
 0x6fc   : > { %v1035_v44 = vmul.f32 %v3029_v21, %v1034_v61 }
 0x6fe   : > { %v1036_v49 = vmul.f32 %v1035_v44, %v1017_v12 }
 0x700   : > { %v1038_v54 = vsel %vm1037_vm2, %v1017_v12, %v1036_v49 }
 0x701   : > { %v1041_v7 = vsel %vm1039_vm3, %v1040_v57, %v1038_v54 }
 0x73f   : > { %v969_v14 = vpop.f32.mrf.mxu1 }
 0x740   : > { %v970_v59 = vadd.f32 %v3800_v11, %v969_v14 }
 0x742   : > { %v974_v16 = vmul.f32 0.5, %v970_v59 }
 0x744   : > { %3030 = vtanh.f32 %v974_v16 }
 0x747   : > { %v971_v34 = vpop.f32.mrf.mxu1 }
 0x748   : > { %v972_v0 = vadd.f32 %v3800_v11, %v971_v34 }
 0x74a   : > { %v3031_v35 = vpop.eup %3030  ;;  %v975_v63 = vmul.f32 0.5, %v972_v0 }
 0x74b   : > { %v978_v42 = vadd.f32 1.0, %v3031_v35 }
 0x74c   : > { %3032 = vtanh.f32 %v975_v63 }
 0x74d   : > { %v980_v43 = vmul.f32 0.5, %v978_v42 }
 0x74f   : > { %v982_v39 = vmul.f32 %v3592_v3, %v980_v43 }
 0x751   : > { %v1042_v48 = vmul.f32 %v1029_v46, %v982_v39 }
 0x752   : > { %v3033_v41 = vpop.eup %3032 }
 0x753   : > { %v1046_v50 = vsub.f32 %v1044_v47, %v1042_v48  ;;  %v979_v29 = vadd.f32 1.0, %v3033_v41  ;;  %v2855_v47 = vld [vmem:[%s3577_s5 + $0x10] sm:$0xff] }
 0x755   : > { %v1048_v53 = vmul.f32 0.5, %v1046_v50  ;;  %v981_v6 = vmul.f32 0.5, %v979_v29 }
 0x757   : > { %3034 = vtanh.f32 %v1048_v53  ;;  %v983_v1 = vmul.f32 %v3592_v3, %v981_v6 }
 0x759   : > { %v1043_v17 = vmul.f32 %v1041_v7, %v983_v1 }
 0x75b   : > { %v1047_v19 = vsub.f32 %v1045_v2, %v1043_v17 }
 0x75d   : > { %v3035_v62 = vpop.eup %3034  ;;  %v1049_v20 = vmul.f32 0.5, %v1047_v19 }
 0x75e   : > { %v1052_v21 = vadd.f32 1.0, %v3035_v62 }
 0x75f   : > { %3036 = vtanh.f32 %v1049_v20 }
 0x760   : > { %v1054_v22 = vmul.f32 0.5, %v1052_v21 }
 0x762   : > { %v1056_v23 = vmul.f32 %v1054_v22, %v1042_v48  ;;  %v2856_v22 = vld [vmem:[%s3577_s5 + $0x18] sm:$0xff] }
 0x764   : > { %v3929_v14 = vmul.f32 %v3807_v51, %v1056_v23 }
 0x765   : > { %v3037_v59 = vpop.eup %3036 }
 0x766   : > { %4758 = vst [vmem:[#allocation16_spill] sm:$0xff] %v3929_v14  ;;  %v1053_v58 = vadd.f32 1.0, %v3037_v59  ;;  %v1080_v40 = vmul.f32 %v3607_v10, %v3929_v14  ;;  %v1072_v12 = vmul.f32 %v3604_v9, %v3929_v14  ;;  %v1060_v8 = vmul.f32 %v3595_v4, %v3929_v14 }
 0x767   : > { %v1064_v0 = vmul.f32 %v3617_v15, %v3929_v14 }
 0x768   : > { %v1055_v16 = vmul.f32 0.5, %v1053_v58  ;;  %1102 = vrot.lane.b32.xlu2 %v1080_v40, %s3402_s22  ;;  %1096 = vrot.lane.b32.xlu0 %v1072_v12, %s3403_s29 }
 0x769   : > { %1088 = vrot.lane.b32.xlu1 %v1060_v8, %s3400_s27 }
 0x76a   : > { %v1057_v18 = vmul.f32 %v1055_v16, %v1043_v17 }
 0x76c   : > { %v3941_v33 = vmul.f32 %v3807_v51, %v1057_v18 }
 0x76e   : > { %4759 = vst [vmem:[#allocation17_spill] sm:$0xff] %v3941_v33  ;;  %v1061_v34 = vmul.f32 %v3595_v4, %v3941_v33  ;;  %v1081_v55 = vmul.f32 %v3607_v10, %v3941_v33  ;;  %v1065_v61 = vmul.f32 %v3617_v15, %v3941_v33  ;;  %v1073_v35 = vmul.f32 %v3604_v9, %v3941_v33 }
 0x770   : > { %1074 = vrot.lane.b32.xlu0 %v1072_v12, %s3402_s22  ;;  %1090 = vrot.lane.b32.xlu2 %v1061_v34, %s3400_s27 }
 0x771   : > { %1066 = vrot.lane.b32.xlu1 %v1064_v0, %s3403_s29 }
 0x778   : > { %1104 = vrot.lane.b32.xlu0 %v1081_v55, %s3402_s22  ;;  %1068 = vrot.lane.b32.xlu2 %v1065_v61, %s3403_s29 }
 0x779   : > { %1098 = vrot.lane.b32.xlu1 %v1073_v35, %s3403_s29 }
 0x780   : > { %1084 = vrot.lane.b32.xlu0 %v1081_v55, %s3404_s14  ;;  %1082 = vrot.lane.b32.xlu2 %v1080_v40, %s3404_s14 }
 0x781   : > { %1076 = vrot.lane.b32.xlu1 %v1073_v35, %s3402_s22 }
 0x7c2   : > { %v1103_v63 = vpop.permute.xlu2 %1102 }
 0x7ca   : > { %v1091_v42 = vpop.permute.xlu2 %1090 }
 0x7cb   : > { %v1095_v1 = vadd.f32 %v1091_v42, %v1065_v61 }
 0x7d2   : > { %v1069_v45 = vpop.permute.xlu2 %1068 }
 0x7d3   : > { %v1071_v58 = vadd.f32 %v1069_v45, %v1061_v34 }
 0x7da   : > { %v1097_v43 = vpop.permute.xlu0 %1096  ;;  %v1083_v6 = vpop.permute.xlu2 %1082 }
 0x7db   : > { %v1089_v38 = vpop.permute.xlu1 %1088 }
 0x7dc   : > { %v1094_v44 = vadd.f32 %v1089_v38, %v1064_v0 }
 0x7de   : > { %v1100_v39 = vadd.f32 %v1097_v43, %v1094_v44 }
 0x7e0   : > { %v1106_v46 = vadd.f32 %v1103_v63, %v1100_v39 }
 0x7e2   : > { %v1108_v48 = vmul.f32 %v3615_v13, %v1106_v46  ;;  %v1075_v49 = vpop.permute.xlu0 %1074 }
 0x7e3   : > { %v1067_v41 = vpop.permute.xlu1 %1066 }
 0x7e4   : > { %v1113_v50 = vadd.f32 %v2855_v47, %v1108_v48  ;;  %v1070_v29 = vadd.f32 %v1067_v41, %v1060_v8 }
 0x7e6   : > { %v1078_v53 = vadd.f32 %v1075_v49, %v1070_v29  ;;  %v1115_v54 = vadd.f32 %v1113_v50, %v3849_v56  ;;  %v3989_v49 = vld [vmem:[%s4731_s2] ss:$0 sm:$0xff] }
 0x7e8   : > { %v1086_v57 = vadd.f32 %v1083_v6, %v1078_v53 }
 0x7ea   : > { %v3965_v7 = vsub.f32 %v1115_v54, %v1086_v57  ;;  %v1105_v17 = vpop.permute.xlu0 %1104 }
 0x7eb   : > { %v1099_v2 = vpop.permute.xlu1 %1098 }
 0x7ec   : > { %v1101_v19 = vadd.f32 %v1099_v2, %v1095_v1  ;;  %v1127_v62 = vmul.f32 0.2, %v3965_v7 }
 0x7ee   : > { %v1107_v20 = vadd.f32 %v1105_v17, %v1101_v19  ;;  %1141 = vrot.lane.b32.xlu0 %v1127_v62, %s3398_s15  ;;  %v1129_v21 = vpack.c.bf16 %v1127_v62, %v1127_v62 }
 0x7f0   : > { %v1109_v23 = vmul.f32 %v3615_v13, %v1107_v20  ;;  %v1131_v59 = vunpack.c.l.bf16 %v1129_v21  ;;  %v3997_v20 = vld [vmem:[#allocation5 + $0x38] sm:$0xff]  ;;  %v4000_v21 = vld [vmem:[#allocation5 + $0x30] sm:$0xff] }
 0x7f2   : > { %v1114_v40 = vadd.f32 %v2856_v22, %v1109_v23  ;;  %v1133_v56 = vsub.f32 %v1127_v62, %v1131_v59  ;;  %v1085_v16 = vpop.permute.xlu0 %1084  ;;  %v4003_v22 = vld [vmem:[#allocation5 + $0x28] sm:$0xff]  ;;  %v4006_v23 = vld [vmem:[#allocation5 + $0x20] sm:$0xff]  ;;  %v4009_v59 = vld [vmem:[#allocation5 + $0x18] sm:$0xff] }
 0x7f3   : > { %v1077_v12 = vpop.permute.xlu1 %1076 }
 0x7f4   : > { %v1079_v8 = vadd.f32 %v1077_v12, %v1071_v58  ;;  %1135 = vrot.lane.b32.xlu1 %v1133_v56, %s3397_s1  ;;  %v1116_v18 = vadd.f32 %v1114_v40, %v3857_v37  ;;  %v4012_v58 = vld [vmem:[#allocation5 + $0x10] sm:$0xff]  ;;  %v4015_v40 = vld [vmem:[#allocation5 + $0x8] sm:$0xff]  ;;  %v4018_v56 = vld [vmem:[#allocation5] sm:$0xff] }
 0x7f6   : > { %v1087_v0 = vadd.f32 %v1085_v16, %v1079_v8  ;;  %v4024_v8 = vld [vmem:[%s4733_s4] ss:$0 sm:$0xff] }
 0x7f8   : > { %v3973_v55 = vsub.f32 %v1116_v18, %v1087_v0 }
 0x7fa   : > { %v1128_v61 = vmul.f32 0.2, %v3973_v55 }
 0x7fc   : > { %1143 = vrot.lane.b32.xlu1 %v1128_v61, %s3398_s15  ;;  %v1130_v35 = vpack.c.bf16 %v1128_v61, %v1128_v61 }
 0x7fe   : > { %v1132_v63 = vunpack.c.l.bf16 %v1130_v35 }
 0x800   : > { %v1134_v42 = vsub.f32 %v1128_v61, %v1132_v63 }
 0x802   : > { %1137 = vrot.lane.b32.xlu2 %v1134_v42, %s3397_s1 }
 0x85c   : > { %v1138_v43 = vpop.permute.xlu2 %1137 }
 0x85d   : > { %v1140_v44 = vadd.f32 %v1138_v43, %v1128_v61 }
 0x860   : > { %v1142_v45 = vpop.permute.xlu0 %1141 }
 0x866   : > { %v1136_v34 = vpop.permute.xlu1 %1135 }
 0x867   : > { %v1139_v38 = vadd.f32 %v1136_v34, %v1127_v62 }
 0x869   : > { %v1145_v46 = vadd.f32 %v1142_v45, %v1139_v38 }
 0x86e   : > { %v1144_v39 = vpop.permute.xlu1 %1143 }
 0x86f   : > { %v1146_v37 = vadd.f32 %v1144_v39, %v1140_v44 }
 0x871   : > { %v1147_v47 = vpack.c.bf16 %v1146_v37, %v1145_v46 }
 0x873   : > { %1156 = vmatmul.bf16.vlgmr.msrb.gmra.mxu2 %v1147_v47 }
 0x874   : > { %1734 = vmatpush.bf16.msrb.mxu2 %v3721_v24 }
 0x878   : > { %1735 = vmatpush.bf16.msrb.mxu2 %v3724_v25 }
 0x87c   : > { %1736 = vmatpush.bf16.msrb.mxu2 %v3729_v26 }
 0x880   : > { %1737 = vmatpush.bf16.msrb.mxu2 %v3734_v27 }
 0x884   : > { %1738 = vmatpush.bf16.msrb.mxu2 %v3739_v28 }
 0x888   : > { %1739 = vmatpush.bf16.msrb.mxu2 %v3746_v30 }
 0x88c   : > { %1740 = vmatpush.bf16.msrb.mxu2 %v3749_v31 }
 0x890   : > { %1741 = vmatpush.bf16.msrb.mxu2 %v3756_v32 }
 0x8f6   : > { %v1157_v48 = vpop.f32.mrf.mxu2 }
 0x8f7   : > { %v1158_v24 = vadd.f32 %v3989_v49, %v1157_v48 }
 0x8f9   : > { %3038 = vtanh.f32 %v1158_v24 }
 0x8fe   : > { %v1159_v25 = vpop.f32.mrf.mxu2 }
 0x8ff   : > { %v3039_v26 = vpop.eup %3038  ;;  %v1160_v27 = vadd.f32 %v3989_v49, %v1159_v25 }
 0x900   : > { %1176 = vrot.lane.b32.xlu1 %v3039_v26, %s3398_s15  ;;  %v1164_v28 = vpack.c.bf16 %v3039_v26, %v3039_v26 }
 0x901   : > { %3040 = vtanh.f32 %v1160_v27  ;;  %v4044_v27 = vld [vmem:[#allocation7 + $0x38] sm:$0xff] }
 0x902   : > { %v1166_v30 = vunpack.c.l.bf16 %v1164_v28  ;;  %v4047_v28 = vld [vmem:[#allocation7 + $0x30] sm:$0xff] }
 0x904   : > { %v1168_v31 = vsub.f32 %v3039_v26, %v1166_v30  ;;  %v4050_v30 = vld [vmem:[#allocation7 + $0x28] sm:$0xff] }
 0x906   : > { %1170 = vrot.lane.b32.xlu2 %v1168_v31, %s3397_s1  ;;  %v4053_v31 = vld [vmem:[#allocation7 + $0x20] sm:$0xff] }
 0x907   : > { %v3041_v32 = vpop.eup %3040 }
 0x908   : > { %v1165_v41 = vpack.c.bf16 %v3041_v32, %v3041_v32 }
 0x90a   : > { %v1167_v50 = vunpack.c.l.bf16 %v1165_v41  ;;  %v4059_v41 = vld [vmem:[#allocation7 + $0x10] sm:$0xff] }
 0x90c   : > { %v1169_v29 = vsub.f32 %v3041_v32, %v1167_v50  ;;  %v4062_v50 = vld [vmem:[#allocation7 + $0x8] sm:$0xff] }
 0x90e   : > { %1172 = vrot.lane.b32.xlu0 %v1169_v29, %s3397_s1  ;;  %1178 = vrot.lane.b32.xlu2 %v3041_v32, %s3398_s15  ;;  %v4065_v29 = vld [vmem:[#allocation7] sm:$0xff] }
 0x960   : > { %v1171_v53 = vpop.permute.xlu2 %1170 }
 0x961   : > { %v1174_v57 = vadd.f32 %v3039_v26, %v1171_v53 }
 0x968   : > { %v1179_v2 = vpop.permute.xlu2 %1178 }
 0x972   : > { %v1177_v6 = vpop.permute.xlu1 %1176 }
 0x973   : > { %v1180_v17 = vadd.f32 %v1177_v6, %v1174_v57  ;;  %v1242_v57 = vmul.f32 %v3595_v4, %v3965_v7 }
 0x980   : > { %v1173_v54 = vpop.permute.xlu0 %1172 }
 0x981   : > { %v1175_v1 = vadd.f32 %v3041_v32, %v1173_v54  ;;  %v4056_v32 = vld [vmem:[#allocation7 + $0x18] sm:$0xff] }
 0x983   : > { %v1181_v19 = vadd.f32 %v1179_v2, %v1175_v1 }
 0x985   : > { %v1182_v62 = vpack.c.bf16 %v1181_v19, %v1180_v17 }
 0x987   : > { %1191 = vmatmul.bf16.vlgmr.msrb.gmra.mxu3 %v1182_v62 }
 0x988   : > { %1922 = vmatpush.bf16.msrb.mxu3 %v3997_v20 }
 0x98c   : > { %1923 = vmatpush.bf16.msrb.mxu3 %v4000_v21 }
 0x990   : > { %1924 = vmatpush.bf16.msrb.mxu3 %v4003_v22 }
 0x994   : > { %1925 = vmatpush.bf16.msrb.mxu3 %v4006_v23 }
 0x998   : > { %1926 = vmatpush.bf16.msrb.mxu3 %v4009_v59 }
 0x99c   : > { %1927 = vmatpush.bf16.msrb.mxu3 %v4012_v58 }
 0x9a0   : > { %1928 = vmatpush.bf16.msrb.mxu3 %v4015_v40 }
 0x9a4   : > { %1929 = vmatpush.bf16.msrb.mxu3 %v4018_v56 }
 0xa0a   : > { %v1192_v12 = vpop.f32.mrf.mxu3 }
 0xa0b   : > { %v1193_v16 = vadd.f32 %v4024_v8, %v1192_v12 }
 0xa0d   : > { %3042 = vtanh.f32 %v1193_v16 }
 0xa12   : > { %v1194_v18 = vpop.f32.mrf.mxu3 }
 0xa13   : > { %v3043_v0 = vpop.eup %3042  ;;  %v1195_v61 = vadd.f32 %v4024_v8, %v1194_v18 }
 0xa14   : > { %1211 = vrot.lane.b32.xlu2 %v3043_v0, %s3398_s15  ;;  %v1199_v35 = vpack.c.bf16 %v3043_v0, %v3043_v0 }
 0xa15   : > { %3044 = vtanh.f32 %v1195_v61 }
 0xa16   : > { %v1201_v63 = vunpack.c.l.bf16 %v1199_v35 }
 0xa18   : > { %v1203_v42 = vsub.f32 %v3043_v0, %v1201_v63 }
 0xa1a   : > { %1205 = vrot.lane.b32.xlu0 %v1203_v42, %s3397_s1 }
 0xa1b   : > { %v3045_v34 = vpop.eup %3044 }
 0xa1c   : > { %1248 = vrot.lane.b32.xlu2 %v3973_v55, %s3400_s27  ;;  %v1200_v43 = vpack.c.bf16 %v3045_v34, %v3045_v34 }
 0xa1e   : > { %v1202_v38 = vunpack.c.l.bf16 %v1200_v43 }
 0xa20   : > { %v1204_v44 = vsub.f32 %v3045_v34, %v1202_v38 }
 0xa22   : > { %1207 = vrot.lane.b32.xlu1 %v1204_v44, %s3397_s1  ;;  %1213 = vrot.lane.b32.xlu0 %v3045_v34, %s3398_s15 }
 0xa24   : > { %1262 = vrot.lane.b32.xlu2 %v3965_v7, %s3401_s28 }
 0xa2a   : > { %1246 = vrot.lane.b32.xlu1 %v3965_v7, %s3400_s27  ;;  %1254 = vrot.lane.b32.xlu0 %v3965_v7, %s3399_s24 }
 0xa32   : > { %1256 = vrot.lane.b32.xlu1 %v3973_v55, %s3399_s24  ;;  %1264 = vrot.lane.b32.xlu0 %v3973_v55, %s3401_s28 }
 0xa6e   : > { %v1212_v47 = vpop.permute.xlu2 %1211 }
 0xa76   : > { %v1249_v53 = vpop.permute.xlu2 %1248 }
 0xa77   : > { %v1251_v16 = vmul.f32 %v3617_v15, %v1249_v53 }
 0xa7e   : > { %v1263_v19 = vpop.permute.xlu2 %1262 }
 0xa7f   : > { %v1266_v18 = vmul.f32 %v3607_v10, %v1263_v19 }
 0xa8c   : > { %v1206_v45 = vpop.permute.xlu0 %1205 }
 0xa8d   : > { %v1209_v39 = vadd.f32 %v3043_v0, %v1206_v45  ;;  %v1243_v0 = vmul.f32 %v3595_v4, %v3973_v55 }
 0xa8f   : > { %v1215_v24 = vadd.f32 %v1212_v47, %v1209_v39  ;;  %v1253_v63 = vadd.f32 %v1251_v16, %v1243_v0 }
 0xa94   : > { %v1208_v46 = vpop.permute.xlu1 %1207  ;;  %v1214_v48 = vpop.permute.xlu0 %1213 }
 0xa95   : > { %v1210_v37 = vadd.f32 %v3045_v34, %v1208_v46 }
 0xa97   : > { %v1216_v25 = vadd.f32 %v1214_v48, %v1210_v37 }
 0xa99   : > { %v1217_v26 = vpack.c.bf16 %v1216_v25, %v1215_v24 }
 0xa9b   : > { %1226 = vmatmul.bf16.vlgmr.msra.gmra.mxu0 %v1217_v26 }
 0xa9c   : > { %1957 = vmatpush.bf16.msra.mxu0 %v4044_v27  ;;  %v1247_v6 = vpop.permute.xlu1 %1246  ;;  %v1255_v1 = vpop.permute.xlu0 %1254 }
 0xa9d   : > { %v1250_v54 = vmul.f32 %v3617_v15, %v1247_v6  ;;  %v1258_v17 = vmul.f32 %v3604_v9, %v1255_v1 }
 0xa9f   : > { %v1252_v2 = vadd.f32 %v1250_v54, %v1242_v57 }
 0xaa0   : > { %1958 = vmatpush.bf16.msra.mxu0 %v4047_v28 }
 0xaa1   : > { %v1260_v62 = vadd.f32 %v1258_v17, %v1252_v2 }
 0xaa3   : > { %v1268_v61 = vadd.f32 %v1266_v18, %v1260_v62 }
 0xaa4   : > { %1959 = vmatpush.bf16.msra.mxu0 %v4050_v30  ;;  %v1257_v12 = vpop.permute.xlu1 %1256  ;;  %v1265_v42 = vpop.permute.xlu0 %1264 }
 0xaa5   : > { %v1259_v35 = vmul.f32 %v3604_v9, %v1257_v12  ;;  %v1270_v34 = vsub.f32 %v1268_v61, %v3794_v60  ;;  %v1267_v38 = vmul.f32 %v3607_v10, %v1265_v42 }
 0xaa7   : > { %v1261_v43 = vadd.f32 %v1259_v35, %v1253_v63  ;;  %v1272_v44 = vmax.f32 %v1270_v34, 0.0 }
 0xaa8   : > { %1960 = vmatpush.bf16.msra.mxu0 %v4053_v31 }
 0xaa9   : > { %v1269_v45 = vadd.f32 %v1267_v38, %v1261_v43  ;;  %v1274_v39 = vmul.f32 19.6, %v1272_v44 }
 0xaab   : > { %v1271_v46 = vsub.f32 %v1269_v45, %v3794_v60  ;;  %3046 = vrsqrt.f32 %v1274_v39  ;;  %vm1283_vm4 = vcmp.eq.f32.partialorder %v1274_v39, inf  ;;  %v1286_v43 = vand.u32 2147483648, %v1274_v39 }
 0xaac   : > { %1961 = vmatpush.bf16.msra.mxu0 %v4056_v32  ;;  %vm1285_vm5 = vcmp.eq.f32.partialorder %v1274_v39, 0.0 }
 0xaad   : > { %v1273_v37 = vmax.f32 %v1271_v46, 0.0  ;;  %v1302_v46 = vmul.f32 %v3807_v51, %v1272_v44 }
 0xaaf   : > { %v1275_v47 = vmul.f32 19.6, %v1273_v37 }
 0xab0   : > { %1962 = vmatpush.bf16.msra.mxu0 %v4059_v41 }
 0xab1   : > { %v3047_v48 = vpop.eup %3046  ;;  %3048 = vrsqrt.f32 %v1275_v47  ;;  %vm1295_vm6 = vcmp.eq.f32.partialorder %v1275_v47, inf  ;;  %vm1297_vm7 = vcmp.eq.f32.partialorder %v1275_v47, 0.0 }
 0xab2   : > { %v1277_v24 = vmul.f32 %v3047_v48, %v1274_v39 }
 0xab4   : > { %1963 = vmatpush.bf16.msra.mxu0 %v4062_v50  ;;  %v1278_v25 = vmul.f32 %v3047_v48, %v1277_v24 }
 0xab6   : > { %v1279_v53 = vmul.f32 0.5, %v1278_v25 }
 0xab7   : > { %v3049_v26 = vpop.eup %3048 }
 0xab8   : > { %1964 = vmatpush.bf16.msra.mxu0 %v4065_v29  ;;  %v1289_v6 = vmul.f32 %v3049_v26, %v1275_v47  ;;  %v1280_v1 = vsub.f32 1.5, %v1279_v53 }
 0xaba   : > { %v1290_v2 = vmul.f32 %v3049_v26, %v1289_v6  ;;  %v1281_v19 = vmul.f32 %v3047_v48, %v1280_v1  ;;  %v1298_v1 = vand.u32 2147483648, %v1275_v47 }
 0xabc   : > { %v1291_v62 = vmul.f32 0.5, %v1290_v2  ;;  %v1282_v16 = vmul.f32 %v1281_v19, %v1274_v39 }
 0xabe   : > { %v1292_v18 = vsub.f32 1.5, %v1291_v62  ;;  %v1284_v42 = vsel %vm1283_vm4, %v1274_v39, %v1282_v16  ;;  %v4088_v39 = vld [vmem:[%s4737_s8] ss:$0 sm:$0xff] }
 0xabf   : > { %v1287_v45 = vsel %vm1285_vm5, %v1286_v43, %v1284_v42  ;;  %v1303_v51 = vmul.f32 %v4088_v39, %v1273_v37 }
 0xac0   : > { %v1293_v34 = vmul.f32 %v3049_v26, %v1292_v18 }
 0xac2   : > { %v1294_v24 = vmul.f32 %v1293_v34, %v1275_v47 }
 0xb18   : > { %v1227_v54 = vpop.f32.mrf.mxu0 }
 0xb19   : > { %v1228_v57 = vadd.f32 %v3800_v11, %v1227_v54 }
 0xb1b   : > { %v1232_v17 = vmul.f32 0.5, %v1228_v57  ;;  %v1296_v57 = vsel %vm1295_vm6, %v1275_v47, %v1294_v24 }
 0xb1c   : > { %v1299_v2 = vsel %vm1297_vm7, %v1298_v1, %v1296_v57 }
 0xb1d   : > { %3050 = vtanh.f32 %v1232_v17 }
 0xb20   : > { %v1229_v60 = vpop.f32.mrf.mxu0 }
 0xb21   : > { %v1230_v12 = vadd.f32 %v3800_v11, %v1229_v60 }
 0xb23   : > { %v3051_v0 = vpop.eup %3050  ;;  %v1233_v61 = vmul.f32 0.5, %v1230_v12 }
 0xb24   : > { %v1236_v35 = vadd.f32 1.0, %v3051_v0 }
 0xb25   : > { %3052 = vtanh.f32 %v1233_v61 }
 0xb26   : > { %v1238_v63 = vmul.f32 0.5, %v1236_v35 }
 0xb28   : > { %v1240_v38 = vmul.f32 %v3592_v3, %v1238_v63 }
 0xb2a   : > { %v1300_v48 = vmul.f32 %v1287_v45, %v1240_v38 }
 0xb2b   : > { %v3053_v11 = vpop.eup %3052 }
 0xb2c   : > { %v1304_v25 = vsub.f32 %v1302_v46, %v1300_v48  ;;  %v1237_v53 = vadd.f32 1.0, %v3053_v11 }
 0xb2e   : > { %v1306_v6 = vmul.f32 0.5, %v1304_v25  ;;  %v1239_v54 = vmul.f32 0.5, %v1237_v53 }
 0xb30   : > { %3054 = vtanh.f32 %v1306_v6  ;;  %v1241_v26 = vmul.f32 %v3592_v3, %v1239_v54 }
 0xb32   : > { %v1301_v44 = vmul.f32 %v1299_v2, %v1241_v26  ;;  %v2857_v26 = vld [vmem:[%s3577_s5 + $0x20] sm:$0xff] }
 0xb34   : > { %v1305_v17 = vsub.f32 %v1303_v51, %v1301_v44 }
 0xb36   : > { %v3055_v19 = vpop.eup %3054  ;;  %v1307_v62 = vmul.f32 0.5, %v1305_v17 }
 0xb37   : > { %v1310_v60 = vadd.f32 1.0, %v3055_v19 }
 0xb38   : > { %3056 = vtanh.f32 %v1307_v62 }
 0xb39   : > { %v1312_v12 = vmul.f32 0.5, %v1310_v60 }
 0xb3b   : > { %v1314_v16 = vmul.f32 %v1312_v12, %v1300_v48 }
 0xb3d   : > { %v4092_v18 = vmul.f32 %v4088_v39, %v1314_v16 }
 0xb3e   : > { %v3057_v47 = vpop.eup %3056 }
 0xb3f   : > { %4760 = vst [vmem:[#allocation18_spill] sm:$0xff] %v4092_v18  ;;  %v1311_v0 = vadd.f32 1.0, %v3057_v47  ;;  %v1338_v61 = vmul.f32 %v3607_v10, %v4092_v18  ;;  %v1330_v35 = vmul.f32 %v3604_v9, %v4092_v18  ;;  %v1318_v37 = vmul.f32 %v3595_v4, %v4092_v18 }
 0xb40   : > { %v1322_v38 = vmul.f32 %v3617_v15, %v4092_v18 }
 0xb41   : > { %v1313_v63 = vmul.f32 0.5, %v1311_v0  ;;  %1360 = vrot.lane.b32.xlu2 %v1338_v61, %s3402_s22  ;;  %1354 = vrot.lane.b32.xlu0 %v1330_v35, %s3403_s29 }
 0xb42   : > { %1346 = vrot.lane.b32.xlu1 %v1318_v37, %s3400_s27 }
 0xb43   : > { %v1315_v42 = vmul.f32 %v1313_v63, %v1301_v44 }
 0xb45   : > { %v4104_v34 = vmul.f32 %v4088_v39, %v1315_v42 }
 0xb47   : > { %4761 = vst [vmem:[#allocation19_spill] sm:$0xff] %v4104_v34  ;;  %v1319_v43 = vmul.f32 %v3595_v4, %v4104_v34  ;;  %v1339_v45 = vmul.f32 %v3607_v10, %v4104_v34  ;;  %v1323_v46 = vmul.f32 %v3617_v15, %v4104_v34  ;;  %v1331_v48 = vmul.f32 %v3604_v9, %v4104_v34 }
 0xb49   : > { %1332 = vrot.lane.b32.xlu0 %v1330_v35, %s3402_s22  ;;  %1348 = vrot.lane.b32.xlu2 %v1319_v43, %s3400_s27 }
 0xb4a   : > { %1324 = vrot.lane.b32.xlu1 %v1322_v38, %s3403_s29 }
 0xb51   : > { %1362 = vrot.lane.b32.xlu0 %v1339_v45, %s3402_s22  ;;  %1326 = vrot.lane.b32.xlu2 %v1323_v46, %s3403_s29 }
 0xb52   : > { %1356 = vrot.lane.b32.xlu1 %v1331_v48, %s3403_s29 }
 0xb59   : > { %1342 = vrot.lane.b32.xlu0 %v1339_v45, %s3404_s14  ;;  %1340 = vrot.lane.b32.xlu2 %v1338_v61, %s3404_s14 }
 0xb5a   : > { %1334 = vrot.lane.b32.xlu1 %v1331_v48, %s3402_s22  ;;  %v2858_v48 = vld [vmem:[%s3577_s5 + $0x28] sm:$0xff] }
 0xb9b   : > { %v1361_v24 = vpop.permute.xlu2 %1360 }
 0xba3   : > { %v1349_v11 = vpop.permute.xlu2 %1348 }
 0xba4   : > { %v1353_v47 = vadd.f32 %v1349_v11, %v1323_v46 }
 0xbab   : > { %v1327_v54 = vpop.permute.xlu2 %1326 }
 0xbb3   : > { %v1355_v25 = vpop.permute.xlu0 %1354  ;;  %v1341_v60 = vpop.permute.xlu2 %1340 }
 0xbb4   : > { %v1347_v53 = vpop.permute.xlu1 %1346 }
 0xbb5   : > { %v1352_v6 = vadd.f32 %v1347_v53, %v1322_v38 }
 0xbb7   : > { %v1358_v57 = vadd.f32 %v1355_v25, %v1352_v6  ;;  %v1329_v25 = vadd.f32 %v1327_v54, %v1319_v43 }
 0xbb9   : > { %v1364_v1 = vadd.f32 %v1361_v24, %v1358_v57 }
 0xbbb   : > { %v1366_v2 = vmul.f32 %v3615_v13, %v1364_v1  ;;  %v1333_v51 = vpop.permute.xlu0 %1332 }
 0xbbc   : > { %v1325_v44 = vpop.permute.xlu1 %1324 }
 0xbbd   : > { %v1371_v17 = vadd.f32 %v2857_v26, %v1366_v2  ;;  %v1328_v19 = vadd.f32 %v1325_v44, %v1318_v37 }
 0xbbf   : > { %v1336_v62 = vadd.f32 %v1333_v51, %v1328_v19  ;;  %v1373_v12 = vadd.f32 %v1371_v17, %v3965_v7 }
 0xbc1   : > { %v1344_v16 = vadd.f32 %v1341_v60, %v1336_v62 }
 0xbc3   : > { %v4128_v0 = vsub.f32 %v1373_v12, %v1344_v16  ;;  %v1363_v35 = vpop.permute.xlu0 %1362 }
 0xbc4   : > { %v1357_v61 = vpop.permute.xlu1 %1356 }
 0xbc5   : > { %v1359_v63 = vadd.f32 %v1357_v61, %v1353_v47  ;;  %v1385_v42 = vmul.f32 0.2, %v4128_v0  ;;  %v4141_v61 = vld [vmem:[#allocation8 + $0x38] sm:$0xff] }
 0xbc7   : > { %v1365_v38 = vadd.f32 %v1363_v35, %v1359_v63  ;;  %1399 = vrot.lane.b32.xlu0 %v1385_v42, %s3398_s15  ;;  %v1387_v45 = vpack.c.bf16 %v1385_v42, %v1385_v42  ;;  %v4144_v35 = vld [vmem:[#allocation8 + $0x30] sm:$0xff]  ;;  %v4147_v63 = vld [vmem:[#allocation8 + $0x28] sm:$0xff] }
 0xbc9   : > { %v1367_v37 = vmul.f32 %v3615_v13, %v1365_v38  ;;  %v1389_v24 = vunpack.c.l.bf16 %v1387_v45  ;;  %v4153_v38 = vld [vmem:[#allocation8 + $0x18] sm:$0xff]  ;;  %v4156_v45 = vld [vmem:[#allocation8 + $0x10] sm:$0xff] }
 0xbcb   : > { %v1372_v53 = vadd.f32 %v2858_v48, %v1367_v37  ;;  %v1391_v7 = vsub.f32 %v1385_v42, %v1389_v24  ;;  %v1343_v11 = vpop.permute.xlu0 %1342  ;;  %v4159_v48 = vld [vmem:[#allocation8 + $0x8] sm:$0xff]  ;;  %v4162_v37 = vld [vmem:[#allocation8] sm:$0xff] }
 0xbcc   : > { %v1335_v6 = vpop.permute.xlu1 %1334 }
 0xbcd   : > { %v1337_v46 = vadd.f32 %v1335_v6, %v1329_v25  ;;  %1393 = vrot.lane.b32.xlu1 %v1391_v7, %s3397_s1  ;;  %v1374_v57 = vadd.f32 %v1372_v53, %v3973_v55 }
 0xbcf   : > { %v1345_v1 = vadd.f32 %v1343_v11, %v1337_v46 }
 0xbd1   : > { %v4136_v26 = vsub.f32 %v1374_v57, %v1345_v1 }
 0xbd3   : > { %v1386_v2 = vmul.f32 0.2, %v4136_v26 }
 0xbd5   : > { %1401 = vrot.lane.b32.xlu1 %v1386_v2, %s3398_s15  ;;  %v1388_v51 = vpack.c.bf16 %v1386_v2, %v1386_v2 }
 0xbd7   : > { %v1390_v44 = vunpack.c.l.bf16 %v1388_v51 }
 0xbd9   : > { %v1392_v17 = vsub.f32 %v1386_v2, %v1390_v44 }
 0xbdb   : > { %1395 = vrot.lane.b32.xlu2 %v1392_v17, %s3397_s1 }
 0xc35   : > { %v1396_v54 = vpop.permute.xlu2 %1395 }
 0xc36   : > { %v1398_v62 = vadd.f32 %v1396_v54, %v1386_v2 }
 0xc39   : > { %v1400_v60 = vpop.permute.xlu0 %1399 }
 0xc3f   : > { %v1394_v43 = vpop.permute.xlu1 %1393 }
 0xc40   : > { %v1397_v19 = vadd.f32 %v1394_v43, %v1385_v42  ;;  %v4150_v42 = vld [vmem:[#allocation8 + $0x20] sm:$0xff] }
 0xc42   : > { %v1403_v16 = vadd.f32 %v1400_v60, %v1397_v19 }
 0xc47   : > { %v1402_v12 = vpop.permute.xlu1 %1401 }
 0xc48   : > { %v1404_v55 = vadd.f32 %v1402_v12, %v1398_v62 }
 0xc4a   : > { %v1405_v47 = vpack.c.bf16 %v1404_v55, %v1403_v16 }
 0xc4c   : > { %1414 = vmatmul.bf16.vlgmr.msra.gmra.mxu1 %v1405_v47 }
 0xc4d   : > { %1992 = vmatpush.bf16.msra.mxu1 %v4141_v61 }
 0xc51   : > { %1993 = vmatpush.bf16.msra.mxu1 %v4144_v35 }
 0xc55   : > { %1994 = vmatpush.bf16.msra.mxu1 %v4147_v63 }
 0xc59   : > { %1995 = vmatpush.bf16.msra.mxu1 %v4150_v42 }
 0xc5d   : > { %1996 = vmatpush.bf16.msra.mxu1 %v4153_v38 }
 0xc61   : > { %1997 = vmatpush.bf16.msra.mxu1 %v4156_v45 }
 0xc65   : > { %1998 = vmatpush.bf16.msra.mxu1 %v4159_v48 }
 0xc69   : > { %1999 = vmatpush.bf16.msra.mxu1 %v4162_v37 }
 0xcc9   : > { %v1415_v24 = vpop.f32.mrf.mxu1 }
 0xcca   : > { %v1416_v25 = vadd.f32 %v3989_v49, %v1415_v24 }
 0xccc   : > { %3058 = vtanh.f32 %v1416_v25 }
 0xcd1   : > { %v1417_v53 = vpop.f32.mrf.mxu1 }
 0xcd2   : > { %v3059_v7 = vpop.eup %3058  ;;  %v1418_v6 = vadd.f32 %v3989_v49, %v1417_v53 }
 0xcd3   : > { %1434 = vrot.lane.b32.xlu1 %v3059_v7, %s3398_s15  ;;  %v1422_v46 = vpack.c.bf16 %v3059_v7, %v3059_v7 }
 0xcd4   : > { %3060 = vtanh.f32 %v1418_v6 }
 0xcd5   : > { %v1424_v11 = vunpack.c.l.bf16 %v1422_v46 }
 0xcd7   : > { %v1426_v57 = vsub.f32 %v3059_v7, %v1424_v11 }
 0xcd9   : > { %1428 = vrot.lane.b32.xlu2 %v1426_v57, %s3397_s1 }
 0xcda   : > { %v3061_v1 = vpop.eup %3060 }
 0xcdb   : > { %v1423_v2 = vpack.c.bf16 %v3061_v1, %v3061_v1 }
 0xcdd   : > { %v1425_v51 = vunpack.c.l.bf16 %v1423_v2 }
 0xcdf   : > { %v1427_v44 = vsub.f32 %v3061_v1, %v1425_v51 }
 0xce1   : > { %1430 = vrot.lane.b32.xlu0 %v1427_v44, %s3397_s1  ;;  %1436 = vrot.lane.b32.xlu2 %v3061_v1, %s3398_s15 }
 0xd33   : > { %v1429_v17 = vpop.permute.xlu2 %1428 }
 0xd34   : > { %v1432_v19 = vadd.f32 %v3059_v7, %v1429_v17 }
 0xd3b   : > { %v1437_v60 = vpop.permute.xlu2 %1436 }
 0xd45   : > { %v1435_v43 = vpop.permute.xlu1 %1434 }
 0xd46   : > { %v1438_v12 = vadd.f32 %v1435_v43, %v1432_v19 }
 0xd53   : > { %v1431_v54 = vpop.permute.xlu0 %1430 }
 0xd54   : > { %v1433_v62 = vadd.f32 %v3061_v1, %v1431_v54 }
 0xd56   : > { %v1439_v16 = vadd.f32 %v1437_v60, %v1433_v62 }
 0xd58   : > { %v1440_v55 = vpack.c.bf16 %v1439_v16, %v1438_v12 }
 0xd5a   : > { %1449 = vmatmul.bf16.vlgmr.msra.gmra.mxu2 %v1440_v55 }
 0xd5b   : > { %2180 = vmatpush.bf16.msra.mxu2 %v3997_v20 }
 0xd5f   : > { %2181 = vmatpush.bf16.msra.mxu2 %v4000_v21 }
 0xd63   : > { %2182 = vmatpush.bf16.msra.mxu2 %v4003_v22 }
 0xd67   : > { %2183 = vmatpush.bf16.msra.mxu2 %v4006_v23 }
 0xd6b   : > { %2184 = vmatpush.bf16.msra.mxu2 %v4009_v59 }
 0xd6f   : > { %2185 = vmatpush.bf16.msra.mxu2 %v4012_v58 }
 0xd73   : > { %2186 = vmatpush.bf16.msra.mxu2 %v4015_v40 }
 0xd77   : > { %2187 = vmatpush.bf16.msra.mxu2 %v4018_v56 }
 0xddd   : > { %v1450_v47 = vpop.f32.mrf.mxu2 }
 0xdde   : > { %v1451_v24 = vadd.f32 %v4024_v8, %v1450_v47 }
 0xde0   : > { %3062 = vtanh.f32 %v1451_v24 }
 0xde5   : > { %v1452_v25 = vpop.f32.mrf.mxu2 }
 0xde6   : > { %v3063_v53 = vpop.eup %3062  ;;  %v1453_v7 = vadd.f32 %v4024_v8, %v1452_v25  ;;  %v1500_v25 = vmul.f32 %v3595_v4, %v4128_v0 }
 0xde7   : > { %1469 = vrot.lane.b32.xlu2 %v3063_v53, %s3398_s15  ;;  %v1457_v6 = vpack.c.bf16 %v3063_v53, %v3063_v53 }
 0xde8   : > { %3064 = vtanh.f32 %v1453_v7 }
 0xde9   : > { %v1459_v46 = vunpack.c.l.bf16 %v1457_v6 }
 0xdeb   : > { %v1461_v11 = vsub.f32 %v3063_v53, %v1459_v46 }
 0xded   : > { %1463 = vrot.lane.b32.xlu0 %v1461_v11, %s3397_s1 }
 0xdee   : > { %v3065_v57 = vpop.eup %3064 }
 0xdef   : > { %1506 = vrot.lane.b32.xlu2 %v4136_v26, %s3400_s27  ;;  %v1458_v1 = vpack.c.bf16 %v3065_v57, %v3065_v57 }
 0xdf1   : > { %v1460_v2 = vunpack.c.l.bf16 %v1458_v1 }
 0xdf3   : > { %v1462_v51 = vsub.f32 %v3065_v57, %v1460_v2 }
 0xdf5   : > { %1465 = vrot.lane.b32.xlu1 %v1462_v51, %s3397_s1  ;;  %1471 = vrot.lane.b32.xlu0 %v3065_v57, %s3398_s15  ;;  %v1501_v51 = vmul.f32 %v3595_v4, %v4136_v26 }
 0xdf7   : > { %1520 = vrot.lane.b32.xlu2 %v4128_v0, %s3401_s28 }
 0xdfd   : > { %1504 = vrot.lane.b32.xlu1 %v4128_v0, %s3400_s27  ;;  %1512 = vrot.lane.b32.xlu0 %v4128_v0, %s3399_s24 }
 0xe05   : > { %1514 = vrot.lane.b32.xlu1 %v4136_v26, %s3399_s24  ;;  %1522 = vrot.lane.b32.xlu0 %v4136_v26, %s3401_s28 }
 0xe41   : > { %v1470_v19 = vpop.permute.xlu2 %1469 }
 0xe49   : > { %v1507_v55 = vpop.permute.xlu2 %1506 }
 0xe4a   : > { %v1509_v1 = vmul.f32 %v3617_v15, %v1507_v55 }
 0xe51   : > { %v1521_v46 = vpop.permute.xlu2 %1520 }
 0xe52   : > { %v1524_v2 = vmul.f32 %v3607_v10, %v1521_v46 }
 0xe5f   : > { %v1464_v44 = vpop.permute.xlu0 %1463 }
 0xe60   : > { %v1467_v17 = vadd.f32 %v3063_v53, %v1464_v44 }
 0xe62   : > { %v1473_v60 = vadd.f32 %v1470_v19, %v1467_v17  ;;  %v4217_v19 = vld [vmem:[%s4736_s7] ss:$0 sm:$0xff] }
 0xe67   : > { %v1466_v43 = vpop.permute.xlu1 %1465  ;;  %v1472_v62 = vpop.permute.xlu0 %1471 }
 0xe68   : > { %v1468_v54 = vadd.f32 %v3065_v57, %v1466_v43  ;;  %v1511_v43 = vadd.f32 %v1509_v1, %v1501_v51  ;;  %v4225_v51 = vld [vmem:[%s4735_s6] ss:$0 sm:$0xff] }
 0xe6a   : > { %v1474_v12 = vadd.f32 %v1472_v62, %v1468_v54 }
 0xe6c   : > { %v1475_v16 = vpack.c.bf16 %v1474_v12, %v1473_v60 }
 0xe6e   : > { %1484 = vmatmul.bf16.vlgmr.msra.gmra.mxu3 %v1475_v16 }
 0xe6f   : > { %2215 = vmatpush.bf16.msra.mxu3 %v4044_v27  ;;  %v1505_v47 = vpop.permute.xlu1 %1504  ;;  %v1513_v53 = vpop.permute.xlu0 %1512 }
 0xe70   : > { %v1508_v24 = vmul.f32 %v3617_v15, %v1505_v47  ;;  %v1516_v6 = vmul.f32 %v3604_v9, %v1513_v53 }
 0xe72   : > { %v1510_v7 = vadd.f32 %v1508_v24, %v1500_v25 }
 0xe73   : > { %2216 = vmatpush.bf16.msra.mxu3 %v4047_v28 }
 0xe74   : > { %v1518_v11 = vadd.f32 %v1516_v6, %v1510_v7 }
 0xe76   : > { %v1526_v44 = vadd.f32 %v1524_v2, %v1518_v11 }
 0xe77   : > { %2217 = vmatpush.bf16.msra.mxu3 %v4050_v30  ;;  %v1515_v57 = vpop.permute.xlu1 %1514  ;;  %v1523_v54 = vpop.permute.xlu0 %1522 }
 0xe78   : > { %v1517_v17 = vmul.f32 %v3604_v9, %v1515_v57  ;;  %v1528_v62 = vsub.f32 %v1526_v44, %v4217_v19  ;;  %v1525_v12 = vmul.f32 %v3607_v10, %v1523_v54 }
 0xe7a   : > { %v1519_v60 = vadd.f32 %v1517_v17, %v1511_v43  ;;  %v1530_v16 = vmax.f32 %v1528_v62, 0.0 }
 0xe7b   : > { %2218 = vmatpush.bf16.msra.mxu3 %v4053_v31 }
 0xe7c   : > { %v1527_v55 = vadd.f32 %v1525_v12, %v1519_v60  ;;  %v1532_v47 = vmul.f32 19.6, %v1530_v16 }
 0xe7e   : > { %v1529_v24 = vsub.f32 %v1527_v55, %v4217_v19  ;;  %3066 = vrsqrt.f32 %v1532_v47  ;;  %vm1541_vm8 = vcmp.eq.f32.partialorder %v1532_v47, inf  ;;  %vm1543_vm9 = vcmp.eq.f32.partialorder %v1532_v47, 0.0 }
 0xe7f   : > { %2219 = vmatpush.bf16.msra.mxu3 %v4056_v32 }
 0xe80   : > { %v1531_v25 = vmax.f32 %v1529_v24, 0.0 }
 0xe82   : > { %v1533_v53 = vmul.f32 19.6, %v1531_v25 }
 0xe83   : > { %2220 = vmatpush.bf16.msra.mxu3 %v4059_v41 }
 0xe84   : > { %v3067_v7 = vpop.eup %3066  ;;  %3068 = vrsqrt.f32 %v1533_v53  ;;  %vm1553_vm10 = vcmp.eq.f32.partialorder %v1533_v53, inf  ;;  %vm1555_vm11 = vcmp.eq.f32.partialorder %v1533_v53, 0.0 }
 0xe85   : > { %v1535_v6 = vmul.f32 %v3067_v7, %v1532_v47 }
 0xe87   : > { %2221 = vmatpush.bf16.msra.mxu3 %v4062_v50  ;;  %v1536_v46 = vmul.f32 %v3067_v7, %v1535_v6 }
 0xe89   : > { %v1537_v57 = vmul.f32 0.5, %v1536_v46 }
 0xe8a   : > { %v3069_v11 = vpop.eup %3068 }
 0xe8b   : > { %2222 = vmatpush.bf16.msra.mxu3 %v4065_v29  ;;  %v1547_v1 = vmul.f32 %v3069_v11, %v1533_v53  ;;  %v1538_v17 = vsub.f32 1.5, %v1537_v57 }
 0xe8d   : > { %v1548_v43 = vmul.f32 %v3069_v11, %v1547_v1  ;;  %v1539_v62 = vmul.f32 %v3067_v7, %v1538_v17  ;;  %v1560_v7 = vmul.f32 %v4088_v39, %v1530_v16 }
 0xe8f   : > { %v1549_v60 = vmul.f32 0.5, %v1548_v43  ;;  %v1540_v24 = vmul.f32 %v1539_v62, %v1532_v47 }
 0xe91   : > { %v1550_v6 = vsub.f32 1.5, %v1549_v60  ;;  %v1542_v36 = vsel %vm1541_vm8, %v1532_v47, %v1540_v24 }
 0xe93   : > { %v1551_v18 = vmul.f32 %v3069_v11, %v1550_v6 }
 0xe95   : > { %v1552_v17 = vmul.f32 %v1551_v18, %v1533_v53 }
 0xef1   : > { %v1485_v2 = vpop.f32.mrf.mxu3 }
 0xef2   : > { %v1486_v44 = vadd.f32 %v4225_v51, %v1485_v2  ;;  %v1544_v2 = vand.u32 2147483648, %v1532_v47 }
 0xef4   : > { %v1490_v54 = vmul.f32 0.5, %v1486_v44  ;;  %v1545_v1 = vsel %vm1543_vm9, %v1544_v2, %v1542_v36 }
 0xef6   : > { %3070 = vtanh.f32 %v1490_v54 }
 0xef9   : > { %v1487_v12 = vpop.f32.mrf.mxu3 }
 0xefa   : > { %v1488_v55 = vadd.f32 %v4225_v51, %v1487_v12 }
 0xefc   : > { %v3071_v46 = vpop.eup %3070  ;;  %v1491_v34 = vmul.f32 0.5, %v1488_v55  ;;  %v1554_v55 = vsel %vm1553_vm10, %v1533_v53, %v1552_v17 }
 0xefd   : > { %v1494_v33 = vadd.f32 1.0, %v3071_v46 }
 0xefe   : > { %3072 = vtanh.f32 %v1491_v34  ;;  %v1556_v34 = vand.u32 2147483648, %v1533_v53 }
 0xeff   : > { %v1496_v14 = vmul.f32 0.5, %v1494_v33 }
 0xf00   : > { %v1557_v11 = vsel %vm1555_vm11, %v1556_v34, %v1554_v55 }
 0xf01   : > { %v1498_v57 = vmul.f32 %v3592_v3, %v1496_v14  ;;  %v1561_v14 = vmul.f32 %v4088_v39, %v1531_v25 }
 0xf03   : > { %v1558_v44 = vmul.f32 %v1545_v1, %v1498_v57 }
 0xf04   : > { %v3073_v43 = vpop.eup %3072 }
 0xf05   : > { %v1562_v54 = vsub.f32 %v1560_v7, %v1558_v44  ;;  %v1495_v62 = vadd.f32 1.0, %v3073_v43 }
 0xf07   : > { %v1564_v60 = vmul.f32 0.5, %v1562_v54  ;;  %v1497_v12 = vmul.f32 0.5, %v1495_v62 }
 0xf09   : > { %3074 = vtanh.f32 %v1564_v60  ;;  %v1499_v33 = vmul.f32 %v3592_v3, %v1497_v12 }
 0xf0b   : > { %v1559_v36 = vmul.f32 %v1557_v11, %v1499_v33 }
 0xf0d   : > { %v1563_v47 = vsub.f32 %v1561_v14, %v1559_v36 }
 0xf0f   : > { %v3075_v16 = vpop.eup %3074  ;;  %v1565_v24 = vmul.f32 0.5, %v1563_v47 }
 0xf10   : > { %v1568_v18 = vadd.f32 1.0, %v3075_v16 }
 0xf11   : > { %3076 = vtanh.f32 %v1565_v24 }
 0xf12   : > { %v1570_v6 = vmul.f32 0.5, %v1568_v18  ;;  %v2859_v18 = vld [vmem:[%s3577_s5 + $0x30] sm:$0xff] }
 0xf14   : > { %v1572_v46 = vmul.f32 %v1570_v6, %v1558_v44 }
 0xf16   : > { %v4234_v2 = vmul.f32 %v4088_v39, %v1572_v46 }
 0xf17   : > { %v3077_v57 = vpop.eup %3076 }
 0xf18   : > { %4762 = vst [vmem:[#allocation20_spill] sm:$0xff] %v4234_v2  ;;  %v1569_v1 = vadd.f32 1.0, %v3077_v57  ;;  %v1596_v7 = vmul.f32 %v3607_v10, %v4234_v2  ;;  %v1588_v53 = vmul.f32 %v3604_v9, %v4234_v2  ;;  %v1576_v25 = vmul.f32 %v3595_v4, %v4234_v2 }
 0xf19   : > { %v1580_v62 = vmul.f32 %v3617_v15, %v4234_v2 }
 0xf1a   : > { %v1571_v17 = vmul.f32 0.5, %v1569_v1  ;;  %1618 = vrot.lane.b32.xlu2 %v1596_v7, %s3402_s22  ;;  %1612 = vrot.lane.b32.xlu0 %v1588_v53, %s3403_s29 }
 0xf1b   : > { %1604 = vrot.lane.b32.xlu1 %v1576_v25, %s3400_s27 }
 0xf1c   : > { %v1573_v44 = vmul.f32 %v1571_v17, %v1559_v36 }
 0xf1e   : > { %v4246_v43 = vmul.f32 %v4088_v39, %v1573_v44 }
 0xf20   : > { %v1577_v54 = vmul.f32 %v3595_v4, %v4246_v43  ;;  %v1597_v60 = vmul.f32 %v3607_v10, %v4246_v43  ;;  %v1581_v12 = vmul.f32 %v3617_v15, %v4246_v43  ;;  %v1589_v55 = vmul.f32 %v3604_v9, %v4246_v43 }
 0xf22   : > { %1590 = vrot.lane.b32.xlu0 %v1588_v53, %s3402_s22  ;;  %1606 = vrot.lane.b32.xlu2 %v1577_v54, %s3400_s27 }
 0xf23   : > { %1582 = vrot.lane.b32.xlu1 %v1580_v62, %s3403_s29 }
 0xf2a   : > { %1620 = vrot.lane.b32.xlu0 %v1597_v60, %s3402_s22  ;;  %1584 = vrot.lane.b32.xlu2 %v1581_v12, %s3403_s29 }
 0xf2b   : > { %1614 = vrot.lane.b32.xlu1 %v1589_v55, %s3403_s29 }
 0xf32   : > { %1600 = vrot.lane.b32.xlu0 %v1597_v60, %s3404_s14  ;;  %1598 = vrot.lane.b32.xlu2 %v1596_v7, %s3404_s14 }
 0xf33   : > { %1592 = vrot.lane.b32.xlu1 %v1589_v55, %s3402_s22 }
 0xf74   : > { %v1619_v34 = vpop.permute.xlu2 %1618 }
 0xf7c   : > { %v1607_v33 = vpop.permute.xlu2 %1606 }
 0xf7d   : > { %v1611_v55 = vadd.f32 %v1607_v33, %v1581_v12 }
 0xf84   : > { %v1585_v47 = vpop.permute.xlu2 %1584 }
 0xf8c   : > { %v1613_v11 = vpop.permute.xlu0 %1612  ;;  %v1599_v7 = vpop.permute.xlu2 %1598 }
 0xf8d   : > { %v1605_v14 = vpop.permute.xlu1 %1604 }
 0xf8e   : > { %v1610_v36 = vadd.f32 %v1605_v14, %v1580_v62 }
 0xf90   : > { %v1616_v16 = vadd.f32 %v1613_v11, %v1610_v36 }
 0xf92   : > { %v1622_v24 = vadd.f32 %v1619_v34, %v1616_v16 }
 0xf94   : > { %v1624_v6 = vmul.f32 %v3615_v13, %v1622_v24  ;;  %v1591_v46 = vpop.permute.xlu0 %1590  ;;  %v2860_v24 = vld [vmem:[%s3577_s5 + $0x38] sm:$0xff] }
 0xf95   : > { %v1583_v57 = vpop.permute.xlu1 %1582 }
 0xf96   : > { %v1629_v1 = vadd.f32 %v2859_v18, %v1624_v6  ;;  %v1586_v53 = vadd.f32 %v1583_v57, %v1576_v25  ;;  %v1587_v6 = vadd.f32 %v1585_v47, %v1577_v54 }
 0xf98   : > { %v1594_v17 = vadd.f32 %v1591_v46, %v1586_v53  ;;  %v1631_v44 = vadd.f32 %v1629_v1, %v4128_v0 }
 0xf9a   : > { %v1602_v60 = vadd.f32 %v1599_v7, %v1594_v17 }
 0xf9c   : > { %v4270_v2 = vsub.f32 %v1631_v44, %v1602_v60  ;;  %v1621_v14 = vpop.permute.xlu0 %1620 }
 0xf9d   : > { %v1615_v62 = vpop.permute.xlu1 %1614 }
 0xf9e   : > { %v1617_v11 = vadd.f32 %v1615_v62, %v1611_v55  ;;  %v1643_v34 = vmul.f32 0.2, %v4270_v2 }
 0xfa0   : > { %v1623_v36 = vadd.f32 %v1621_v14, %v1617_v11  ;;  %1657 = vrot.lane.b32.xlu0 %v1643_v34, %s3398_s15  ;;  %v1645_v16 = vpack.c.bf16 %v1643_v34, %v1643_v34 }
 0xfa2   : > { %v1625_v25 = vmul.f32 %v3615_v13, %v1623_v36  ;;  %v1647_v18 = vunpack.c.l.bf16 %v1645_v16 }
 0xfa4   : > { %v1630_v46 = vadd.f32 %v2860_v24, %v1625_v25  ;;  %v1649_v0 = vsub.f32 %v1643_v34, %v1647_v18  ;;  %v1601_v33 = vpop.permute.xlu0 %1600 }
 0xfa5   : > { %v1593_v57 = vpop.permute.xlu1 %1592 }
 0xfa6   : > { %v1595_v12 = vadd.f32 %v1593_v57, %v1587_v6  ;;  %1651 = vrot.lane.b32.xlu1 %v1649_v0, %s3397_s1  ;;  %v1632_v1 = vadd.f32 %v1630_v46, %v4136_v26 }
 0xfa8   : > { %v1603_v53 = vadd.f32 %v1601_v33, %v1595_v12 }
 0xfaa   : > { %v4278_v17 = vsub.f32 %v1632_v1, %v1603_v53 }
 0xfac   : > { %v1644_v7 = vmul.f32 0.2, %v4278_v17 }
 0xfae   : > { %1659 = vrot.lane.b32.xlu1 %v1644_v7, %s3398_s15  ;;  %v1646_v44 = vpack.c.bf16 %v1644_v7, %v1644_v7 }
 0xfb0   : > { %v1648_v60 = vunpack.c.l.bf16 %v1646_v44 }
 0xfb2   : > { %v1650_v55 = vsub.f32 %v1644_v7, %v1648_v60 }
 0xfb4   : > { %1653 = vrot.lane.b32.xlu2 %v1650_v55, %s3397_s1 }
0x100e   : > { %v1654_v47 = vpop.permute.xlu2 %1653 }
0x100f   : > { %v1656_v14 = vadd.f32 %v1654_v47, %v1644_v7 }
0x1012   : > { %v1658_v11 = vpop.permute.xlu0 %1657 }
0x1018   : > { %v1652_v54 = vpop.permute.xlu1 %1651 }
0x1019   : > { %v1655_v62 = vadd.f32 %v1652_v54, %v1643_v34 }
0x101b   : > { %v1661_v16 = vadd.f32 %v1658_v11, %v1655_v62 }
0x1020   : > { %v1660_v36 = vpop.permute.xlu1 %1659 }
0x1021   : > { %v1662_v26 = vadd.f32 %v1660_v36, %v1656_v14 }
0x1023   : > { %v1663_v24 = vpack.c.bf16 %v1662_v26, %v1661_v16 }
0x1025   : > { %1672 = vmatmul.bf16.vlgmr.msrb.gmra.mxu0 %v1663_v24 }
0x1026   : > { %2250 = vmatpush.bf16.msrb.mxu0 %v4141_v61 }
0x102a   : > { %2251 = vmatpush.bf16.msrb.mxu0 %v4144_v35 }
0x102e   : > { %2252 = vmatpush.bf16.msrb.mxu0 %v4147_v63 }
0x1032   : > { %2253 = vmatpush.bf16.msrb.mxu0 %v4150_v42 }
0x1036   : > { %2254 = vmatpush.bf16.msrb.mxu0 %v4153_v38 }
0x103a   : > { %2255 = vmatpush.bf16.msrb.mxu0 %v4156_v45 }
0x103e   : > { %2256 = vmatpush.bf16.msrb.mxu0 %v4159_v48 }
0x1042   : > { %2257 = vmatpush.bf16.msrb.mxu0 %v4162_v37 }
0x10a2   : > { %v1673_v34 = vpop.f32.mrf.mxu0 }
0x10a3   : > { %v1674_v25 = vadd.f32 %v3989_v49, %v1673_v34 }
0x10a5   : > { %3078 = vtanh.f32 %v1674_v25 }
0x10aa   : > { %v1675_v18 = vpop.f32.mrf.mxu0 }
0x10ab   : > { %v3079_v6 = vpop.eup %3078  ;;  %v1676_v46 = vadd.f32 %v3989_v49, %v1675_v18 }
0x10ac   : > { %1692 = vrot.lane.b32.xlu1 %v3079_v6, %s3398_s15  ;;  %v1680_v0 = vpack.c.bf16 %v3079_v6, %v3079_v6 }
0x10ad   : > { %3080 = vtanh.f32 %v1676_v46 }
0x10ae   : > { %v1682_v57 = vunpack.c.l.bf16 %v1680_v0 }
0x10b0   : > { %v1684_v12 = vsub.f32 %v3079_v6, %v1682_v57 }
0x10b2   : > { %1686 = vrot.lane.b32.xlu2 %v1684_v12, %s3397_s1 }
0x10b3   : > { %v3081_v33 = vpop.eup %3080 }
0x10b4   : > { %v1681_v1 = vpack.c.bf16 %v3081_v33, %v3081_v33 }
0x10b6   : > { %v1683_v53 = vunpack.c.l.bf16 %v1681_v1 }
0x10b8   : > { %v1685_v7 = vsub.f32 %v3081_v33, %v1683_v53 }
0x10ba   : > { %1688 = vrot.lane.b32.xlu0 %v1685_v7, %s3397_s1  ;;  %1694 = vrot.lane.b32.xlu2 %v3081_v33, %s3398_s15 }
0x110c   : > { %v1687_v44 = vpop.permute.xlu2 %1686 }
0x110d   : > { %v1690_v49 = vadd.f32 %v3079_v6, %v1687_v44 }
0x1114   : > { %v1695_v47 = vpop.permute.xlu2 %1694 }
0x111e   : > { %v1693_v60 = vpop.permute.xlu1 %1692 }
0x111f   : > { %v1696_v62 = vadd.f32 %v1693_v60, %v1690_v49 }
0x112c   : > { %v1689_v55 = vpop.permute.xlu0 %1688 }
0x112d   : > { %v1691_v54 = vadd.f32 %v3081_v33, %v1689_v55 }
0x112f   : > { %v1697_v14 = vadd.f32 %v1695_v47, %v1691_v54 }
0x1131   : > { %v1698_v11 = vpack.c.bf16 %v1697_v14, %v1696_v62 }
0x1133   : > { %1707 = vmatmul.bf16.vlgmr.msrb.gmra.mxu1 %v1698_v11 }
0x1134   : > { %2438 = vmatpush.bf16.msrb.mxu1 %v3997_v20 }
0x1138   : > { %2439 = vmatpush.bf16.msrb.mxu1 %v4000_v21 }
0x113c   : > { %2440 = vmatpush.bf16.msrb.mxu1 %v4003_v22 }
0x1140   : > { %2441 = vmatpush.bf16.msrb.mxu1 %v4006_v23 }
0x1144   : > { %2442 = vmatpush.bf16.msrb.mxu1 %v4009_v59 }
0x1148   : > { %2443 = vmatpush.bf16.msrb.mxu1 %v4012_v58 }
0x114c   : > { %2444 = vmatpush.bf16.msrb.mxu1 %v4015_v40 }
0x1150   : > { %2445 = vmatpush.bf16.msrb.mxu1 %v4018_v56 }
0x11b0   : > { %v1708_v36 = vpop.f32.mrf.mxu1 }
0x11b1   : > { %v1709_v16 = vadd.f32 %v4024_v8, %v1708_v36 }
0x11b3   : > { %3082 = vtanh.f32 %v1709_v16 }
0x11b8   : > { %v1710_v26 = vpop.f32.mrf.mxu1 }
0x11b9   : > { %v3083_v20 = vpop.eup %3082  ;;  %v1711_v21 = vadd.f32 %v4024_v8, %v1710_v26 }
0x11ba   : > { %1727 = vrot.lane.b32.xlu2 %v3083_v20, %s3398_s15  ;;  %v1715_v22 = vpack.c.bf16 %v3083_v20, %v3083_v20 }
0x11bb   : > { %3084 = vtanh.f32 %v1711_v21 }
0x11bc   : > { %v1717_v23 = vunpack.c.l.bf16 %v1715_v22 }
0x11be   : > { %v1719_v59 = vsub.f32 %v3083_v20, %v1717_v23 }
0x11c0   : > { %1721 = vrot.lane.b32.xlu0 %v1719_v59, %s3397_s1 }
0x11c1   : > { %v3085_v58 = vpop.eup %3084 }
0x11c2   : > { %1764 = vrot.lane.b32.xlu2 %v4278_v17, %s3400_s27  ;;  %v1716_v40 = vpack.c.bf16 %v3085_v58, %v3085_v58 }
0x11c4   : > { %v1718_v56 = vunpack.c.l.bf16 %v1716_v40 }
0x11c6   : > { %v1720_v24 = vsub.f32 %v3085_v58, %v1718_v56 }
0x11c8   : > { %1723 = vrot.lane.b32.xlu1 %v1720_v24, %s3397_s1  ;;  %1729 = vrot.lane.b32.xlu0 %v3085_v58, %s3398_s15 }
0x11ca   : > { %1778 = vrot.lane.b32.xlu2 %v4270_v2, %s3401_s28 }
0x11d0   : > { %1762 = vrot.lane.b32.xlu1 %v4270_v2, %s3400_s27  ;;  %1770 = vrot.lane.b32.xlu0 %v4270_v2, %s3399_s24 }
0x11d8   : > { %1772 = vrot.lane.b32.xlu1 %v4278_v17, %s3399_s24  ;;  %1780 = vrot.lane.b32.xlu0 %v4278_v17, %s3401_s28 }
0x1214   : > { %v1728_v6 = vpop.permute.xlu2 %1727 }
0x121c   : > { %v1765_v33 = vpop.permute.xlu2 %1764 }
0x1232   : > { %v1722_v8 = vpop.permute.xlu0 %1721 }
0x1233   : > { %v1725_v34 = vadd.f32 %v3083_v20, %v1722_v8 }
0x1235   : > { %v1731_v0 = vadd.f32 %v1728_v6, %v1725_v34 }
0x123a   : > { %v1724_v25 = vpop.permute.xlu1 %1723  ;;  %v1730_v46 = vpop.permute.xlu0 %1729 }
0x123b   : > { %v1726_v18 = vadd.f32 %v3085_v58, %v1724_v25 }
0x123d   : > { %v1732_v57 = vadd.f32 %v1730_v46, %v1726_v18 }
0x123f   : > { %v1733_v12 = vpack.c.bf16 %v1732_v57, %v1731_v0 }
0x1241   : > { %1742 = vmatmul.bf16.vlgmr.msrb.gmra.mxu2 %v1733_v12 }
0x1242   : > { %2473 = vmatpush.bf16.msrb.mxu2 %v4044_v27  ;;  %v1763_v1 = vpop.permute.xlu1 %1762  ;;  %v1758_v27 = vmul.f32 %v3595_v4, %v4270_v2 }
0x1243   : > { %v1766_v53 = vmul.f32 %v3617_v15, %v1763_v1 }
0x1245   : > { %v1768_v7 = vadd.f32 %v1766_v53, %v1758_v27 }
0x1246   : > { %2474 = vmatpush.bf16.msrb.mxu2 %v4047_v28  ;;  %v1771_v28 = vpop.permute.xlu0 %1770 }
0x124a   : > { %2475 = vmatpush.bf16.msrb.mxu2 %v4050_v30  ;;  %v1774_v30 = vmul.f32 %v3604_v9, %v1771_v28 }
0x124c   : > { %v1776_v44 = vadd.f32 %v1774_v30, %v1768_v7 }
0x124e   : > { %2476 = vmatpush.bf16.msrb.mxu2 %v4053_v31  ;;  %v1779_v31 = vpop.permute.xlu2 %1778  ;;  %v1781_v54 = vpop.permute.xlu0 %1780 }
0x124f   : > { %v1783_v14 = vmul.f32 %v3607_v10, %v1781_v54 }
0x1252   : > { %2477 = vmatpush.bf16.msrb.mxu2 %v4056_v32  ;;  %v1773_v32 = vpop.permute.xlu1 %1772 }
0x1253   : > { %v1775_v55 = vmul.f32 %v3604_v9, %v1773_v32 }
0x1256   : > { %2478 = vmatpush.bf16.msrb.mxu2 %v4059_v41  ;;  %v1767_v41 = vmul.f32 %v3617_v15, %v1765_v33 }
0x125a   : > { %2479 = vmatpush.bf16.msrb.mxu2 %v4062_v50  ;;  %v1782_v50 = vmul.f32 %v3607_v10, %v1779_v31 }
0x125c   : > { %v1784_v60 = vadd.f32 %v1782_v50, %v1776_v44 }
0x125e   : > { %2480 = vmatpush.bf16.msrb.mxu2 %v4065_v29  ;;  %v1759_v29 = vmul.f32 %v3595_v4, %v4278_v17  ;;  %v1786_v47 = vsub.f32 %v1784_v60, %v4217_v19 }
0x1260   : > { %v1769_v49 = vadd.f32 %v1767_v41, %v1759_v29  ;;  %v1788_v11 = vmax.f32 %v1786_v47, 0.0 }
0x1262   : > { %v1777_v62 = vadd.f32 %v1775_v55, %v1769_v49  ;;  %v1790_v16 = vmul.f32 19.6, %v1788_v11  ;;  %v1818_v41 = vmul.f32 %v4088_v39, %v1788_v11 }
0x1264   : > { %v1785_v36 = vadd.f32 %v1783_v14, %v1777_v62  ;;  %3086 = vrsqrt.f32 %v1790_v16  ;;  %vm1799_vm12 = vcmp.eq.f32.partialorder %v1790_v16, inf  ;;  %v1802_v31 = vand.u32 2147483648, %v1790_v16 }
0x1265   : > { %vm1801_vm13 = vcmp.eq.f32.partialorder %v1790_v16, 0.0 }
0x1266   : > { %v1787_v26 = vsub.f32 %v1785_v36, %v4217_v19 }
0x1268   : > { %v1789_v20 = vmax.f32 %v1787_v26, 0.0 }
0x126a   : > { %v1791_v21 = vmul.f32 19.6, %v1789_v20  ;;  %v3087_v22 = vpop.eup %3086 }
0x126b   : > { %v1793_v23 = vmul.f32 %v3087_v22, %v1790_v16 }
0x126c   : > { %3088 = vrsqrt.f32 %v1791_v21  ;;  %vm1811_vm14 = vcmp.eq.f32.partialorder %v1791_v21, inf  ;;  %v1814_v14 = vand.u32 2147483648, %v1791_v21  ;;  %vm1813_vm15 = vcmp.eq.f32.partialorder %v1791_v21, 0.0 }
0x126d   : > { %v1794_v59 = vmul.f32 %v3087_v22, %v1793_v23 }
0x126f   : > { %v1795_v40 = vmul.f32 0.5, %v1794_v59 }
0x1271   : > { %v1796_v34 = vsub.f32 1.5, %v1795_v40 }
0x1272   : > { %v3089_v58 = vpop.eup %3088 }
0x1273   : > { %v1805_v56 = vmul.f32 %v3089_v58, %v1791_v21  ;;  %v1797_v6 = vmul.f32 %v3087_v22, %v1796_v34 }
0x1275   : > { %v1806_v25 = vmul.f32 %v3089_v58, %v1805_v56  ;;  %v1798_v12 = vmul.f32 %v1797_v6, %v1790_v16  ;;  %v4364_v6 = vld [vmem:[%s4737_s8] ss:$0 sm:$0xff] }
0x1277   : > { %v1807_v46 = vmul.f32 0.5, %v1806_v25  ;;  %v1800_v7 = vsel %vm1799_vm12, %v1790_v16, %v1798_v12  ;;  %v1819_v16 = vmul.f32 %v4088_v39, %v1789_v20 }
0x1278   : > { %v1803_v32 = vsel %vm1801_vm13, %v1802_v31, %v1800_v7 }
0x1279   : > { %v1808_v33 = vsub.f32 1.5, %v1807_v46 }
0x127b   : > { %v1809_v30 = vmul.f32 %v3089_v58, %v1808_v33 }
0x127d   : > { %v1810_v29 = vmul.f32 %v1809_v30, %v1791_v21 }
0x127f   : > { %v1812_v62 = vsel %vm1811_vm14, %v1791_v21, %v1810_v29 }
0x1280   : > { %v1815_v26 = vsel %vm1813_vm15, %v1814_v14, %v1812_v62 }
0x12c4   : > { %v1743_v24 = vpop.f32.mrf.mxu2 }
0x12c5   : > { %v1744_v8 = vadd.f32 %v4225_v51, %v1743_v24 }
0x12c7   : > { %v1748_v18 = vmul.f32 0.5, %v1744_v8 }
0x12c9   : > { %3090 = vtanh.f32 %v1748_v18 }
0x12cc   : > { %v1745_v0 = vpop.f32.mrf.mxu2 }
0x12cd   : > { %v1746_v57 = vadd.f32 %v4225_v51, %v1745_v0 }
0x12cf   : > { %v3091_v1 = vpop.eup %3090  ;;  %v1749_v53 = vmul.f32 0.5, %v1746_v57 }
0x12d0   : > { %v1752_v27 = vadd.f32 1.0, %v3091_v1 }
0x12d1   : > { %3092 = vtanh.f32 %v1749_v53 }
0x12d2   : > { %v1754_v28 = vmul.f32 0.5, %v1752_v27 }
0x12d4   : > { %v1756_v44 = vmul.f32 %v3592_v3, %v1754_v28 }
0x12d6   : > { %v1816_v50 = vmul.f32 %v1803_v32, %v1756_v44 }
0x12d7   : > { %v3093_v60 = vpop.eup %3092 }
0x12d8   : > { %v1820_v55 = vsub.f32 %v1818_v41, %v1816_v50  ;;  %v1753_v49 = vadd.f32 1.0, %v3093_v60  ;;  %v2861_v41 = vld [vmem:[%s3577_s5 + $0x40] sm:$0xff] }
0x12da   : > { %v1822_v54 = vmul.f32 0.5, %v1820_v55  ;;  %v1755_v47 = vmul.f32 0.5, %v1753_v49 }
0x12dc   : > { %3094 = vtanh.f32 %v1822_v54  ;;  %v1757_v36 = vmul.f32 %v3592_v3, %v1755_v47 }
0x12de   : > { %v1817_v22 = vmul.f32 %v1815_v26, %v1757_v36 }
0x12e0   : > { %v1821_v23 = vsub.f32 %v1819_v16, %v1817_v22 }
0x12e2   : > { %v3095_v11 = vpop.eup %3094  ;;  %v1823_v59 = vmul.f32 0.5, %v1821_v23 }
0x12e3   : > { %v1826_v58 = vadd.f32 1.0, %v3095_v11 }
0x12e4   : > { %3096 = vtanh.f32 %v1823_v59 }
0x12e5   : > { %v1828_v40 = vmul.f32 0.5, %v1826_v58 }
0x12e7   : > { %v1830_v56 = vmul.f32 %v1828_v40, %v1816_v50  ;;  %v2862_v40 = vld [vmem:[%s3577_s5 + $0x48] sm:$0xff] }
0x12e9   : > { %v4350_v24 = vmul.f32 %v4088_v39, %v1830_v56 }
0x12ea   : > { %v3097_v8 = vpop.eup %3096 }
0x12eb   : > { %v1827_v34 = vadd.f32 1.0, %v3097_v8  ;;  %v1854_v25 = vmul.f32 %v3607_v10, %v4350_v24  ;;  %v1846_v21 = vmul.f32 %v3604_v9, %v4350_v24  ;;  %v1834_v20 = vmul.f32 %v3595_v4, %v4350_v24 }
0x12ec   : > { %v1838_v57 = vmul.f32 %v3617_v15, %v4350_v24 }
0x12ed   : > { %v1829_v18 = vmul.f32 0.5, %v1827_v34  ;;  %1876 = vrot.lane.b32.xlu2 %v1854_v25, %s3402_s22  ;;  %1870 = vrot.lane.b32.xlu0 %v1846_v21, %s3403_s29 }
0x12ee   : > { %1862 = vrot.lane.b32.xlu1 %v1834_v20, %s3400_s27 }
0x12ef   : > { %v1831_v39 = vmul.f32 %v1829_v18, %v1817_v22 }
0x12f1   : > { %v4367_v46 = vmul.f32 %v4364_v6, %v1831_v39 }
0x12f3   : > { %v1835_v0 = vmul.f32 %v3595_v4, %v4367_v46  ;;  %v1855_v12 = vmul.f32 %v3607_v10, %v4367_v46  ;;  %v1839_v33 = vmul.f32 %v3617_v15, %v4367_v46  ;;  %v1847_v1 = vmul.f32 %v3604_v9, %v4367_v46 }
0x12f5   : > { %1848 = vrot.lane.b32.xlu0 %v1846_v21, %s3402_s22  ;;  %1864 = vrot.lane.b32.xlu2 %v1835_v0, %s3400_s27 }
0x12f6   : > { %1840 = vrot.lane.b32.xlu1 %v1838_v57, %s3403_s29 }
0x12fd   : > { %1878 = vrot.lane.b32.xlu0 %v1855_v12, %s3402_s22  ;;  %1842 = vrot.lane.b32.xlu2 %v1839_v33, %s3403_s29 }
0x12fe   : > { %1872 = vrot.lane.b32.xlu1 %v1847_v1, %s3403_s29 }
0x1305   : > { %1858 = vrot.lane.b32.xlu0 %v1855_v12, %s3404_s14  ;;  %1856 = vrot.lane.b32.xlu2 %v1854_v25, %s3404_s14 }
0x1306   : > { %1850 = vrot.lane.b32.xlu1 %v1847_v1, %s3402_s22 }
0x1347   : > { %v1877_v53 = vpop.permute.xlu2 %1876 }
0x134f   : > { %v1865_v27 = vpop.permute.xlu2 %1864 }
0x1350   : > { %v1869_v36 = vadd.f32 %v1865_v27, %v1839_v33 }
0x1357   : > { %v1843_v31 = vpop.permute.xlu2 %1842 }
0x1358   : > { %v1845_v34 = vadd.f32 %v1843_v31, %v1835_v0 }
0x135f   : > { %v1871_v28 = vpop.permute.xlu0 %1870  ;;  %v1857_v47 = vpop.permute.xlu2 %1856 }
0x1360   : > { %v1863_v7 = vpop.permute.xlu1 %1862 }
0x1361   : > { %v1868_v30 = vadd.f32 %v1863_v7, %v1838_v57 }
0x1363   : > { %v1874_v44 = vadd.f32 %v1871_v28, %v1868_v30 }
0x1365   : > { %v1880_v32 = vadd.f32 %v1877_v53, %v1874_v44 }
0x1367   : > { %v1882_v50 = vmul.f32 %v3615_v13, %v1880_v32  ;;  %v1849_v29 = vpop.permute.xlu0 %1848 }
0x1368   : > { %v1841_v60 = vpop.permute.xlu1 %1840 }
0x1369   : > { %v1887_v55 = vadd.f32 %v2861_v41, %v1882_v50  ;;  %v1844_v49 = vadd.f32 %v1841_v60, %v1834_v20 }
0x136b   : > { %v1852_v54 = vadd.f32 %v1849_v29, %v1844_v49  ;;  %v1889_v62 = vadd.f32 %v1887_v55, %v4270_v2  ;;  %v4415_v29 = vld [vmem:[%s4731_s2] ss:$0 sm:$0xff] }
0x136d   : > { %v1860_v14 = vadd.f32 %v1857_v47, %v1852_v54 }
0x136f   : > { %v4391_v26 = vsub.f32 %v1889_v62, %v1860_v14  ;;  %v1879_v22 = vpop.permute.xlu0 %1878 }
0x1370   : > { %v1873_v16 = vpop.permute.xlu1 %1872 }
0x1371   : > { %v1875_v23 = vadd.f32 %v1873_v16, %v1869_v36  ;;  %v1901_v11 = vmul.f32 0.2, %v4391_v26 }
0x1373   : > { %v1881_v59 = vadd.f32 %v1879_v22, %v1875_v23  ;;  %1915 = vrot.lane.b32.xlu0 %v1901_v11, %s3398_s15  ;;  %v1903_v58 = vpack.c.bf16 %v1901_v11, %v1901_v11 }
0x1375   : > { %v1883_v56 = vmul.f32 %v3615_v13, %v1881_v59  ;;  %v1905_v8 = vunpack.c.l.bf16 %v1903_v58  ;;  %v4426_v58 = vld [vmem:[%s4733_s4] ss:$0 sm:$0xff] }
0x1377   : > { %v1888_v25 = vadd.f32 %v2862_v40, %v1883_v56  ;;  %v1907_v2 = vsub.f32 %v1901_v11, %v1905_v8  ;;  %v1859_v18 = vpop.permute.xlu0 %1858 }
0x1378   : > { %v1851_v21 = vpop.permute.xlu1 %1850 }
0x1379   : > { %v1853_v20 = vadd.f32 %v1851_v21, %v1845_v34  ;;  %1909 = vrot.lane.b32.xlu1 %v1907_v2, %s3397_s1  ;;  %v1890_v39 = vadd.f32 %v1888_v25, %v4278_v17 }
0x137b   : > { %v1861_v57 = vadd.f32 %v1859_v18, %v1853_v20 }
0x137d   : > { %v4399_v12 = vsub.f32 %v1890_v39, %v1861_v57 }
0x137f   : > { %v1902_v33 = vmul.f32 0.2, %v4399_v12 }
0x1381   : > { %1917 = vrot.lane.b32.xlu1 %v1902_v33, %s3398_s15  ;;  %v1904_v1 = vpack.c.bf16 %v1902_v33, %v1902_v33 }
0x1383   : > { %v1906_v53 = vunpack.c.l.bf16 %v1904_v1 }
0x1385   : > { %v1908_v27 = vsub.f32 %v1902_v33, %v1906_v53 }
0x1387   : > { %1911 = vrot.lane.b32.xlu2 %v1908_v27, %s3397_s1 }
0x13e1   : > { %v1912_v28 = vpop.permute.xlu2 %1911 }
0x13e2   : > { %v1914_v30 = vadd.f32 %v1912_v28, %v1902_v33 }
0x13e5   : > { %v1916_v31 = vpop.permute.xlu0 %1915 }
0x13eb   : > { %v1910_v0 = vpop.permute.xlu1 %1909 }
0x13ec   : > { %v1913_v7 = vadd.f32 %v1910_v0, %v1901_v11 }
0x13ee   : > { %v1919_v32 = vadd.f32 %v1916_v31, %v1913_v7 }
0x13f3   : > { %v1918_v44 = vpop.permute.xlu1 %1917 }
0x13f4   : > { %v1920_v17 = vadd.f32 %v1918_v44, %v1914_v30 }
0x13f6   : > { %v1921_v41 = vpack.c.bf16 %v1920_v17, %v1919_v32 }
0x13f8   : > { %1930 = vmatmul.bf16.vlgmr.msrb.gmra.mxu3 %v1921_v41  ;;  %v2016_v41 = vmul.f32 %v3595_v4, %v4391_v26 }
0x13f9   : > { %2508 = vmatpush.bf16.msrb.mxu3 %v4141_v61 }
0x13fd   : > { %2509 = vmatpush.bf16.msrb.mxu3 %v4144_v35 }
0x1401   : > { %2510 = vmatpush.bf16.msrb.mxu3 %v4147_v63 }
0x1405   : > { %2511 = vmatpush.bf16.msrb.mxu3 %v4150_v42 }
0x1409   : > { %2512 = vmatpush.bf16.msrb.mxu3 %v4153_v38 }
0x140d   : > { %2513 = vmatpush.bf16.msrb.mxu3 %v4156_v45 }
0x1411   : > { %2514 = vmatpush.bf16.msrb.mxu3 %v4159_v48 }
0x1415   : > { %2515 = vmatpush.bf16.msrb.mxu3 %v4162_v37 }
0x147b   : > { %v1931_v50 = vpop.f32.mrf.mxu3 }
0x147c   : > { %v1932_v61 = vadd.f32 %v4415_v29, %v1931_v50 }
0x147e   : > { %3098 = vtanh.f32 %v1932_v61 }
0x1483   : > { %v1933_v35 = vpop.f32.mrf.mxu3 }
0x1484   : > { %v3099_v63 = vpop.eup %3098  ;;  %v1934_v42 = vadd.f32 %v4415_v29, %v1933_v35 }
0x1485   : > { %1950 = vrot.lane.b32.xlu1 %v3099_v63, %s3398_s15  ;;  %v1938_v38 = vpack.c.bf16 %v3099_v63, %v3099_v63 }
0x1486   : > { %3100 = vtanh.f32 %v1934_v42 }
0x1487   : > { %v1940_v45 = vunpack.c.l.bf16 %v1938_v38 }
0x1489   : > { %v1942_v48 = vsub.f32 %v3099_v63, %v1940_v45 }
0x148b   : > { %1944 = vrot.lane.b32.xlu2 %v1942_v48, %s3397_s1 }
0x148c   : > { %v3101_v37 = vpop.eup %3100 }
0x148d   : > { %v1939_v60 = vpack.c.bf16 %v3101_v37, %v3101_v37 }
0x148f   : > { %v1941_v55 = vunpack.c.l.bf16 %v1939_v60 }
0x1491   : > { %v1943_v49 = vsub.f32 %v3101_v37, %v1941_v55 }
0x1493   : > { %1946 = vrot.lane.b32.xlu0 %v1943_v49, %s3397_s1  ;;  %1952 = vrot.lane.b32.xlu2 %v3101_v37, %s3398_s15 }
0x14e5   : > { %v1945_v54 = vpop.permute.xlu2 %1944 }
0x14e6   : > { %v1948_v14 = vadd.f32 %v3099_v63, %v1945_v54 }
0x14ed   : > { %v1953_v16 = vpop.permute.xlu2 %1952 }
0x14f7   : > { %v1951_v47 = vpop.permute.xlu1 %1950 }
0x14f8   : > { %v1954_v22 = vadd.f32 %v1951_v47, %v1948_v14 }
0x1505   : > { %v1947_v62 = vpop.permute.xlu0 %1946 }
0x1506   : > { %v1949_v36 = vadd.f32 %v3101_v37, %v1947_v62  ;;  %v2017_v37 = vmul.f32 %v3595_v4, %v4399_v12 }
0x1508   : > { %v1955_v23 = vadd.f32 %v1953_v16, %v1949_v36 }
0x150a   : > { %v1956_v11 = vpack.c.bf16 %v1955_v23, %v1954_v22 }
0x150c   : > { %1965 = vmatmul.bf16.vlgmr.msra.gmra.mxu0 %v1956_v11 }
0x1589   : > { %v1966_v59 = vpop.f32.mrf.mxu0 }
0x158a   : > { %v1967_v40 = vadd.f32 %v4426_v58, %v1966_v59 }
0x158c   : > { %3102 = vtanh.f32 %v1967_v40 }
0x1591   : > { %v1968_v56 = vpop.f32.mrf.mxu0 }
0x1592   : > { %v3103_v8 = vpop.eup %3102  ;;  %v1969_v34 = vadd.f32 %v4426_v58, %v1968_v56 }
0x1593   : > { %1985 = vrot.lane.b32.xlu2 %v3103_v8, %s3398_s15  ;;  %v1973_v25 = vpack.c.bf16 %v3103_v8, %v3103_v8 }
0x1594   : > { %3104 = vtanh.f32 %v1969_v34 }
0x1595   : > { %v1975_v2 = vunpack.c.l.bf16 %v1973_v25 }
0x1597   : > { %v1977_v21 = vsub.f32 %v3103_v8, %v1975_v2 }
0x1599   : > { %1979 = vrot.lane.b32.xlu0 %v1977_v21, %s3397_s1 }
0x159a   : > { %v3105_v20 = vpop.eup %3104 }
0x159b   : > { %2022 = vrot.lane.b32.xlu2 %v4399_v12, %s3400_s27  ;;  %v1974_v18 = vpack.c.bf16 %v3105_v20, %v3105_v20 }
0x159d   : > { %v1976_v39 = vunpack.c.l.bf16 %v1974_v18 }
0x159f   : > { %v1978_v57 = vsub.f32 %v3105_v20, %v1976_v39 }
0x15a1   : > { %1981 = vrot.lane.b32.xlu1 %v1978_v57, %s3397_s1  ;;  %1987 = vrot.lane.b32.xlu0 %v3105_v20, %s3398_s15 }
0x15a3   : > { %2036 = vrot.lane.b32.xlu2 %v4391_v26, %s3401_s28 }
0x15a9   : > { %2020 = vrot.lane.b32.xlu1 %v4391_v26, %s3400_s27  ;;  %2028 = vrot.lane.b32.xlu0 %v4391_v26, %s3399_s24 }
0x15b1   : > { %2030 = vrot.lane.b32.xlu1 %v4399_v12, %s3399_s24  ;;  %2038 = vrot.lane.b32.xlu0 %v4399_v12, %s3401_s28 }
0x15ed   : > { %v1986_v0 = vpop.permute.xlu2 %1985 }
0x15f5   : > { %v2023_v44 = vpop.permute.xlu2 %2022 }
0x15f6   : > { %v2025_v45 = vmul.f32 %v3617_v15, %v2023_v44 }
0x15f8   : > { %v2027_v49 = vadd.f32 %v2025_v45, %v2017_v37 }
0x15fd   : > { %v2037_v63 = vpop.permute.xlu2 %2036 }
0x15fe   : > { %v2040_v48 = vmul.f32 %v3607_v10, %v2037_v63 }
0x160b   : > { %v1980_v33 = vpop.permute.xlu0 %1979 }
0x160c   : > { %v1983_v1 = vadd.f32 %v3103_v8, %v1980_v33 }
0x160e   : > { %v1989_v7 = vadd.f32 %v1986_v0, %v1983_v1 }
0x1613   : > { %v1982_v53 = vpop.permute.xlu1 %1981  ;;  %v1988_v28 = vpop.permute.xlu0 %1987 }
0x1614   : > { %v1984_v27 = vadd.f32 %v3105_v20, %v1982_v53 }
0x1616   : > { %v1990_v30 = vadd.f32 %v1988_v28, %v1984_v27 }
0x1618   : > { %v1991_v31 = vpack.c.bf16 %v1990_v30, %v1989_v7 }
0x161a   : > { %2000 = vmatmul.bf16.vlgmr.msra.gmra.mxu1 %v1991_v31 }
0x161b   : > { %v2021_v32 = vpop.permute.xlu1 %2020  ;;  %v2029_v50 = vpop.permute.xlu0 %2028 }
0x161c   : > { %v2024_v17 = vmul.f32 %v3617_v15, %v2021_v32  ;;  %v2032_v35 = vmul.f32 %v3604_v9, %v2029_v50 }
0x161e   : > { %v2026_v61 = vadd.f32 %v2024_v17, %v2016_v41 }
0x1620   : > { %v2034_v42 = vadd.f32 %v2032_v35, %v2026_v61 }
0x1622   : > { %v2042_v60 = vadd.f32 %v2040_v48, %v2034_v42 }
0x1623   : > { %v2031_v38 = vpop.permute.xlu1 %2030  ;;  %v2039_v54 = vpop.permute.xlu0 %2038 }
0x1624   : > { %v2033_v55 = vmul.f32 %v3604_v9, %v2031_v38  ;;  %v2044_v47 = vsub.f32 %v2042_v60, %v4217_v19  ;;  %v2041_v14 = vmul.f32 %v3607_v10, %v2039_v54 }
0x1626   : > { %v2035_v62 = vadd.f32 %v2033_v55, %v2027_v49  ;;  %v2046_v36 = vmax.f32 %v2044_v47, 0.0 }
0x1628   : > { %v2043_v16 = vadd.f32 %v2041_v14, %v2035_v62  ;;  %v2048_v22 = vmul.f32 19.6, %v2046_v36  ;;  %v2076_v61 = vmul.f32 %v4364_v6, %v2046_v36 }
0x162a   : > { %v2045_v23 = vsub.f32 %v2043_v16, %v4217_v19  ;;  %3106 = vrsqrt.f32 %v2048_v22  ;;  %vm2057_vm0 = vcmp.eq.f32.partialorder %v2048_v22, inf  ;;  %v2060_v17 = vand.u32 2147483648, %v2048_v22 }
0x162b   : > { %vm2059_vm1 = vcmp.eq.f32.partialorder %v2048_v22, 0.0 }
0x162c   : > { %v2047_v11 = vmax.f32 %v2045_v23, 0.0 }
0x162e   : > { %v2049_v59 = vmul.f32 19.6, %v2047_v11  ;;  %v2077_v54 = vmul.f32 %v4364_v6, %v2047_v11 }
0x1630   : > { %v3107_v40 = vpop.eup %3106  ;;  %3108 = vrsqrt.f32 %v2049_v59  ;;  %vm2069_vm2 = vcmp.eq.f32.partialorder %v2049_v59, inf  ;;  %v2072_v60 = vand.u32 2147483648, %v2049_v59  ;;  %vm2071_vm3 = vcmp.eq.f32.partialorder %v2049_v59, 0.0 }
0x1631   : > { %v2051_v56 = vmul.f32 %v3107_v40, %v2048_v22 }
0x1633   : > { %v2052_v8 = vmul.f32 %v3107_v40, %v2051_v56 }
0x1635   : > { %v2053_v25 = vmul.f32 0.5, %v2052_v8 }
0x1636   : > { %v3109_v34 = vpop.eup %3108 }
0x1637   : > { %v2063_v2 = vmul.f32 %v3109_v34, %v2049_v59  ;;  %v2054_v18 = vsub.f32 1.5, %v2053_v25 }
0x1639   : > { %v2064_v39 = vmul.f32 %v3109_v34, %v2063_v2  ;;  %v2055_v33 = vmul.f32 %v3107_v40, %v2054_v18 }
0x163b   : > { %v2065_v1 = vmul.f32 0.5, %v2064_v39  ;;  %v2056_v27 = vmul.f32 %v2055_v33, %v2048_v22 }
0x163d   : > { %v2066_v0 = vsub.f32 1.5, %v2065_v1  ;;  %v2058_v44 = vsel %vm2057_vm0, %v2048_v22, %v2056_v27 }
0x163e   : > { %v2061_v50 = vsel %vm2059_vm1, %v2060_v17, %v2058_v44 }
0x163f   : > { %v2067_v32 = vmul.f32 %v3109_v34, %v2066_v0 }
0x1641   : > { %v2068_v63 = vmul.f32 %v2067_v32, %v2049_v59 }
0x1643   : > { %v2070_v37 = vsel %vm2069_vm2, %v2049_v59, %v2068_v63 }
0x1644   : > { %v2073_v49 = vsel %vm2071_vm3, %v2072_v60, %v2070_v37 }
0x1697   : > { %v2001_v21 = vpop.f32.mrf.mxu1 }
0x1698   : > { %v2002_v20 = vadd.f32 %v4225_v51, %v2001_v21 }
0x169a   : > { %v2006_v57 = vmul.f32 0.5, %v2002_v20 }
0x169c   : > { %3110 = vtanh.f32 %v2006_v57 }
0x169f   : > { %v2003_v19 = vpop.f32.mrf.mxu1 }
0x16a0   : > { %v2004_v53 = vadd.f32 %v4225_v51, %v2003_v19 }
0x16a2   : > { %v3111_v28 = vpop.eup %3110  ;;  %v2007_v7 = vmul.f32 0.5, %v2004_v53 }
0x16a3   : > { %v2010_v30 = vadd.f32 1.0, %v3111_v28 }
0x16a4   : > { %3112 = vtanh.f32 %v2007_v7 }
0x16a5   : > { %v2012_v31 = vmul.f32 0.5, %v2010_v30 }
0x16a7   : > { %v2014_v41 = vmul.f32 %v3592_v3, %v2012_v31  ;;  %v2863_v31 = vld [vmem:[%s3577_s5 + $0x50] sm:$0xff] }
0x16a9   : > { %v2074_v35 = vmul.f32 %v2061_v50, %v2014_v41 }
0x16aa   : > { %v3113_v51 = vpop.eup %3112 }
0x16ab   : > { %v2078_v42 = vsub.f32 %v2076_v61, %v2074_v35  ;;  %v2011_v38 = vadd.f32 1.0, %v3113_v51 }
0x16ad   : > { %v2080_v45 = vmul.f32 0.5, %v2078_v42  ;;  %v2013_v48 = vmul.f32 0.5, %v2011_v38 }
0x16af   : > { %3114 = vtanh.f32 %v2080_v45  ;;  %v2015_v55 = vmul.f32 %v3592_v3, %v2013_v48 }
0x16b1   : > { %v2075_v47 = vmul.f32 %v2073_v49, %v2015_v55 }
0x16b3   : > { %v2079_v62 = vsub.f32 %v2077_v54, %v2075_v47  ;;  %v2864_v54 = vld [vmem:[%s3577_s5 + $0x58] sm:$0xff] }
0x16b5   : > { %v3115_v14 = vpop.eup %3114  ;;  %v2081_v36 = vmul.f32 0.5, %v2079_v62 }
0x16b6   : > { %v2084_v16 = vadd.f32 1.0, %v3115_v14 }
0x16b7   : > { %3116 = vtanh.f32 %v2081_v36 }
0x16b8   : > { %v2086_v22 = vmul.f32 0.5, %v2084_v16 }
0x16ba   : > { %v2088_v23 = vmul.f32 %v2086_v22, %v2074_v35 }
0x16bc   : > { %v4465_v40 = vmul.f32 %v4364_v6, %v2088_v23 }
0x16bd   : > { %v3117_v56 = vpop.eup %3116 }
0x16be   : > { %v2085_v8 = vadd.f32 1.0, %v3117_v56  ;;  %v2112_v34 = vmul.f32 %v3607_v10, %v4465_v40  ;;  %v2104_v59 = vmul.f32 %v3604_v9, %v4465_v40  ;;  %v2092_v11 = vmul.f32 %v3595_v4, %v4465_v40 }
0x16bf   : > { %v2096_v18 = vmul.f32 %v3617_v15, %v4465_v40 }
0x16c0   : > { %v2087_v25 = vmul.f32 0.5, %v2085_v8  ;;  %2134 = vrot.lane.b32.xlu2 %v2112_v34, %s3402_s22  ;;  %2128 = vrot.lane.b32.xlu0 %v2104_v59, %s3403_s29 }
0x16c1   : > { %2120 = vrot.lane.b32.xlu1 %v2092_v11, %s3400_s27 }
0x16c2   : > { %v2089_v2 = vmul.f32 %v2087_v25, %v2075_v47 }
0x16c4   : > { %v4477_v21 = vmul.f32 %v4364_v6, %v2089_v2 }
0x16c6   : > { %v2093_v20 = vmul.f32 %v3595_v4, %v4477_v21  ;;  %v2113_v39 = vmul.f32 %v3607_v10, %v4477_v21  ;;  %v2097_v57 = vmul.f32 %v3617_v15, %v4477_v21  ;;  %v2105_v33 = vmul.f32 %v3604_v9, %v4477_v21 }
0x16c8   : > { %2106 = vrot.lane.b32.xlu0 %v2104_v59, %s3402_s22  ;;  %2122 = vrot.lane.b32.xlu2 %v2093_v20, %s3400_s27 }
0x16c9   : > { %2098 = vrot.lane.b32.xlu1 %v2096_v18, %s3403_s29 }
0x16d0   : > { %2136 = vrot.lane.b32.xlu0 %v2113_v39, %s3402_s22  ;;  %2100 = vrot.lane.b32.xlu2 %v2097_v57, %s3403_s29 }
0x16d1   : > { %2130 = vrot.lane.b32.xlu1 %v2105_v33, %s3403_s29 }
0x16d8   : > { %2116 = vrot.lane.b32.xlu0 %v2113_v39, %s3404_s14  ;;  %2114 = vrot.lane.b32.xlu2 %v2112_v34, %s3404_s14 }
0x16d9   : > { %2108 = vrot.lane.b32.xlu1 %v2105_v33, %s3402_s22 }
0x171a   : > { %v2135_v1 = vpop.permute.xlu2 %2134 }
0x1722   : > { %v2123_v19 = vpop.permute.xlu2 %2122 }
0x1723   : > { %v2127_v42 = vadd.f32 %v2123_v19, %v2097_v57 }
0x172a   : > { %v2101_v28 = vpop.permute.xlu2 %2100 }
0x172b   : > { %v2103_v14 = vadd.f32 %v2101_v28, %v2093_v20 }
0x1732   : > { %v2129_v53 = vpop.permute.xlu0 %2128  ;;  %v2115_v35 = vpop.permute.xlu2 %2114 }
0x1733   : > { %v2121_v27 = vpop.permute.xlu1 %2120 }
0x1734   : > { %v2126_v0 = vadd.f32 %v2121_v27, %v2096_v18 }
0x1736   : > { %v2132_v7 = vadd.f32 %v2129_v53, %v2126_v0 }
0x1738   : > { %v2138_v30 = vadd.f32 %v2135_v1, %v2132_v7 }
0x173a   : > { %v2140_v44 = vmul.f32 %v3615_v13, %v2138_v30  ;;  %v2107_v32 = vpop.permute.xlu0 %2106 }
0x173b   : > { %v2099_v17 = vpop.permute.xlu1 %2098 }
0x173c   : > { %v2145_v41 = vadd.f32 %v2863_v31, %v2140_v44  ;;  %v2102_v50 = vadd.f32 %v2099_v17, %v2092_v11 }
0x173e   : > { %v2110_v61 = vadd.f32 %v2107_v32, %v2102_v50  ;;  %v2147_v63 = vadd.f32 %v2145_v41, %v4391_v26 }
0x1740   : > { %v2118_v51 = vadd.f32 %v2115_v35, %v2110_v61 }
0x1742   : > { %v4501_v38 = vsub.f32 %v2147_v63, %v2118_v51  ;;  %v2137_v48 = vpop.permute.xlu0 %2136 }
0x1743   : > { %v2131_v45 = vpop.permute.xlu1 %2130 }
0x1744   : > { %v2133_v37 = vadd.f32 %v2131_v45, %v2127_v42  ;;  %v2159_v60 = vmul.f32 0.2, %v4501_v38 }
0x1746   : > { %v2139_v55 = vadd.f32 %v2137_v48, %v2133_v37  ;;  %2173 = vrot.lane.b32.xlu0 %v2159_v60, %s3398_s15  ;;  %v2161_v49 = vpack.c.bf16 %v2159_v60, %v2159_v60 }
0x1748   : > { %v2141_v47 = vmul.f32 %v3615_v13, %v2139_v55  ;;  %v2163_v62 = vunpack.c.l.bf16 %v2161_v49 }
0x174a   : > { %v2146_v36 = vadd.f32 %v2864_v54, %v2141_v47  ;;  %v2165_v26 = vsub.f32 %v2159_v60, %v2163_v62  ;;  %v2117_v23 = vpop.permute.xlu0 %2116 }
0x174b   : > { %v2109_v16 = vpop.permute.xlu1 %2108 }
0x174c   : > { %v2111_v22 = vadd.f32 %v2109_v16, %v2103_v14  ;;  %2167 = vrot.lane.b32.xlu1 %v2165_v26, %s3397_s1  ;;  %v2148_v56 = vadd.f32 %v2146_v36, %v4399_v12 }
0x174e   : > { %v2119_v8 = vadd.f32 %v2117_v23, %v2111_v22 }
0x1750   : > { %v4509_v34 = vsub.f32 %v2148_v56, %v2119_v8 }
0x1752   : > { %v2160_v59 = vmul.f32 0.2, %v4509_v34 }
0x1754   : > { %2175 = vrot.lane.b32.xlu1 %v2160_v59, %s3398_s15  ;;  %v2162_v11 = vpack.c.bf16 %v2160_v59, %v2160_v59 }
0x1756   : > { %v2164_v25 = vunpack.c.l.bf16 %v2162_v11 }
0x1758   : > { %v2166_v2 = vsub.f32 %v2160_v59, %v2164_v25 }
0x175a   : > { %2169 = vrot.lane.b32.xlu2 %v2166_v2, %s3397_s1 }
0x17b4   : > { %v2170_v18 = vpop.permute.xlu2 %2169 }
0x17b5   : > { %v2172_v57 = vadd.f32 %v2170_v18, %v2160_v59 }
0x17b8   : > { %v2174_v33 = vpop.permute.xlu0 %2173 }
0x17be   : > { %v2168_v20 = vpop.permute.xlu1 %2167 }
0x17bf   : > { %v2171_v39 = vadd.f32 %v2168_v20, %v2159_v60 }
0x17c1   : > { %v2177_v19 = vadd.f32 %v2174_v33, %v2171_v39 }
0x17c6   : > { %v2176_v1 = vpop.permute.xlu1 %2175 }
0x17c7   : > { %v2178_v12 = vadd.f32 %v2176_v1, %v2172_v57 }
0x17c9   : > { %v2179_v53 = vpack.c.bf16 %v2178_v12, %v2177_v19 }
0x17cb   : > { %2188 = vmatmul.bf16.vlgmr.msra.gmra.mxu2 %v2179_v53  ;;  %v2274_v53 = vmul.f32 %v3595_v4, %v4501_v38 }
0x184e   : > { %v2189_v27 = vpop.f32.mrf.mxu2 }
0x184f   : > { %v2190_v0 = vadd.f32 %v4415_v29, %v2189_v27 }
0x1851   : > { %3118 = vtanh.f32 %v2190_v0 }
0x1856   : > { %v2191_v28 = vpop.f32.mrf.mxu2 }
0x1857   : > { %v3119_v7 = vpop.eup %3118  ;;  %v2192_v30 = vadd.f32 %v4415_v29, %v2191_v28 }
0x1858   : > { %2208 = vrot.lane.b32.xlu1 %v3119_v7, %s3398_s15  ;;  %v2196_v31 = vpack.c.bf16 %v3119_v7, %v3119_v7 }
0x1859   : > { %3120 = vtanh.f32 %v2192_v30 }
0x185a   : > { %v2198_v44 = vunpack.c.l.bf16 %v2196_v31 }
0x185c   : > { %v2200_v32 = vsub.f32 %v3119_v7, %v2198_v44 }
0x185e   : > { %2202 = vrot.lane.b32.xlu2 %v2200_v32, %s3397_s1 }
0x185f   : > { %v3121_v17 = vpop.eup %3120 }
0x1860   : > { %v2197_v41 = vpack.c.bf16 %v3121_v17, %v3121_v17 }
0x1862   : > { %v2199_v50 = vunpack.c.l.bf16 %v2197_v41 }
0x1864   : > { %v2201_v61 = vsub.f32 %v3121_v17, %v2199_v50 }
0x1866   : > { %2204 = vrot.lane.b32.xlu0 %v2201_v61, %s3397_s1  ;;  %2210 = vrot.lane.b32.xlu2 %v3121_v17, %s3398_s15 }
0x18b8   : > { %v2203_v35 = vpop.permute.xlu2 %2202 }
0x18b9   : > { %v2206_v42 = vadd.f32 %v3119_v7, %v2203_v35 }
0x18c0   : > { %v2211_v48 = vpop.permute.xlu2 %2210 }
0x18ca   : > { %v2209_v63 = vpop.permute.xlu1 %2208 }
0x18cb   : > { %v2212_v37 = vadd.f32 %v2209_v63, %v2206_v42  ;;  %v4550_v63 = vld [vmem:[%s4736_s7] ss:$0 sm:$0xff] }
0x18d8   : > { %v2205_v51 = vpop.permute.xlu0 %2204 }
0x18d9   : > { %v2207_v45 = vadd.f32 %v3121_v17, %v2205_v51  ;;  %v2275_v17 = vmul.f32 %v3595_v4, %v4509_v34 }
0x18db   : > { %v2213_v60 = vadd.f32 %v2211_v48, %v2207_v45 }
0x18dd   : > { %v2214_v55 = vpack.c.bf16 %v2213_v60, %v2212_v37 }
0x18df   : > { %2223 = vmatmul.bf16.vlgmr.msra.gmra.mxu3 %v2214_v55 }
0x1962   : > { %v2224_v49 = vpop.f32.mrf.mxu3 }
0x1963   : > { %v2225_v54 = vadd.f32 %v4426_v58, %v2224_v49 }
0x1965   : > { %3122 = vtanh.f32 %v2225_v54 }
0x196a   : > { %v2226_v47 = vpop.f32.mrf.mxu3 }
0x196b   : > { %v3123_v62 = vpop.eup %3122  ;;  %v2227_v14 = vadd.f32 %v4426_v58, %v2226_v47 }
0x196c   : > { %2243 = vrot.lane.b32.xlu2 %v3123_v62, %s3398_s15  ;;  %v2231_v36 = vpack.c.bf16 %v3123_v62, %v3123_v62 }
0x196d   : > { %3124 = vtanh.f32 %v2227_v14 }
0x196e   : > { %v2233_v26 = vunpack.c.l.bf16 %v2231_v36 }
0x1970   : > { %v2235_v16 = vsub.f32 %v3123_v62, %v2233_v26 }
0x1972   : > { %2237 = vrot.lane.b32.xlu0 %v2235_v16, %s3397_s1 }
0x1973   : > { %v3125_v22 = vpop.eup %3124 }
0x1974   : > { %2280 = vrot.lane.b32.xlu2 %v4509_v34, %s3400_s27  ;;  %v2232_v23 = vpack.c.bf16 %v3125_v22, %v3125_v22 }
0x1976   : > { %v2234_v56 = vunpack.c.l.bf16 %v2232_v23  ;;  %v4558_v23 = vld [vmem:[%s4735_s6] ss:$0 sm:$0xff] }
0x1978   : > { %v2236_v8 = vsub.f32 %v3125_v22, %v2234_v56 }
0x197a   : > { %2239 = vrot.lane.b32.xlu1 %v2236_v8, %s3397_s1  ;;  %2245 = vrot.lane.b32.xlu0 %v3125_v22, %s3398_s15 }
0x197c   : > { %2294 = vrot.lane.b32.xlu2 %v4501_v38, %s3401_s28 }
0x1982   : > { %2278 = vrot.lane.b32.xlu1 %v4501_v38, %s3400_s27  ;;  %2286 = vrot.lane.b32.xlu0 %v4501_v38, %s3399_s24 }
0x198a   : > { %2288 = vrot.lane.b32.xlu1 %v4509_v34, %s3399_s24  ;;  %2296 = vrot.lane.b32.xlu0 %v4509_v34, %s3401_s28 }
0x19c6   : > { %v2244_v20 = vpop.permute.xlu2 %2243 }
0x19ce   : > { %v2281_v1 = vpop.permute.xlu2 %2280 }
0x19cf   : > { %v2283_v44 = vmul.f32 %v3617_v15, %v2281_v1 }
0x19d1   : > { %v2285_v61 = vadd.f32 %v2283_v44, %v2275_v17 }
0x19d6   : > { %v2295_v7 = vpop.permute.xlu2 %2294 }
0x19d7   : > { %v2298_v32 = vmul.f32 %v3607_v10, %v2295_v7 }
0x19e4   : > { %v2238_v59 = vpop.permute.xlu0 %2237 }
0x19e5   : > { %v2241_v11 = vadd.f32 %v3123_v62, %v2238_v59 }
0x19e7   : > { %v2247_v39 = vadd.f32 %v2244_v20, %v2241_v11 }
0x19ec   : > { %v2240_v25 = vpop.permute.xlu1 %2239  ;;  %v2246_v18 = vpop.permute.xlu0 %2245 }
0x19ed   : > { %v2242_v2 = vadd.f32 %v3125_v22, %v2240_v25 }
0x19ef   : > { %v2248_v57 = vadd.f32 %v2246_v18, %v2242_v2 }
0x19f1   : > { %v2249_v33 = vpack.c.bf16 %v2248_v57, %v2247_v39 }
0x19f3   : > { %2258 = vmatmul.bf16.vlgmr.msrb.gmra.mxu0 %v2249_v33 }
0x19f4   : > { %v2279_v19 = vpop.permute.xlu1 %2278  ;;  %v2287_v27 = vpop.permute.xlu0 %2286 }
0x19f5   : > { %v2282_v12 = vmul.f32 %v3617_v15, %v2279_v19  ;;  %v2290_v28 = vmul.f32 %v3604_v9, %v2287_v27 }
0x19f7   : > { %v2284_v0 = vadd.f32 %v2282_v12, %v2274_v53 }
0x19f9   : > { %v2292_v30 = vadd.f32 %v2290_v28, %v2284_v0 }
0x19fb   : > { %v2300_v41 = vadd.f32 %v2298_v32, %v2292_v30 }
0x19fc   : > { %v2289_v31 = vpop.permute.xlu1 %2288  ;;  %v2297_v35 = vpop.permute.xlu0 %2296 }
0x19fd   : > { %v2291_v50 = vmul.f32 %v3604_v9, %v2289_v31  ;;  %v2302_v51 = vsub.f32 %v2300_v41, %v4550_v63  ;;  %v2299_v45 = vmul.f32 %v3607_v10, %v2297_v35 }
0x19ff   : > { %v2293_v42 = vadd.f32 %v2291_v50, %v2285_v61  ;;  %v2304_v48 = vmax.f32 %v2302_v51, 0.0 }
0x1a01   : > { %v2301_v37 = vadd.f32 %v2299_v45, %v2293_v42  ;;  %v2306_v60 = vmul.f32 19.6, %v2304_v48  ;;  %v2334_v30 = vmul.f32 %v4364_v6, %v2304_v48 }
0x1a03   : > { %v2303_v55 = vsub.f32 %v2301_v37, %v4550_v63  ;;  %3126 = vrsqrt.f32 %v2306_v60  ;;  %vm2315_vm4 = vcmp.eq.f32.partialorder %v2306_v60, inf  ;;  %v2318_v0 = vand.u32 2147483648, %v2306_v60 }
0x1a04   : > { %vm2317_vm5 = vcmp.eq.f32.partialorder %v2306_v60, 0.0 }
0x1a05   : > { %v2305_v49 = vmax.f32 %v2303_v55, 0.0 }
0x1a07   : > { %v2307_v54 = vmul.f32 19.6, %v2305_v49  ;;  %v2335_v37 = vmul.f32 %v4364_v6, %v2305_v49 }
0x1a09   : > { %v3127_v47 = vpop.eup %3126  ;;  %3128 = vrsqrt.f32 %v2307_v54  ;;  %vm2327_vm6 = vcmp.eq.f32.partialorder %v2307_v54, inf  ;;  %v2330_v51 = vand.u32 2147483648, %v2307_v54  ;;  %vm2329_vm7 = vcmp.eq.f32.partialorder %v2307_v54, 0.0 }
0x1a0a   : > { %v2309_v62 = vmul.f32 %v3127_v47, %v2306_v60 }
0x1a0c   : > { %v2310_v14 = vmul.f32 %v3127_v47, %v2309_v62 }
0x1a0e   : > { %v2311_v26 = vmul.f32 0.5, %v2310_v14 }
0x1a0f   : > { %v3129_v36 = vpop.eup %3128 }
0x1a10   : > { %v2321_v16 = vmul.f32 %v3129_v36, %v2307_v54  ;;  %v2312_v8 = vsub.f32 1.5, %v2311_v26 }
0x1a12   : > { %v2322_v59 = vmul.f32 %v3129_v36, %v2321_v16  ;;  %v2313_v25 = vmul.f32 %v3127_v47, %v2312_v8 }
0x1a14   : > { %v2323_v2 = vmul.f32 0.5, %v2322_v59  ;;  %v2314_v39 = vmul.f32 %v2313_v25, %v2306_v60 }
0x1a16   : > { %v2324_v57 = vsub.f32 1.5, %v2323_v2  ;;  %v2316_v53 = vsel %vm2315_vm4, %v2306_v60, %v2314_v39 }
0x1a17   : > { %v2319_v7 = vsel %vm2317_vm5, %v2318_v0, %v2316_v53  ;;  %v2865_v0 = vld [vmem:[%s3577_s5 + $0x60] sm:$0xff] }
0x1a18   : > { %v2325_v27 = vmul.f32 %v3129_v36, %v2324_v57 }
0x1a1a   : > { %v2326_v44 = vmul.f32 %v2325_v27, %v2307_v54 }
0x1a1c   : > { %v2328_v35 = vsel %vm2327_vm6, %v2307_v54, %v2326_v44 }
0x1a1d   : > { %v2331_v45 = vsel %vm2329_vm7, %v2330_v51, %v2328_v35 }
0x1a70   : > { %v2259_v22 = vpop.f32.mrf.mxu0 }
0x1a71   : > { %v2260_v56 = vadd.f32 %v4558_v23, %v2259_v22 }
0x1a73   : > { %v2264_v11 = vmul.f32 0.5, %v2260_v56 }
0x1a75   : > { %3130 = vtanh.f32 %v2264_v11 }
0x1a78   : > { %v2261_v20 = vpop.f32.mrf.mxu0 }
0x1a79   : > { %v2262_v18 = vadd.f32 %v4558_v23, %v2261_v20 }
0x1a7b   : > { %v3131_v33 = vpop.eup %3130  ;;  %v2265_v1 = vmul.f32 0.5, %v2262_v18 }
0x1a7c   : > { %v2268_v19 = vadd.f32 1.0, %v3131_v33 }
0x1a7d   : > { %3132 = vtanh.f32 %v2265_v1 }
0x1a7e   : > { %v2270_v12 = vmul.f32 0.5, %v2268_v19 }
0x1a80   : > { %v2272_v28 = vmul.f32 %v3592_v3, %v2270_v12 }
0x1a82   : > { %v2332_v31 = vmul.f32 %v2319_v7, %v2272_v28 }
0x1a83   : > { %v3133_v32 = vpop.eup %3132 }
0x1a84   : > { %v2336_v17 = vsub.f32 %v2334_v30, %v2332_v31  ;;  %v2269_v41 = vadd.f32 1.0, %v3133_v32 }
0x1a86   : > { %v2338_v50 = vmul.f32 0.5, %v2336_v17  ;;  %v2271_v61 = vmul.f32 0.5, %v2269_v41 }
0x1a88   : > { %3134 = vtanh.f32 %v2338_v50  ;;  %v2273_v42 = vmul.f32 %v3592_v3, %v2271_v61 }
0x1a8a   : > { %v2333_v60 = vmul.f32 %v2331_v45, %v2273_v42 }
0x1a8c   : > { %v2337_v55 = vsub.f32 %v2335_v37, %v2333_v60 }
0x1a8e   : > { %v3135_v48 = vpop.eup %3134  ;;  %v2339_v47 = vmul.f32 0.5, %v2337_v55 }
0x1a8f   : > { %v2342_v62 = vadd.f32 1.0, %v3135_v48  ;;  %v2866_v48 = vld [vmem:[%s3577_s5 + $0x68] sm:$0xff]  ;;  %s3405_s5 = smov 120  }
0x1a90   : > { %3136 = vtanh.f32 %v2339_v47 }
0x1a91   : > { %v2344_v14 = vmul.f32 0.5, %v2342_v62 }
0x1a93   : > { %v2346_v36 = vmul.f32 %v2344_v14, %v2332_v31 }
0x1a95   : > { %v4567_v26 = vmul.f32 %v4364_v6, %v2346_v36 }
0x1a96   : > { %v3137_v16 = vpop.eup %3136 }
0x1a97   : > { %v2343_v22 = vadd.f32 1.0, %v3137_v16  ;;  %v2370_v56 = vmul.f32 %v3607_v10, %v4567_v26  ;;  %v2362_v54 = vmul.f32 %v3604_v9, %v4567_v26  ;;  %v2350_v49 = vmul.f32 %v3595_v4, %v4567_v26 }
0x1a98   : > { %v2354_v2 = vmul.f32 %v3617_v15, %v4567_v26 }
0x1a99   : > { %v2345_v8 = vmul.f32 0.5, %v2343_v22  ;;  %2392 = vrot.lane.b32.xlu2 %v2370_v56, %s3402_s22  ;;  %2386 = vrot.lane.b32.xlu0 %v2362_v54, %s3403_s29 }
0x1a9a   : > { %2378 = vrot.lane.b32.xlu1 %v2350_v49, %s3400_s27 }
0x1a9b   : > { %v2347_v59 = vmul.f32 %v2345_v8, %v2333_v60 }
0x1a9d   : > { %v4579_v11 = vmul.f32 %v4364_v6, %v2347_v59 }
0x1a9f   : > { %v2351_v25 = vmul.f32 %v3595_v4, %v4579_v11  ;;  %v2371_v20 = vmul.f32 %v3607_v10, %v4579_v11  ;;  %v2355_v18 = vmul.f32 %v3617_v15, %v4579_v11  ;;  %v2363_v6 = vmul.f32 %v3604_v9, %v4579_v11 }
0x1aa1   : > { %2364 = vrot.lane.b32.xlu0 %v2362_v54, %s3402_s22  ;;  %2380 = vrot.lane.b32.xlu2 %v2351_v25, %s3400_s27 }
0x1aa2   : > { %2356 = vrot.lane.b32.xlu1 %v2354_v2, %s3403_s29 }
0x1aa9   : > { %2394 = vrot.lane.b32.xlu0 %v2371_v20, %s3402_s22  ;;  %2358 = vrot.lane.b32.xlu2 %v2355_v18, %s3403_s29 }
0x1aaa   : > { %2388 = vrot.lane.b32.xlu1 %v2363_v6, %s3403_s29 }
0x1ab1   : > { %2374 = vrot.lane.b32.xlu0 %v2371_v20, %s3404_s14  ;;  %2372 = vrot.lane.b32.xlu2 %v2370_v56, %s3404_s14 }
0x1ab2   : > { %2366 = vrot.lane.b32.xlu1 %v2363_v6, %s3402_s22 }
0x1af3   : > { %v2393_v39 = vpop.permute.xlu2 %2392 }
0x1afb   : > { %v2381_v57 = vpop.permute.xlu2 %2380 }
0x1afc   : > { %v2385_v61 = vadd.f32 %v2381_v57, %v2355_v18 }
0x1b03   : > { %v2359_v12 = vpop.permute.xlu2 %2358 }
0x1b04   : > { %v2361_v14 = vadd.f32 %v2359_v12, %v2351_v25 }
0x1b0b   : > { %v2387_v33 = vpop.permute.xlu0 %2386  ;;  %v2373_v17 = vpop.permute.xlu2 %2372 }
0x1b0c   : > { %v2379_v1 = vpop.permute.xlu1 %2378 }
0x1b0d   : > { %v2384_v19 = vadd.f32 %v2379_v1, %v2354_v2 }
0x1b0f   : > { %v2390_v53 = vadd.f32 %v2387_v33, %v2384_v19 }
0x1b11   : > { %v2396_v27 = vadd.f32 %v2393_v39, %v2390_v53 }
0x1b13   : > { %v2398_v28 = vmul.f32 %v3615_v13, %v2396_v27  ;;  %v2365_v7 = vpop.permute.xlu0 %2364 }
0x1b14   : > { %v2357_v30 = vpop.permute.xlu1 %2356 }
0x1b15   : > { %v2403_v31 = vadd.f32 %v2865_v0, %v2398_v28  ;;  %v2360_v44 = vadd.f32 %v2357_v30, %v2350_v49 }
0x1b17   : > { %v2368_v32 = vadd.f32 %v2365_v7, %v2360_v44  ;;  %v2405_v41 = vadd.f32 %v2403_v31, %v4501_v38 }
0x1b19   : > { %v2376_v50 = vadd.f32 %v2373_v17, %v2368_v32 }
0x1b1b   : > { %v4603_v35 = vsub.f32 %v2405_v41, %v2376_v50  ;;  %v2395_v42 = vpop.permute.xlu0 %2394 }
0x1b1c   : > { %v2389_v51 = vpop.permute.xlu1 %2388 }
0x1b1d   : > { %v2391_v45 = vadd.f32 %v2389_v51, %v2385_v61  ;;  %v2417_v37 = vmul.f32 0.2, %v4603_v35 }
0x1b1f   : > { %v2397_v60 = vadd.f32 %v2395_v42, %v2391_v45  ;;  %2431 = vrot.lane.b32.xlu0 %v2417_v37, %s3398_s15  ;;  %v2419_v55 = vpack.c.bf16 %v2417_v37, %v2417_v37 }
0x1b21   : > { %v2399_v47 = vmul.f32 %v3615_v13, %v2397_v60  ;;  %v2421_v62 = vunpack.c.l.bf16 %v2419_v55 }
0x1b23   : > { %v2404_v36 = vadd.f32 %v2866_v48, %v2399_v47  ;;  %v2423_v38 = vsub.f32 %v2417_v37, %v2421_v62  ;;  %v2375_v56 = vpop.permute.xlu0 %2374 }
0x1b24   : > { %v2367_v16 = vpop.permute.xlu1 %2366 }
0x1b25   : > { %v2369_v22 = vadd.f32 %v2367_v16, %v2361_v14  ;;  %2425 = vrot.lane.b32.xlu1 %v2423_v38, %s3397_s1  ;;  %v2406_v54 = vadd.f32 %v2404_v36, %v4509_v34 }
0x1b27   : > { %v2377_v49 = vadd.f32 %v2375_v56, %v2369_v22 }
0x1b29   : > { %v4611_v8 = vsub.f32 %v2406_v54, %v2377_v49 }
0x1b2b   : > { %v2418_v59 = vmul.f32 0.2, %v4611_v8 }
0x1b2d   : > { %2433 = vrot.lane.b32.xlu1 %v2418_v59, %s3398_s15  ;;  %v2420_v2 = vpack.c.bf16 %v2418_v59, %v2418_v59 }
0x1b2f   : > { %v2422_v13 = vunpack.c.l.bf16 %v2420_v2  ;;  %v4763_v2 = vld [vmem:[#allocation18_spill] sm:$0xff] }
0x1b31   : > { %v2424_v20 = vsub.f32 %v2418_v59, %v2422_v13  ;;  %v1377_v13 = vmul.f32 %v3597_v5, %v4763_v2 }
0x1b33   : > { %2427 = vrot.lane.b32.xlu2 %v2424_v20, %s3397_s1  ;;  %v4764_v20 = vld [vmem:[#allocation15_spill] sm:$0xff] }
0x1b8d   : > { %v2428_v18 = vpop.permute.xlu2 %2427 }
0x1b8e   : > { %v2430_v39 = vadd.f32 %v2428_v18, %v2418_v59  ;;  %v4765_v18 = vld [vmem:[#allocation16_spill] sm:$0xff] }
0x1b91   : > { %v2432_v57 = vpop.permute.xlu0 %2431 }
0x1b97   : > { %v2426_v25 = vpop.permute.xlu1 %2425 }
0x1b98   : > { %v2429_v6 = vadd.f32 %v2426_v25, %v2417_v37  ;;  %v861_v25 = vmul.f32 %v3597_v5, %v4764_v20 }
0x1b9a   : > { %v2435_v1 = vadd.f32 %v2432_v57, %v2429_v6  ;;  %v1119_v6 = vmul.f32 %v3597_v5, %v4765_v18 }
0x1b9f   : > { %v2434_v33 = vpop.permute.xlu1 %2433 }
0x1ba0   : > { %v2436_v34 = vadd.f32 %v2434_v33, %v2430_v39  ;;  %v4766_v39 = vld [vmem:[#allocation17_spill] sm:$0xff]  ;;  %v4767_v33 = vld [vmem:[#allocation19_spill] sm:$0xff] }
0x1ba1   : > { %v1120_v57 = vmul.f32 %v3597_v5, %v4766_v39 }
0x1ba2   : > { %v2437_v19 = vpack.c.bf16 %v2436_v34, %v2435_v1  ;;  %v1378_v1 = vmul.f32 %v3597_v5, %v4767_v33  ;;  %v2151_v34 = vmul.f32 %v3597_v5, %v4465_v40  ;;  %v2152_v40 = vmul.f32 %v3597_v5, %v4477_v21 }
0x1ba4   : > { %2446 = vmatmul.bf16.vlgmr.msrb.gmra.mxu1 %v2437_v19  ;;  %v4768_v19 = vld [vmem:[#allocation20_spill] sm:$0xff] }
0x1c21   : > { %v2447_v12 = vpop.f32.mrf.mxu1 }
0x1c22   : > { %v2448_v53 = vadd.f32 %v4415_v29, %v2447_v12  ;;  %v1635_v12 = vmul.f32 %v3597_v5, %v4768_v19 }
0x1c24   : > { %3138 = vtanh.f32 %v2448_v53  ;;  %v2410_v53 = vmul.f32 %v3597_v5, %v4579_v11 }
0x1c29   : > { %v2449_v27 = vpop.f32.mrf.mxu1 }
0x1c2a   : > { %v3139_v0 = vpop.eup %3138  ;;  %v2450_v28 = vadd.f32 %v4415_v29, %v2449_v27  ;;  %v1894_v27 = vmul.f32 %v3597_v5, %v4367_v46 }
0x1c2b   : > { %2466 = vrot.lane.b32.xlu1 %v3139_v0, %s3398_s15  ;;  %v2454_v7 = vpack.c.bf16 %v3139_v0, %v3139_v0 }
0x1c2c   : > { %3140 = vtanh.f32 %v2450_v28 }
0x1c2d   : > { %v2456_v30 = vunpack.c.l.bf16 %v2454_v7 }
0x1c2f   : > { %v2458_v31 = vsub.f32 %v3139_v0, %v2456_v30 }
0x1c31   : > { %2460 = vrot.lane.b32.xlu2 %v2458_v31, %s3397_s1 }
0x1c32   : > { %v3141_v44 = vpop.eup %3140 }
0x1c33   : > { %v2455_v32 = vpack.c.bf16 %v3141_v44, %v3141_v44 }
0x1c35   : > { %v2457_v17 = vunpack.c.l.bf16 %v2455_v32 }
0x1c37   : > { %v2459_v41 = vsub.f32 %v3141_v44, %v2457_v17 }
0x1c39   : > { %2462 = vrot.lane.b32.xlu0 %v2459_v41, %s3397_s1  ;;  %2468 = vrot.lane.b32.xlu2 %v3141_v44, %s3398_s15 }
0x1c8b   : > { %v2461_v50 = vpop.permute.xlu2 %2460 }
0x1c8c   : > { %v2464_v29 = vadd.f32 %v3139_v0, %v2461_v50  ;;  %v2532_v50 = vmul.f32 %v3595_v4, %v4603_v35 }
0x1c93   : > { %v2469_v45 = vpop.permute.xlu2 %2468 }
0x1c9d   : > { %v2467_v61 = vpop.permute.xlu1 %2466 }
0x1c9e   : > { %v2470_v37 = vadd.f32 %v2467_v61, %v2464_v29 }
0x1cab   : > { %v2463_v51 = vpop.permute.xlu0 %2462 }
0x1cac   : > { %v2465_v42 = vadd.f32 %v3141_v44, %v2463_v51 }
0x1cae   : > { %v2471_v60 = vadd.f32 %v2469_v45, %v2465_v42 }
0x1cb0   : > { %v2472_v55 = vpack.c.bf16 %v2471_v60, %v2470_v37 }
0x1cb2   : > { %2481 = vmatmul.bf16.vlgmr.msrb.gmra.mxu2 %v2472_v55  ;;  %v2533_v55 = vmul.f32 %v3595_v4, %v4611_v8 }
0x1d35   : > { %v2482_v48 = vpop.f32.mrf.mxu2 }
0x1d36   : > { %v2483_v47 = vadd.f32 %v4426_v58, %v2482_v48 }
0x1d38   : > { %3142 = vtanh.f32 %v2483_v47 }
0x1d3d   : > { %v2484_v62 = vpop.f32.mrf.mxu2 }
0x1d3e   : > { %v3143_v14 = vpop.eup %3142  ;;  %v2485_v36 = vadd.f32 %v4426_v58, %v2484_v62  ;;  %v862_v58 = vmul.f32 %v3597_v5, %v3825_v52  ;;  %v1636_v52 = vmul.f32 %v3597_v5, %v4246_v43  ;;  %v1893_v43 = vmul.f32 %v3597_v5, %v4350_v24 }
0x1d3f   : > { %2501 = vrot.lane.b32.xlu2 %v3143_v14, %s3398_s15  ;;  %v2489_v38 = vpack.c.bf16 %v3143_v14, %v3143_v14  ;;  %v2409_v24 = vmul.f32 %v3597_v5, %v4567_v26 }
0x1d40   : > { %3144 = vtanh.f32 %v2485_v36 }
0x1d41   : > { %v2491_v16 = vunpack.c.l.bf16 %v2489_v38 }
0x1d43   : > { %v2493_v22 = vsub.f32 %v3143_v14, %v2491_v16 }
0x1d45   : > { %2495 = vrot.lane.b32.xlu0 %v2493_v22, %s3397_s1 }
0x1d46   : > { %v3145_v56 = vpop.eup %3144 }
0x1d47   : > { %2538 = vrot.lane.b32.xlu2 %v4611_v8, %s3400_s27  ;;  %v2490_v54 = vpack.c.bf16 %v3145_v56, %v3145_v56 }
0x1d49   : > { %v2492_v49 = vunpack.c.l.bf16 %v2490_v54 }
0x1d4b   : > { %v2494_v59 = vsub.f32 %v3145_v56, %v2492_v49 }
0x1d4d   : > { %2497 = vrot.lane.b32.xlu1 %v2494_v59, %s3397_s1  ;;  %2503 = vrot.lane.b32.xlu0 %v3145_v56, %s3398_s15  ;;  %s3406_s1 = smov 122   ;;  %s3407_s15 = smov 121  }
0x1d4f   : > { %2552 = vrot.lane.b32.xlu2 %v4603_v35, %s3401_s28 }
0x1d55   : > { %2536 = vrot.lane.b32.xlu1 %v4603_v35, %s3400_s27  ;;  %2544 = vrot.lane.b32.xlu0 %v4603_v35, %s3399_s24  ;;  %s3409_s27 = smov 124  }
0x1d57   : > { %865 = vrot.lane.b32.xlu2 %v862_v58, %s3405_s5 }
0x1d5d   : > { %2546 = vrot.lane.b32.xlu1 %v4611_v8, %s3399_s24  ;;  %2554 = vrot.lane.b32.xlu0 %v4611_v8, %s3401_s28  ;;  %s3408_s24 = smov 123   ;;  %s3333_s28 = scalar_lea.hbm %s4738_s9, 32 }
0x1d5f   : > { %1379 = vrot.lane.b32.xlu2 %v1377_v13, %s3406_s1 }
0x1d65   : > { %863 = vrot.lane.b32.xlu1 %v861_v25, %s3405_s5  ;;  %1121 = vrot.lane.b32.xlu0 %v1119_v6, %s3407_s15 }
0x1d67   : > { %1639 = vrot.lane.b32.xlu2 %v1636_v52, %s3408_s24 }
0x1d6d   : > { %1123 = vrot.lane.b32.xlu1 %v1120_v57, %s3407_s15  ;;  %1381 = vrot.lane.b32.xlu0 %v1378_v1, %s3406_s1 }
0x1d6f   : > { %2153 = vrot.lane.b32.xlu2 %v2151_v34, %s3404_s14 }
0x1d75   : > { %1637 = vrot.lane.b32.xlu1 %v1635_v12, %s3408_s24  ;;  %1895 = vrot.lane.b32.xlu0 %v1893_v43, %s3409_s27 }
0x1d77   : > { %2413 = vrot.lane.b32.xlu2 %v2410_v53, %s3402_s22 }
0x1d7d   : > { %1897 = vrot.lane.b32.xlu1 %v1894_v27, %s3409_s27  ;;  %2155 = vrot.lane.b32.xlu0 %v2152_v40, %s3404_s14  ;;  %s2897_s14 = sshll.u32 %s3483_s13, 4  ;;  %s2619_s13 = scalar_lea.sflag [#allocation4], %s3573_s18 }
0x1d7e   : > { %s2630_s3 = scalar_lea.hbm %s4738_s9, %s2897_s14 }
0x1d7f   : > { %s2633_s5 = sshll.u32 %s2630_s3, 4  ;;  %s2634_s5 = int_to_ptr.hbm [resolvable:$true] %s2633_s5 }
0x1d80   : > { %s3327_s1 = sshra.s32 %s2634_s5, 4  ;;  %s3328_s1 = int_to_ptr.hbm [resolvable:$true] %s3327_s1 }
0x1d81   : > { %s3329_s15 = scalar_lea.hbm %s3328_s1, 16  ;;  %p3334_p11 = scmp.lt.s32.totalorder %s3328_s1, %s4738_s9 }
0x1d82   : > { %p3330_p1 = scmp.ne.s32.totalorder %s3328_s1, %s3329_s15  ;;  %p3335_p9 = scmp.lt.s32.totalorder %s3333_s28, %s3329_s15 }
0x1d84   : > { %p3331_p4 = pnand %p3330_p1, %p3545_p7  ;;  %p3336_p2 = por %p3335_p9, %p3334_p11 }
0x1d85   : > { %2411 = vrot.lane.b32.xlu1 %v2409_v24, %s3402_s22 }
0x1d86   : > { %p3332_p8 = pneg %p3331_p4 }
0x1d88   : > { %p3337_p10 = pnand %p3336_p2, %p3332_p8 }
0x1d99   : > { %v2502_v30 = vpop.permute.xlu2 %2501 }
0x1da1   : > { %v2539_v17 = vpop.permute.xlu2 %2538 }
0x1da2   : > { %v2541_v37 = vmul.f32 %v3617_v15, %v2539_v17 }
0x1da4   : > { %v2543_v62 = vadd.f32 %v2541_v37, %v2533_v55 }
0x1da9   : > { %v2553_v29 = vpop.permute.xlu2 %2552 }
0x1daa   : > { %v2556_v60 = vmul.f32 %v3607_v10, %v2553_v29 }
0x1db7   : > { %v2496_v0 = vpop.permute.xlu0 %2495 }
0x1db8   : > { %v2499_v28 = vadd.f32 %v3143_v14, %v2496_v0  ;;  %v3192_v0 = vld [vmem:[%s4737_s8] ss:$0 sm:$0xff] }
0x1dba   : > { %v2505_v44 = vadd.f32 %v2502_v30, %v2499_v28 }
0x1dbf   : > { %v2498_v7 = vpop.permute.xlu1 %2497  ;;  %v2504_v31 = vpop.permute.xlu0 %2503 }
0x1dc0   : > { %v2500_v11 = vadd.f32 %v3145_v56, %v2498_v7 }
0x1dc2   : > { %v2506_v32 = vadd.f32 %v2504_v31, %v2500_v11 }
0x1dc4   : > { %v2507_v46 = vpack.c.bf16 %v2506_v32, %v2505_v44 }
0x1dc6   : > { %2516 = vmatmul.bf16.vlgmr.msrb.gmra.mxu3 %v2507_v46 }
0x1dc7   : > { %v2537_v21 = vpop.permute.xlu1 %2536  ;;  %v2545_v26 = vpop.permute.xlu0 %2544 }
0x1dc8   : > { %v2540_v41 = vmul.f32 %v3617_v15, %v2537_v21  ;;  %v2548_v51 = vmul.f32 %v3604_v9, %v2545_v26 }
0x1dca   : > { %v2542_v61 = vadd.f32 %v2540_v41, %v2532_v50 }
0x1dcc   : > { %v2550_v42 = vadd.f32 %v2548_v51, %v2542_v61 }
0x1dce   : > { %v2558_v48 = vadd.f32 %v2556_v60, %v2550_v42 }
0x1dcf   : > { %v2547_v45 = vpop.permute.xlu1 %2546  ;;  %v2555_v14 = vpop.permute.xlu0 %2554 }
0x1dd0   : > { %v2549_v47 = vmul.f32 %v3604_v9, %v2547_v45  ;;  %v2560_v35 = vsub.f32 %v2558_v48, %v4550_v63  ;;  %v2557_v38 = vmul.f32 %v3607_v10, %v2555_v14 }
0x1dd2   : > { %v2551_v36 = vadd.f32 %v2549_v47, %v2543_v62  ;;  %v2562_v16 = vmax.f32 %v2560_v35, 0.0 }
0x1dd4   : > { %v2559_v22 = vadd.f32 %v2557_v38, %v2551_v36  ;;  %v2564_v56 = vmul.f32 19.6, %v2562_v16 }
0x1dd6   : > { %v2561_v15 = vsub.f32 %v2559_v22, %v4550_v63  ;;  %3146 = vrsqrt.f32 %v2564_v56  ;;  %vm2573_vm8 = vcmp.eq.f32.partialorder %v2564_v56, inf  ;;  %v2576_v27 = vand.u32 2147483648, %v2564_v56 }
0x1dd7   : > { %vm2575_vm9 = vcmp.eq.f32.partialorder %v2564_v56, 0.0  ;;  %v864_v36 = vpop.permute.xlu1 %863  ;;  %v1122_v38 = vpop.permute.xlu0 %1121 }
0x1dd8   : > { %v2563_v54 = vmax.f32 %v2561_v15, 0.0 }
0x1dda   : > { %v2565_v49 = vmul.f32 19.6, %v2563_v54  ;;  %v2593_v50 = vmul.f32 %v3192_v0, %v2563_v54 }
0x1ddc   : > { %v3147_v59 = vpop.eup %3146  ;;  %3148 = vrsqrt.f32 %v2565_v49  ;;  %vm2585_vm10 = vcmp.eq.f32.partialorder %v2565_v49, inf  ;;  %v2588_v17 = vand.u32 2147483648, %v2565_v49  ;;  %vm2587_vm11 = vcmp.eq.f32.partialorder %v2565_v49, 0.0 }
0x1ddd   : > { %v2567_v4 = vmul.f32 %v3147_v59, %v2564_v56 }
0x1ddf   : > { %v2568_v8 = vmul.f32 %v3147_v59, %v2567_v4  ;;  %v1124_v22 = vpop.permute.xlu1 %1123 }
0x1de1   : > { %v2569_v58 = vmul.f32 0.5, %v2568_v8 }
0x1de2   : > { %v3149_v9 = vpop.eup %3148 }
0x1de3   : > { %v2579_v2 = vmul.f32 %v3149_v9, %v2565_v49  ;;  %v2570_v25 = vsub.f32 1.5, %v2569_v58 }
0x1de5   : > { %v2580_v10 = vmul.f32 %v3149_v9, %v2579_v2  ;;  %v2571_v6 = vmul.f32 %v3147_v59, %v2570_v25  ;;  %v1125_v59 = vadd.f32 %v1122_v38, %v864_v36 }
0x1de7   : > { %v2581_v52 = vmul.f32 0.5, %v2580_v10  ;;  %v2572_v57 = vmul.f32 %v2571_v6, %v2564_v56  ;;  %v1638_v54 = vpop.permute.xlu1 %1637 }
0x1de9   : > { %v2582_v33 = vsub.f32 1.5, %v2581_v52  ;;  %v2574_v43 = vsel %vm2573_vm8, %v2564_v56, %v2572_v57  ;;  %v1382_v56 = vpop.permute.xlu0 %1381 }
0x1dea   : > { %v2577_v24 = vsel %vm2575_vm9, %v2576_v27, %v2574_v43 }
0x1deb   : > { %v2583_v53 = vmul.f32 %v3149_v9, %v2582_v33 }
0x1ded   : > { %v2584_v7 = vmul.f32 %v2583_v53, %v2565_v49 }
0x1def   : > { %v2586_v46 = vsel %vm2585_vm10, %v2565_v49, %v2584_v7  ;;  %v1898_v8 = vpop.permute.xlu1 %1897 }
0x1df0   : > { %v2589_v41 = vsel %vm2587_vm11, %v2588_v17, %v2586_v46 }
0x1df1   : > { %v1896_v49 = vpop.permute.xlu0 %1895 }
0x1df7   : > { %v2412_v10 = vpop.permute.xlu1 %2411 }
0x1e49   : > { %v2517_v13 = vpop.f32.mrf.mxu3 }
0x1e4a   : > { %v2518_v20 = vadd.f32 %v4558_v23, %v2517_v13  ;;  %v2156_v13 = vpop.permute.xlu0 %2155 }
0x1e4c   : > { %v2522_v18 = vmul.f32 0.5, %v2518_v20 }
0x1e4e   : > { %3150 = vtanh.f32 %v2522_v18 }
0x1e51   : > { %v2519_v63 = vpop.f32.mrf.mxu3 }
0x1e52   : > { %v2520_v39 = vadd.f32 %v4558_v23, %v2519_v63  ;;  %v2592_v23 = vmul.f32 %v3192_v0, %v2562_v16  ;;  %v866_v16 = vpop.permute.xlu2 %865 }
0x1e53   : > { %v1126_v58 = vadd.f32 %v1124_v22, %v866_v16 }
0x1e54   : > { %v3151_v1 = vpop.eup %3150  ;;  %v2523_v34 = vmul.f32 0.5, %v2520_v39 }
0x1e55   : > { %v2526_v19 = vadd.f32 1.0, %v3151_v1 }
0x1e56   : > { %3152 = vtanh.f32 %v2523_v34 }
0x1e57   : > { %v2528_v12 = vmul.f32 0.5, %v2526_v19 }
0x1e59   : > { %v2530_v40 = vmul.f32 %v3592_v3, %v2528_v12 }
0x1e5a   : > { %v1380_v15 = vpop.permute.xlu2 %1379 }
0x1e5b   : > { %v2590_v28 = vmul.f32 %v2577_v24, %v2530_v40  ;;  %v1383_v9 = vadd.f32 %v1380_v15, %v1125_v59 }
0x1e5c   : > { %v3153_v11 = vpop.eup %3152 }
0x1e5d   : > { %v2594_v30 = vsub.f32 %v2592_v23, %v2590_v28  ;;  %v2527_v31 = vadd.f32 1.0, %v3153_v11  ;;  %v1641_v2 = vadd.f32 %v1638_v54, %v1383_v9 }
0x1e5f   : > { %v2596_v44 = vmul.f32 0.5, %v2594_v30  ;;  %v2529_v32 = vmul.f32 0.5, %v2527_v31  ;;  %v1899_v20 = vadd.f32 %v1896_v49, %v1641_v2 }
0x1e61   : > { %3154 = vtanh.f32 %v2596_v44  ;;  %v2531_v21 = vmul.f32 %v3592_v3, %v2529_v32 }
0x1e62   : > { %v1640_v4 = vpop.permute.xlu2 %1639 }
0x1e63   : > { %v2591_v26 = vmul.f32 %v2589_v41, %v2531_v21 }
0x1e65   : > { %v2595_v61 = vsub.f32 %v2593_v50, %v2591_v26 }
0x1e67   : > { %v3155_v51 = vpop.eup %3154  ;;  %v2597_v29 = vmul.f32 0.5, %v2595_v61 }
0x1e68   : > { %v2600_v42 = vadd.f32 1.0, %v3155_v51 }
0x1e69   : > { %3156 = vtanh.f32 %v2597_v29 }
0x1e6a   : > { %v2602_v45 = vmul.f32 0.5, %v2600_v42  ;;  %v2154_v25 = vpop.permute.xlu2 %2153 }
0x1e6b   : > { %v2157_v6 = vadd.f32 %v2154_v25, %v1899_v20 }
0x1e6c   : > { %v2604_v37 = vmul.f32 %v2602_v45, %v2590_v28 }
0x1e6d   : > { %v2415_v63 = vadd.f32 %v2412_v10, %v2157_v6 }
0x1e6e   : > { %v2606_v60 = vmul.f32 %v3192_v0, %v2604_v37 }
0x1e6f   : > { %v3157_v55 = vpop.eup %3156 }
0x1e70   : > { %v2601_v48 = vadd.f32 1.0, %v3157_v55  ;;  %v2608_v47 = vmul.f32 %v3597_v5, %v2606_v60 }
0x1e72   : > { %v2603_v62 = vmul.f32 0.5, %v2601_v48  ;;  %2610 = vrot.lane.b32.xlu0 %v2608_v47, %s3403_s29  ;;  %v2414_v1 = vpop.permute.xlu2 %2413 }
0x1e74   : > { %v2605_v3 = vmul.f32 %v2603_v62, %v2591_v26 }
0x1e76   : > { %v2607_v14 = vmul.f32 %v3192_v0, %v2605_v3 }
0x1e78   : > { %v2609_v35 = vmul.f32 %v3597_v5, %v2607_v14  ;;  %v1384_v5 = vadd.f32 %v1382_v56, %v1126_v58 }
0x1e7a   : > { %2612 = vrot.lane.b32.xlu1 %v2609_v35, %s3403_s29  ;;  %v1642_v18 = vadd.f32 %v1640_v4, %v1384_v5  ;;  %s2750_s29 = sshll.u32 %s3573_s18, 4 }
0x1e7b   : > { %s402_s20 = scalar_lea.vmem [#allocation10], %s2750_s29 }
0x1e7c   : > { %v1900_v52 = vadd.f32 %v1898_v8, %v1642_v18  ;;  %s2631_s21 = sshll.u32 %s402_s20, 4  ;;  %s2632_s21 = int_to_ptr.vmem [resolvable:$true] %s2631_s21 }
0x1e7e   : > { %v2158_v33 = vadd.f32 %v2156_v13, %v1900_v52 }
0x1e80   : > { %v2416_v34 = vadd.f32 %v2414_v1, %v2158_v33 }
0x1ee4   : > { %v2611_v39 = vpop.permute.xlu0 %2610 }
0x1ee5   : > { %v2614_v57 = vadd.f32 %v2611_v39, %v2415_v63 }
0x1ee7   : > { %2616 = vst [vmem:[%s402_s20] sm:$0xff] %v2614_v57 }
0x1eec   : > { %v2613_v19 = vpop.permute.xlu1 %2612 }
0x1eed   : > { %v2615_v12 = vadd.f32 %v2613_v19, %v2416_v34 }
0x1eef   : > { %2617 = vst [vmem:[%s402_s20 + $0x8] sm:$0xff] %v2615_v12 }
0x1ef0   : > { %3340 = shalt.err (!%p3337_p10)
}
0x1ef1   : > { %s3410_s18 = smov 128   ;;  %s3411_s14 = smov 8  }
0x1ef2   : > { %2912 = dma.vmem_to_hbm [thread:$0]  (%p3545_p7), %s2632_s21, 256, %s2634_s5, %s2619_s13, %s3410_s18, %s3410_s18, %s3411_s14  }
0x1ef3 PF: > { %s2648_s25 = sand.u32 1, %s3375_s30   ;;  %p4769_p12 = scmp.ge.s32.totalorder %s3387_s12, 2 }
0x1ef4   : > { %s2649_s23 = scalar_lea.sflag [#allocation4], %s2648_s25 }
0x1ef5   : > { %p2929_p13 = pnand %p4769_p12, %p3497_p6 }
0x1ef7   : > { %p2930_p0 = pneg %p2929_p13 }
0x1ef9   : > { %3370 = dma.done.wait (%p2930_p0), %s2649_s23, 256  }
0x1efa   : > { %3372 = vsyncadd (%p2930_p0), %s2649_s23, 4294967040  ;;  %p24_p3 = scmp.ge.s32.totalorder %s3529_s19, 4   ;;  %s4770_s30 = smov %s3379_s10 }
0x1efb   : > { %s4771_s10 = smov %s3383_s11  ;;  %s4772_s11 = smov %s3541_s17 }
0x1efc   : > { %s4773_s12 = smov %s3529_s19  ;;  %26 = sbr.rel (!%p24_p3) target bundleno = 11 (0xb), region = 119 }
0x1f01   :  { %2655 = vsyncpa [#allocation3], 1 }
0x1f02   :  { %2657 = vsyncpa [#allocation3 + $0x1], 1 }
0x1f03   :  { %2658 = vsyncpa [#allocation6], 1 }
0x1f04   :  { %2659 = vsyncpa [#allocation9], 1 }
0x1f05   :  { %2660 = vsyncpa [#allocation4], 1 }
0x1f06   :  { %2662 = vsyncpa [#allocation4 + $0x1], 1 }

</bundles_post_ra>
